<compile_context>
chip_gen: v6e
topology: v6e:2x2x1
jax: 0.10.0
libtpu: 0.0.40
codegen_flags: <defaults>
</compile_context>

<pallas_src>
import functools

import jax
import jax.numpy as jnp
from jax import lax
from jax.experimental import pallas as pl
from jax.experimental.pallas import tpu as pltpu

C = 256          # fixed by the module definition (Conv2d(256, 256, ...))
EPS = 1e-5       # BatchNorm2d default eps


def _pick_batch_block(n, h, w):
  """Largest per-step batch that still leaves >= min(n, 4) grid steps.

  Several grid steps (a) let dimension_semantics=("parallel",) shard the batch
  across both v7x TensorCores and (b) keep BlockSpec double-buffering primed.
  Batch is only fused into the matmul M dimension once that is satisfied, and
  the per-step row count is capped so the f32 (M, 3C) lhs stays small in VMEM.
  """
  min_steps = min(n, 4)
  best = 1
  for nb in range(1, n + 1):
    if n % nb:
      continue
    if n // nb < min_steps:
      break
    if nb * h * w > 2048:
      break
    best = nb
  return best


def _conv3x3_k768(src, w_ref, acc_ref, *, width, left_ok, right_ok, top_ok,
                  bot_ok):
  """3x3 'SAME' conv as 3 MXU matmuls with K = 3*C (kw fused into K).

  src     : (M, C) f32 activations, rows in (batch, y, x) row-major order.
  w_ref   : (3, 3C, C) bf16 folded weights; axis 0 = kh, axis 1 = (kw, c_in).
  acc_ref : (M, C) f32 VMEM accumulator (overwritten, then read by caller).

  The x-1 / x / x+1 source columns are built with pltpu.roll (XLU) on the flat
  row slab; rows whose source column falls outside the image are zeroed by the
  precomputed left/right masks (exactly reproducing zero padding). The kh
  shifts are whole-image-row rolls of the concatenated (M, 3C) base; rows
  whose source row is outside the image are zeroed on the matmul *output*
  (top/bot masks), which is equivalent and 3x cheaper than masking the lhs.
  """
  m = src.shape[0]
  a0 = pltpu.roll(src, 1, axis=0) * left_ok          # source column x-1
  a2 = pltpu.roll(src, m - 1, axis=0) * right_ok     # source column x+1
  lhs_base = jnp.concatenate([a0, src, a2], axis=-1)  # (M, 3C) f32

  taps = ((0, width % m, top_ok),        # kh=0 : source row y-1
          (1, 0, None),                  # kh=1 : source row y
          (2, (m - width) % m, bot_ok))  # kh=2 : source row y+1
  for kh, shift, mask in taps:
    lhs = lhs_base if shift == 0 else pltpu.roll(lhs_base, shift, axis=0)
    contrib = jnp.dot(lhs.astype(jnp.bfloat16), w_ref[kh],
                      preferred_element_type=jnp.float32)
    if mask is not None:
      contrib = contrib * mask
    if kh == 0:
      acc_ref[...] = contrib
    else:
      acc_ref[...] += contrib


def residual_block_kernel(x_ref, w1_ref, w2_ref, b1_ref, b2_ref,
                          left_ref, right_ref, top_ref, bot_ref,
                          out_ref, acc_ref, *, width):
  """One grid step = NB images flattened to an (M, C) row-major slab.

  x_ref        : (M, C) f32      input rows (also the residual shortcut)
  w1/w2_ref    : (3, 3C, C) bf16 conv weights with the BN scale folded in
  b1/b2_ref    : (1, C) f32      folded BN bias (conv bias folded in)
  left/right/top/bot_ref : (M, 1) f32  edge-validity masks (1 keep, 0 zero)
  out_ref      : (M, C)
  acc_ref      : VMEM (M, C) f32 matmul accumulator
  """
  x = x_ref[...]                                     # f32, also used for +skip
  masks = dict(left_ok=left_ref[...], right_ok=right_ref[...],
               top_ok=top_ref[...], bot_ok=bot_ref[...])

  # conv1 (BN1 scale folded) -> folded bias -> ReLU
  _conv3x3_k768(x, w1_ref, acc_ref, width=width, **masks)
  h1 = jnp.maximum(acc_ref[...] + b1_ref[...], 0.0)

  # conv2 (BN2 folded) -> folded bias -> +shortcut (f32 x) -> ReLU
  _conv3x3_k768(h1, w2_ref, acc_ref, width=width, **masks)
  y = acc_ref[...] + b2_ref[...] + x
  out_ref[...] = jnp.maximum(y, 0.0).astype(out_ref.dtype)


def _edge_masks(nb, h, w):
  """(nb*h*w, 1) f32 validity masks for the four image borders."""
  idx = jnp.arange(h * w, dtype=jnp.int32)
  col, row = idx % w, idx // w

  def expand(keep):
    return jnp.tile(keep.astype(jnp.float32), nb).reshape(nb * h * w, 1)

  return (expand(col != 0), expand(col != w - 1),
          expand(row != 0), expand(row != h - 1))


def residual_block_nhwc(x_nhwc, w1_k, w2_k, b1, b2):
  """x_nhwc: (N,H,W,C) f32; w*_k: (3, 3C, C) bf16 (BN folded); b*: (C,) f32."""
  n, h, w, c = x_nhwc.shape
  nb = _pick_batch_block(n, h, w)
  m = nb * h * w
  # TODO(synk): shapes with (nb*h*w) % 8 != 0 would need a tail/ragged block.
  assert m % 8 == 0, "per-step row count must be sublane (8) aligned"

  x_rows = x_nhwc.reshape(n * h * w, c)     # free: fuses with ingress transpose
  b1 = b1.reshape(1, c).astype(jnp.float32)
  b2 = b2.reshape(1, c).astype(jnp.float32)
  left_ok, right_ok, top_ok, bot_ok = _edge_masks(nb, h, w)

  flops = 2 * 2 * 9 * n * h * w * c * c
  bytes_accessed = (2 * x_rows.size * x_rows.dtype.itemsize
                    + w1_k.size * 2 + w2_k.size * 2 + 2 * c * 4)

  row_spec = pl.BlockSpec((m, c), lambda b: (b, 0))
  w_spec = pl.BlockSpec((3, 3 * c, c), lambda b: (0, 0, 0))
  vec_spec = pl.BlockSpec((1, c), lambda b: (0, 0))
  mask_spec = pl.BlockSpec((m, 1), lambda b: (0, 0))

  out_rows = pl.pallas_call(
      functools.partial(residual_block_kernel, width=w),
      out_shape=jax.ShapeDtypeStruct((n * h * w, c), x_nhwc.dtype),
      grid_spec=pltpu.PrefetchScalarGridSpec(
          num_scalar_prefetch=0,
          grid=(n // nb,),
          in_specs=[row_spec, w_spec, w_spec, vec_spec, vec_spec,
                    mask_spec, mask_spec, mask_spec, mask_spec],
          out_specs=row_spec,
          scratch_shapes=[pltpu.VMEM((m, c), jnp.float32)],
      ),
      compiler_params=pltpu.CompilerParams(
          dimension_semantics=("parallel",),        # batch chunks independent
          vmem_limit_bytes=48 * 1024 * 1024,        # well under v7x's 64 MiB
      ),
      cost_estimate=pl.CostEstimate(
          flops=flops, transcendentals=0, bytes_accessed=bytes_accessed),
  )(x_rows, w1_k, w2_k, b1, b2, left_ok, right_ok, top_ok, bot_ok)
  return out_rows.reshape(n, h, w, c)


@jax.jit
def residual_block_nchw(x_nchw, params):
  """PyTorch-facing wrapper: NCHW in, NCHW out.

  Note: these two transposes are full HBM round-trips; in a real model keep
  activations NHWC across layers and call residual_block_nhwc directly.
  """
  x_nhwc = jnp.transpose(x_nchw, (0, 2, 3, 1))
  out = residual_block_nhwc(x_nhwc, params["w1"], params["w2"],
                            params["b1"], params["b2"])
  return jnp.transpose(out, (0, 3, 1, 2))


def fold_bn_into_conv(w_hwio, conv_bias, gamma, beta, mean, var):
  """Fold eval-mode BN (and the conv bias) into the conv weights + a bias."""
  scale = gamma / jnp.sqrt(var + EPS)               # (C,)
  w_folded = w_hwio * scale                         # HWIO: scales output chans
  b_folded = beta + (conv_bias - mean) * scale
  return w_folded, b_folded


def make_params(key):
  ks = jax.random.split(key, 12)
  # PyTorch Conv2d weight layout: (out, in, kh, kw); convert to HWIO.
  w1_oihw = jax.random.normal(ks[0], (C, C, 3, 3), jnp.float32) * 0.05
  w2_oihw = jax.random.normal(ks[1], (C, C, 3, 3), jnp.float32) * 0.05
  cb1 = jax.random.normal(ks[2], (C,), jnp.float32) * 0.05
  cb2 = jax.random.normal(ks[3], (C,), jnp.float32) * 0.05
  g1 = 1.0 + 0.1 * jax.random.normal(ks[4], (C,), jnp.float32)
  bt1 = 0.1 * jax.random.normal(ks[5], (C,), jnp.float32)
  m1 = 0.1 * jax.random.normal(ks[6], (C,), jnp.float32)
  v1 = 1.0 + 0.1 * jax.nn.softplus(jax.random.normal(ks[7], (C,), jnp.float32))
  g2 = 1.0 + 0.1 * jax.random.normal(ks[8], (C,), jnp.float32)
  bt2 = 0.1 * jax.random.normal(ks[9], (C,), jnp.float32)
  m2 = 0.1 * jax.random.normal(ks[10], (C,), jnp.float32)
  v2 = 1.0 + 0.1 * jax.nn.softplus(jax.random.normal(ks[11], (C,), jnp.float32))

  w1_hwio = jnp.transpose(w1_oihw, (2, 3, 1, 0))
  w2_hwio = jnp.transpose(w2_oihw, (2, 3, 1, 0))
  w1f, b1 = fold_bn_into_conv(w1_hwio, cb1, g1, bt1, m1, v1)
  w2f, b2 = fold_bn_into_conv(w2_hwio, cb2, g2, bt2, m2, v2)
  # Kernel weight layout: (kh, kw*C + c_in, c_out) == HWIO reshaped to (3,3C,C)
  params = dict(w1=w1f.reshape(3, 3 * C, C).astype(jnp.bfloat16),
                w2=w2f.reshape(3, 3 * C, C).astype(jnp.bfloat16),
                b1=b1, b2=b2)
  raw = dict(w1_hwio=w1_hwio, w2_hwio=w2_hwio, cb1=cb1, cb2=cb2,
             g1=g1, bt1=bt1, m1=m1, v1=v1, g2=g2, bt2=bt2, m2=m2, v2=v2)
  return params, raw


def reference_nchw(x_nchw, raw):
  """Pure-JAX f32 reference matching the PyTorch module (eval-mode BN)."""
  x = jnp.transpose(x_nchw, (0, 2, 3, 1))
  dn = ("NHWC", "HWIO", "NHWC")
  hp = lax.Precision.HIGHEST
  y = lax.conv_general_dilated(x, raw["w1_hwio"], (1, 1), "SAME",
                               dimension_numbers=dn, precision=hp) + raw["cb1"]
  y = (y - raw["m1"]) / jnp.sqrt(raw["v1"] + EPS) * raw["g1"] + raw["bt1"]
  y = jnp.maximum(y, 0.0)
  y = lax.conv_general_dilated(y, raw["w2_hwio"], (1, 1), "SAME",
                               dimension_numbers=dn, precision=hp) + raw["cb2"]
  y = (y - raw["m2"]) / jnp.sqrt(raw["v2"] + EPS) * raw["g2"] + raw["bt2"]
  y = jnp.maximum(y + x, 0.0)
  return jnp.transpose(y, (0, 3, 1, 2))


def quantized_reference_nchw(x_nchw, params):
  """Reference with the same bf16 matmul-operand quantization as the kernel."""
  x = jnp.transpose(x_nchw, (0, 2, 3, 1))
  dn = ("NHWC", "HWIO", "NHWC")
  hp = lax.Precision.HIGHEST
  w1 = params["w1"].astype(jnp.float32).reshape(3, 3, C, C)
  w2 = params["w2"].astype(jnp.float32).reshape(3, 3, C, C)
  xq = x.astype(jnp.bfloat16).astype(jnp.float32)
  y = lax.conv_general_dilated(xq, w1, (1, 1), "SAME",
                               dimension_numbers=dn, precision=hp) + params["b1"]
  y = jnp.maximum(y, 0.0)
  yq = y.astype(jnp.bfloat16).astype(jnp.float32)
  y = lax.conv_general_dilated(yq, w2, (1, 1), "SAME",
                               dimension_numbers=dn, precision=hp) + params["b2"]
  y = jnp.maximum(y + x, 0.0)                # residual add uses f32 x (as kernel)
  return jnp.transpose(y, (0, 3, 1, 2))


if __name__ == "__main__":
  key = jax.random.PRNGKey(0)
  k_x, k_p = jax.random.split(key)

  N, H, W = 2, 8, 8                      # small spatial; C fixed at 256
  x = jax.random.normal(k_x, (N, C, H, W), jnp.float32)   # NCHW like PyTorch
  params, raw = make_params(k_p)

  out = residual_block_nchw(x, params)
  out = jax.block_until_ready(out)
  assert out.shape == (N, C, H, W), out.shape

  # Tight check against a reference using the kernel's exact precision policy
  # (bf16 MXU operands, f32 accumulation) -- catches any indexing/logic bug.
  ref_q = quantized_reference_nchw(x, params)
  err_q = float(jnp.max(jnp.abs(out - ref_q)))
  assert err_q < 1e-2, f"mismatch vs bf16-quantized reference: {err_q}"

  # Sanity check against the full-f32 module semantics (tolerance sized for
  # bf16 weights/activations on the MXU).
  ref = reference_nchw(x, raw)
  err = float(jnp.max(jnp.abs(out - ref)))
  assert err < 2.5e-1, f"mismatch vs f32 reference too large: {err}"

  print("KERNEL_OK")
</pallas_src>

<mosaic_0001>
module attributes {stable_mosaic.version = 11 : i64} {
  func.func @residual_block_kernel(%arg0: i32, %arg1: memref<64x256xf32, #tpu.memory_space<vmem>>, %arg2: memref<3x768x256xbf16, #tpu.memory_space<vmem>>, %arg3: memref<3x768x256xbf16, #tpu.memory_space<vmem>>, %arg4: memref<1x256xf32, #tpu.memory_space<vmem>>, %arg5: memref<1x256xf32, #tpu.memory_space<vmem>>, %arg6: memref<64x1xf32, #tpu.memory_space<vmem>>, %arg7: memref<64x1xf32, #tpu.memory_space<vmem>>, %arg8: memref<64x1xf32, #tpu.memory_space<vmem>>, %arg9: memref<64x1xf32, #tpu.memory_space<vmem>>, %arg10: memref<64x256xf32, #tpu.memory_space<vmem>>, %arg11: memref<64x256xf32, #tpu.memory_space<vmem>>) attributes {dimension_semantics = [#tpu.dimension_semantics<parallel>], iteration_bounds = array<i64: 2>, scalar_prefetch = 0 : i64, scratch_operands = 1 : i64, tpu.core_type = #tpu.core_type<tc>, window_params = [{transform_indices = @transform_0, window_bounds = array<i64: 64, 256>}, {pipeline_mode = #tpu.pipeline_mode<synchronous>, transform_indices = @transform_1, window_bounds = array<i64: 3, 768, 256>}, {pipeline_mode = #tpu.pipeline_mode<synchronous>, transform_indices = @transform_2, window_bounds = array<i64: 3, 768, 256>}, {pipeline_mode = #tpu.pipeline_mode<synchronous>, transform_indices = @transform_3, window_bounds = array<i64: 1, 256>}, {pipeline_mode = #tpu.pipeline_mode<synchronous>, transform_indices = @transform_4, window_bounds = array<i64: 1, 256>}, {pipeline_mode = #tpu.pipeline_mode<synchronous>, transform_indices = @transform_5, window_bounds = array<i64: 64, 1>}, {pipeline_mode = #tpu.pipeline_mode<synchronous>, transform_indices = @transform_6, window_bounds = array<i64: 64, 1>}, {pipeline_mode = #tpu.pipeline_mode<synchronous>, transform_indices = @transform_7, window_bounds = array<i64: 64, 1>}, {pipeline_mode = #tpu.pipeline_mode<synchronous>, transform_indices = @transform_8, window_bounds = array<i64: 64, 1>}, {transform_indices = @transform_9, window_bounds = array<i64: 64, 256>}]} {
    %c0 = arith.constant 0 : index
    %c0_0 = arith.constant 0 : index
    %0 = vector.load %arg1[%c0, %c0_0] : memref<64x256xf32, #tpu.memory_space<vmem>>, vector<64x256xf32>
    %c0_1 = arith.constant 0 : index
    %c0_2 = arith.constant 0 : index
    %1 = vector.load %arg6[%c0_1, %c0_2] : memref<64x1xf32, #tpu.memory_space<vmem>>, vector<64x1xf32>
    %c0_3 = arith.constant 0 : index
    %c0_4 = arith.constant 0 : index
    %2 = vector.load %arg7[%c0_3, %c0_4] : memref<64x1xf32, #tpu.memory_space<vmem>>, vector<64x1xf32>
    %c0_5 = arith.constant 0 : index
    %c0_6 = arith.constant 0 : index
    %3 = vector.load %arg8[%c0_5, %c0_6] : memref<64x1xf32, #tpu.memory_space<vmem>>, vector<64x1xf32>
    %c0_7 = arith.constant 0 : index
    %c0_8 = arith.constant 0 : index
    %4 = vector.load %arg9[%c0_7, %c0_8] : memref<64x1xf32, #tpu.memory_space<vmem>>, vector<64x1xf32>
    %c1_i32 = arith.constant 1 : i32
    %5 = tpu.dynamic_rotate %0 by %c1_i32 dim 0 : vector<64x256xf32>, i32 -> vector<64x256xf32>
    %6 = vector.broadcast %1 : vector<64x1xf32> to vector<64x256xf32>
    %7 = arith.mulf %5, %6 : vector<64x256xf32>
    %c63_i32 = arith.constant 63 : i32
    %8 = tpu.dynamic_rotate %0 by %c63_i32 dim 0 : vector<64x256xf32>, i32 -> vector<64x256xf32>
    %9 = vector.broadcast %2 : vector<64x1xf32> to vector<64x256xf32>
    %10 = arith.mulf %8, %9 : vector<64x256xf32>
    %11 = tpu.concatenate %7, %0, %10 in 1 : vector<64x256xf32>, vector<64x256xf32>, vector<64x256xf32> -> vector<64x768xf32>
    %c8_i32 = arith.constant 8 : i32
    %12 = tpu.dynamic_rotate %11 by %c8_i32 dim 0 : vector<64x768xf32>, i32 -> vector<64x768xf32>
    %13 = arith.truncf %12 : vector<64x768xf32> to vector<64x768xbf16>
    %c0_9 = arith.constant 0 : index
    %c0_10 = arith.constant 0 : index
    %c0_11 = arith.constant 0 : index
    %14 = vector.load %arg2[%c0_9, %c0_10, %c0_11] : memref<3x768x256xbf16, #tpu.memory_space<vmem>>, vector<1x768x256xbf16>
    %15 = vector.shape_cast %14 : vector<1x768x256xbf16> to vector<768x256xbf16>
    %cst = arith.constant dense<0.000000e+00> : vector<64x256xf32>
    %16 = tpu.matmul %13, %15, %cst {dimension_numbers = #tpu.dot_dimension_numbers<[1], [0], [0], [1], [0, 0, 1, 1], [], []>} : vector<64x768xbf16>, vector<768x256xbf16>, vector<64x256xf32> -> vector<64x256xf32>
    %17 = vector.broadcast %3 : vector<64x1xf32> to vector<64x256xf32>
    %18 = arith.mulf %16, %17 : vector<64x256xf32>
    %c0_12 = arith.constant 0 : index
    %c0_13 = arith.constant 0 : index
    %19 = vector.load %arg11[%c0_12, %c0_13] : memref<64x256xf32, #tpu.memory_space<vmem>>, vector<64x256xf32>
    tpu.vector_store %arg11[%c0_12, %c0_13], %18 {strides = array<i32>} : memref<64x256xf32, #tpu.memory_space<vmem>>, vector<64x256xf32>,
    %20 = arith.truncf %11 : vector<64x768xf32> to vector<64x768xbf16>
    %c1 = arith.constant 1 : index
    %c0_14 = arith.constant 0 : index
    %c0_15 = arith.constant 0 : index
    %21 = vector.load %arg2[%c1, %c0_14, %c0_15] : memref<3x768x256xbf16, #tpu.memory_space<vmem>>, vector<1x768x256xbf16>
    %22 = vector.shape_cast %21 : vector<1x768x256xbf16> to vector<768x256xbf16>
    %cst_16 = arith.constant dense<0.000000e+00> : vector<64x256xf32>
    %23 = tpu.matmul %20, %22, %cst_16 {dimension_numbers = #tpu.dot_dimension_numbers<[1], [0], [0], [1], [0, 0, 1, 1], [], []>} : vector<64x768xbf16>, vector<768x256xbf16>, vector<64x256xf32> -> vector<64x256xf32>
    %c0_17 = arith.constant 0 : index
    %c0_18 = arith.constant 0 : index
    %24 = vector.load %arg11[%c0_17, %c0_18] : memref<64x256xf32, #tpu.memory_space<vmem>>, vector<64x256xf32>
    %25 = arith.addf %24, %23 : vector<64x256xf32>
    %c0_19 = arith.constant 0 : index
    %c0_20 = arith.constant 0 : index
    %26 = vector.load %arg11[%c0_19, %c0_20] : memref<64x256xf32, #tpu.memory_space<vmem>>, vector<64x256xf32>
    tpu.vector_store %arg11[%c0_19, %c0_20], %25 {strides = array<i32>} : memref<64x256xf32, #tpu.memory_space<vmem>>, vector<64x256xf32>,
    %c56_i32 = arith.constant 56 : i32
    %27 = tpu.dynamic_rotate %11 by %c56_i32 dim 0 : vector<64x768xf32>, i32 -> vector<64x768xf32>
    %28 = arith.truncf %27 : vector<64x768xf32> to vector<64x768xbf16>
    %c2 = arith.constant 2 : index
    %c0_21 = arith.constant 0 : index
    %c0_22 = arith.constant 0 : index
    %29 = vector.load %arg2[%c2, %c0_21, %c0_22] : memref<3x768x256xbf16, #tpu.memory_space<vmem>>, vector<1x768x256xbf16>
    %30 = vector.shape_cast %29 : vector<1x768x256xbf16> to vector<768x256xbf16>
    %cst_23 = arith.constant dense<0.000000e+00> : vector<64x256xf32>
    %31 = tpu.matmul %28, %30, %cst_23 {dimension_numbers = #tpu.dot_dimension_numbers<[1], [0], [0], [1], [0, 0, 1, 1], [], []>} : vector<64x768xbf16>, vector<768x256xbf16>, vector<64x256xf32> -> vector<64x256xf32>
    %32 = vector.broadcast %4 : vector<64x1xf32> to vector<64x256xf32>
    %33 = arith.mulf %31, %32 : vector<64x256xf32>
    %c0_24 = arith.constant 0 : index
    %c0_25 = arith.constant 0 : index
    %34 = vector.load %arg11[%c0_24, %c0_25] : memref<64x256xf32, #tpu.memory_space<vmem>>, vector<64x256xf32>
    %35 = arith.addf %34, %33 : vector<64x256xf32>
    %c0_26 = arith.constant 0 : index
    %c0_27 = arith.constant 0 : index
    %36 = vector.load %arg11[%c0_26, %c0_27] : memref<64x256xf32, #tpu.memory_space<vmem>>, vector<64x256xf32>
    tpu.vector_store %arg11[%c0_26, %c0_27], %35 {strides = array<i32>} : memref<64x256xf32, #tpu.memory_space<vmem>>, vector<64x256xf32>,
    %c0_28 = arith.constant 0 : index
    %c0_29 = arith.constant 0 : index
    %37 = vector.load %arg11[%c0_28, %c0_29] : memref<64x256xf32, #tpu.memory_space<vmem>>, vector<64x256xf32>
    %c0_30 = arith.constant 0 : index
    %c0_31 = arith.constant 0 : index
    %38 = vector.load %arg4[%c0_30, %c0_31] : memref<1x256xf32, #tpu.memory_space<vmem>>, vector<1x256xf32>
    %39 = vector.broadcast %38 : vector<1x256xf32> to vector<64x256xf32>
    %40 = arith.addf %37, %39 : vector<64x256xf32>
    %cst_32 = arith.constant 0.000000e+00 : f32
    %41 = vector.broadcast %cst_32 : f32 to vector<64x256xf32>
    %42 = arith.maximumf %40, %41 : vector<64x256xf32>
    %c1_i32_33 = arith.constant 1 : i32
    %43 = tpu.dynamic_rotate %42 by %c1_i32_33 dim 0 : vector<64x256xf32>, i32 -> vector<64x256xf32>
    %44 = vector.broadcast %1 : vector<64x1xf32> to vector<64x256xf32>
    %45 = arith.mulf %43, %44 : vector<64x256xf32>
    %c63_i32_34 = arith.constant 63 : i32
    %46 = tpu.dynamic_rotate %42 by %c63_i32_34 dim 0 : vector<64x256xf32>, i32 -> vector<64x256xf32>
    %47 = vector.broadcast %2 : vector<64x1xf32> to vector<64x256xf32>
    %48 = arith.mulf %46, %47 : vector<64x256xf32>
    %49 = tpu.concatenate %45, %42, %48 in 1 : vector<64x256xf32>, vector<64x256xf32>, vector<64x256xf32> -> vector<64x768xf32>
    %c8_i32_35 = arith.constant 8 : i32
    %50 = tpu.dynamic_rotate %49 by %c8_i32_35 dim 0 : vector<64x768xf32>, i32 -> vector<64x768xf32>
    %51 = arith.truncf %50 : vector<64x768xf32> to vector<64x768xbf16>
    %c0_36 = arith.constant 0 : index
    %c0_37 = arith.constant 0 : index
    %c0_38 = arith.constant 0 : index
    %52 = vector.load %arg3[%c0_36, %c0_37, %c0_38] : memref<3x768x256xbf16, #tpu.memory_space<vmem>>, vector<1x768x256xbf16>
    %53 = vector.shape_cast %52 : vector<1x768x256xbf16> to vector<768x256xbf16>
    %cst_39 = arith.constant dense<0.000000e+00> : vector<64x256xf32>
    %54 = tpu.matmul %51, %53, %cst_39 {dimension_numbers = #tpu.dot_dimension_numbers<[1], [0], [0], [1], [0, 0, 1, 1], [], []>} : vector<64x768xbf16>, vector<768x256xbf16>, vector<64x256xf32> -> vector<64x256xf32>
    %55 = vector.broadcast %3 : vector<64x1xf32> to vector<64x256xf32>
    %56 = arith.mulf %54, %55 : vector<64x256xf32>
    %c0_40 = arith.constant 0 : index
    %c0_41 = arith.constant 0 : index
    %57 = vector.load %arg11[%c0_40, %c0_41] : memref<64x256xf32, #tpu.memory_space<vmem>>, vector<64x256xf32>
    tpu.vector_store %arg11[%c0_40, %c0_41], %56 {strides = array<i32>} : memref<64x256xf32, #tpu.memory_space<vmem>>, vector<64x256xf32>,
    %58 = arith.truncf %49 : vector<64x768xf32> to vector<64x768xbf16>
    %c1_42 = arith.constant 1 : index
    %c0_43 = arith.constant 0 : index
    %c0_44 = arith.constant 0 : index
    %59 = vector.load %arg3[%c1_42, %c0_43, %c0_44] : memref<3x768x256xbf16, #tpu.memory_space<vmem>>, vector<1x768x256xbf16>
    %60 = vector.shape_cast %59 : vector<1x768x256xbf16> to vector<768x256xbf16>
    %cst_45 = arith.constant dense<0.000000e+00> : vector<64x256xf32>
    %61 = tpu.matmul %58, %60, %cst_45 {dimension_numbers = #tpu.dot_dimension_numbers<[1], [0], [0], [1], [0, 0, 1, 1], [], []>} : vector<64x768xbf16>, vector<768x256xbf16>, vector<64x256xf32> -> vector<64x256xf32>
    %c0_46 = arith.constant 0 : index
    %c0_47 = arith.constant 0 : index
    %62 = vector.load %arg11[%c0_46, %c0_47] : memref<64x256xf32, #tpu.memory_space<vmem>>, vector<64x256xf32>
    %63 = arith.addf %62, %61 : vector<64x256xf32>
    %c0_48 = arith.constant 0 : index
    %c0_49 = arith.constant 0 : index
    %64 = vector.load %arg11[%c0_48, %c0_49] : memref<64x256xf32, #tpu.memory_space<vmem>>, vector<64x256xf32>
    tpu.vector_store %arg11[%c0_48, %c0_49], %63 {strides = array<i32>} : memref<64x256xf32, #tpu.memory_space<vmem>>, vector<64x256xf32>,
    %c56_i32_50 = arith.constant 56 : i32
    %65 = tpu.dynamic_rotate %49 by %c56_i32_50 dim 0 : vector<64x768xf32>, i32 -> vector<64x768xf32>
    %66 = arith.truncf %65 : vector<64x768xf32> to vector<64x768xbf16>
    %c2_51 = arith.constant 2 : index
    %c0_52 = arith.constant 0 : index
    %c0_53 = arith.constant 0 : index
    %67 = vector.load %arg3[%c2_51, %c0_52, %c0_53] : memref<3x768x256xbf16, #tpu.memory_space<vmem>>, vector<1x768x256xbf16>
    %68 = vector.shape_cast %67 : vector<1x768x256xbf16> to vector<768x256xbf16>
    %cst_54 = arith.constant dense<0.000000e+00> : vector<64x256xf32>
    %69 = tpu.matmul %66, %68, %cst_54 {dimension_numbers = #tpu.dot_dimension_numbers<[1], [0], [0], [1], [0, 0, 1, 1], [], []>} : vector<64x768xbf16>, vector<768x256xbf16>, vector<64x256xf32> -> vector<64x256xf32>
    %70 = vector.broadcast %4 : vector<64x1xf32> to vector<64x256xf32>
    %71 = arith.mulf %69, %70 : vector<64x256xf32>
    %c0_55 = arith.constant 0 : index
    %c0_56 = arith.constant 0 : index
    %72 = vector.load %arg11[%c0_55, %c0_56] : memref<64x256xf32, #tpu.memory_space<vmem>>, vector<64x256xf32>
    %73 = arith.addf %72, %71 : vector<64x256xf32>
    %c0_57 = arith.constant 0 : index
    %c0_58 = arith.constant 0 : index
    %74 = vector.load %arg11[%c0_57, %c0_58] : memref<64x256xf32, #tpu.memory_space<vmem>>, vector<64x256xf32>
    tpu.vector_store %arg11[%c0_57, %c0_58], %73 {strides = array<i32>} : memref<64x256xf32, #tpu.memory_space<vmem>>, vector<64x256xf32>,
    %c0_59 = arith.constant 0 : index
    %c0_60 = arith.constant 0 : index
    %75 = vector.load %arg11[%c0_59, %c0_60] : memref<64x256xf32, #tpu.memory_space<vmem>>, vector<64x256xf32>
    %c0_61 = arith.constant 0 : index
    %c0_62 = arith.constant 0 : index
    %76 = vector.load %arg5[%c0_61, %c0_62] : memref<1x256xf32, #tpu.memory_space<vmem>>, vector<1x256xf32>
    %77 = vector.broadcast %76 : vector<1x256xf32> to vector<64x256xf32>
    %78 = arith.addf %75, %77 : vector<64x256xf32>
    %79 = arith.addf %78, %0 : vector<64x256xf32>
    %cst_63 = arith.constant 0.000000e+00 : f32
    %80 = vector.broadcast %cst_63 : f32 to vector<64x256xf32>
    %81 = arith.maximumf %79, %80 : vector<64x256xf32>
    %c0_64 = arith.constant 0 : index
    %c0_65 = arith.constant 0 : index
    %82 = vector.load %arg10[%c0_64, %c0_65] : memref<64x256xf32, #tpu.memory_space<vmem>>, vector<64x256xf32>
    tpu.vector_store %arg10[%c0_64, %c0_65], %81 {strides = array<i32>} : memref<64x256xf32, #tpu.memory_space<vmem>>, vector<64x256xf32>,
    return
  }
  func.func @transform_0(%arg0: i32) -> (i32, i32) {
    %c0_i32 = arith.constant 0 : i32
    %c0_i32_0 = arith.constant 0 : i32
    return %arg0, %c0_i32 : i32, i32
  }
  func.func @transform_1(%arg0: i32) -> (i32, i32, i32) {
    %c0_i32 = arith.constant 0 : i32
    %c0_i32_0 = arith.constant 0 : i32
    %c0_i32_1 = arith.constant 0 : i32
    %c0_i32_2 = arith.constant 0 : i32
    return %c0_i32, %c0_i32_0, %c0_i32_1 : i32, i32, i32
  }
  func.func @transform_2(%arg0: i32) -> (i32, i32, i32) {
    %c0_i32 = arith.constant 0 : i32
    %c0_i32_0 = arith.constant 0 : i32
    %c0_i32_1 = arith.constant 0 : i32
    %c0_i32_2 = arith.constant 0 : i32
    return %c0_i32, %c0_i32_0, %c0_i32_1 : i32, i32, i32
  }
  func.func @transform_3(%arg0: i32) -> (i32, i32) {
    %c0_i32 = arith.constant 0 : i32
    %c0_i32_0 = arith.constant 0 : i32
    %c0_i32_1 = arith.constant 0 : i32
    return %c0_i32, %c0_i32_0 : i32, i32
  }
  func.func @transform_4(%arg0: i32) -> (i32, i32) {
    %c0_i32 = arith.constant 0 : i32
    %c0_i32_0 = arith.constant 0 : i32
    %c0_i32_1 = arith.constant 0 : i32
    return %c0_i32, %c0_i32_0 : i32, i32
  }
  func.func @transform_5(%arg0: i32) -> (i32, i32) {
    %c0_i32 = arith.constant 0 : i32
    %c0_i32_0 = arith.constant 0 : i32
    %c0_i32_1 = arith.constant 0 : i32
    return %c0_i32, %c0_i32_0 : i32, i32
  }
  func.func @transform_6(%arg0: i32) -> (i32, i32) {
    %c0_i32 = arith.constant 0 : i32
    %c0_i32_0 = arith.constant 0 : i32
    %c0_i32_1 = arith.constant 0 : i32
    return %c0_i32, %c0_i32_0 : i32, i32
  }
  func.func @transform_7(%arg0: i32) -> (i32, i32) {
    %c0_i32 = arith.constant 0 : i32
    %c0_i32_0 = arith.constant 0 : i32
    %c0_i32_1 = arith.constant 0 : i32
    return %c0_i32, %c0_i32_0 : i32, i32
  }
  func.func @transform_8(%arg0: i32) -> (i32, i32) {
    %c0_i32 = arith.constant 0 : i32
    %c0_i32_0 = arith.constant 0 : i32
    %c0_i32_1 = arith.constant 0 : i32
    return %c0_i32, %c0_i32_0 : i32, i32
  }
  func.func @transform_9(%arg0: i32) -> (i32, i32) {
    %c0_i32 = arith.constant 0 : i32
    %c0_i32_0 = arith.constant 0 : i32
    return %arg0, %c0_i32 : i32, i32
  }
}

</mosaic_0001>

<bundles_post_ra>
// kernel: residual_block_nchw.1
= control target key start
LH: loop header
LB: loop body
LE: loop exit
PB: predicated region body
PF: predicated region fallthrough
CT: control target
= control target key end

     0   :  { %s10055_s0 = inlined_call_operand.hbm [shape: f32[128,256], index: 0, kind: input, shape index: {}]   ;;  %s10056_s1 = inlined_call_operand.hbm [shape: bf16[3,768,256], index: 1, kind: input, shape index: {}]   ;;  %s10057_s2 = inlined_call_operand.hbm [shape: bf16[3,768,256], index: 2, kind: input, shape index: {}]   ;;  %s10058_s3 = inlined_call_operand.hbm [shape: f32[1,256], index: 3, kind: input, shape index: {}]   ;;  %s10059_s4 = inlined_call_operand.hbm [shape: f32[1,256], index: 4, kind: input, shape index: {}]   ;;  %s10060_s5 = inlined_call_operand.vmem [shape: f32[64,1], index: 5, kind: input, shape index: {}]   ;;  %s10061_s6 = inlined_call_operand.vmem [shape: f32[64,1], index: 6, kind: input, shape index: {}]   ;;  %s10062_s7 = inlined_call_operand.vmem [shape: f32[64,1], index: 7, kind: input, shape index: {}]   ;;  %s10063_s8 = inlined_call_operand.vmem [shape: f32[64,1], index: 8, kind: input, shape index: {}]   ;;  %s10064_s9 = inlined_call_operand.hbm [shape: f32[128,256], index: 9, kind: output, shape index: {}]  }
   0x1   :  { %10164 = sst [smem:[#allocation61_spill]] %s10056_s1 }
   0x2   :  { %10165 = sst [smem:[#allocation62_spill]] %s10057_s2 }
   0x3   :  { %10166 = sst [smem:[#allocation63_spill]] %s10058_s3 }
   0x4   :  { %14 = vsyncpa [#allocation4], 0 }
   0x5   :  { %16 = vsyncpa [#allocation4 + $0x1], 0 }
   0x6   :  { %17 = vsyncpa [#allocation7], 0 }
   0x7   :  { %18 = vsyncpa [#allocation10], 0 }
   0x8   :  { %19 = vsyncpa [#allocation5], 0 }
   0x9   :  { %21 = vsyncpa [#allocation5 + $0x1], 0  ;;  %s8113_s30 = smov 0   ;;  %s8115_s10 = smov 0  }
   0xa   :  { %s8117_s11 = smov 0   ;;  %s8119_s12 = smov 0  }
   0xb LB: > { %s8134_s13 = sadd.s32 4294967295, %s8048_s12   ;;  %s6248_s14 = sadd.s32 4294967294, %s8048_s12   ;;  %s8048_s12 = sphi %s8119_s12, %s10371_s12   ;;  %s8044_s11 = sphi %s8117_s11, %s10370_s11   ;;  %s8040_s10 = sphi %s8115_s10, %s10369_s10   ;;  %s8036_s30 = sphi %s8113_s30, %s10368_s30  }
   0xc   : > { %p47_p0 = scmp.ne.s32.totalorder %s8040_s10, %s8036_s30  ;;  %p10065_p1 = scmp.eq.s32.totalorder %s8134_s13, 0 }
   0xd   : > { %p245_p3 = scmp.eq.s32.totalorder %s6248_s14, 1  ;;  %p6249_p5 = scmp.ge.s32.totalorder %s8048_s12, 1 }
   0xe   : > { %p8143_p4 = por %p10065_p1, %p47_p0  ;;  %p252_p7 = scmp.lt.s32.totalorder %s8048_s12, 3 }
   0xf   : > { %p8148_p6 = por %p245_p3, %p47_p0  ;;  %s8050_s18 = smov [#allocation6]  }
  0x10   : > { %s10167_s15 = scalar_select %p8143_p4, 1, 0 }
  0x11   : > { %s10168_s16 = scalar_select %p8148_p6, 1, 0 }
  0x12   : > { %p8153_p8 = pnand %p6249_p5, %p252_p7  ;;  %s264_s19 = sshll.u32 %s8050_s18, 4  ;;  %s265_s19 = int_to_ptr.vmem [resolvable:$true] %s264_s19 }
  0x13   : > { %s8051_s21 = smov [#allocation9]   ;;  %s8052_s23 = smov [#allocation8]  }
  0x14   : > { %s10169_s17 = scalar_select %p8153_p8, 1, 0 }
  0x15   : > { %p6872_p9 = pneg %p8153_p8  ;;  %s291_s22 = sshll.u32 %s8051_s21, 4  ;;  %s292_s22 = int_to_ptr.vmem [resolvable:$true] %s291_s22 }
  0x16   : > { %s277_s24 = sshll.u32 %s8052_s23, 4  ;;  %s7855_s25 = scalar_lea.vmem %s265_s19, 36864  ;;  %s278_s24 = int_to_ptr.vmem [resolvable:$true] %s277_s24 }
  0x17   : > { %p8162_p11 = pnand %p6872_p9, %p10065_p1  ;;  %p7856_p13 = scmp.ne.s32.totalorder %s265_s19, %s7855_s25 }
  0x18   : > { %p7863_p5 = scmp.lt.s32.totalorder %s265_s19, %s265_s19  ;;  %p7864_p7 = scmp.lt.s32.totalorder %s7855_s25, %s7855_s25 }
  0x19   : > { %p7846_p12 = pneg %p8162_p11 }
  0x1a   : > { %p7865_p9 = por %p7864_p7, %p7863_p5 }
  0x1b   : > { %p7858_p0 = pnand %p7856_p13, %p7846_p12 }
  0x1d   : > { %p7859_p3 = pneg %p7858_p0 }
  0x1f   : > { %p7866_p10 = pnand %p7865_p9, %p7859_p3 }
  0x21   : > { %7869 = shalt.err (!%p7866_p10)
}
  0x22   : > { %s8053_s26 = smov 128   ;;  %s8054_s27 = smov 8  }
  0x23   : > { %s10171_s1 = sld [smem:[#allocation61_spill]]  ;;  %s7881_s14 = scalar_lea.vmem %s292_s22, 32 }
  0x24   : > { %p7882_p1 = scmp.ne.s32.totalorder %s292_s22, %s7881_s14  ;;  %p7889_p2 = scmp.lt.s32.totalorder %s292_s22, %s292_s22 }
  0x25   : > { %p7890_p6 = scmp.lt.s32.totalorder %s7881_s14, %s7881_s14 }
  0x26   : > { %p7884_p13 = pnand %p7882_p1, %p7846_p12 }
  0x27   : > { %p7891_p5 = por %p7890_p6, %p7889_p2 }
  0x28   : > { %p7885_p0 = pneg %p7884_p13 }
  0x29   : > { %6875 = dma.hbm_to_vmem [thread:$0]  (!%p8162_p11), %s10171_s1, 36864, %s265_s19, [#allocation7], %s8053_s26, %s8053_s26, %s8054_s27  }
  0x2a   : > { %p7892_p3 = pnand %p7891_p5, %p7885_p0 }
  0x2c   : > { %7895 = shalt.err (!%p7892_p3)
}
  0x2d   : > { %s10172_s3 = sld [smem:[#allocation63_spill]]  ;;  %s7907_s19 = scalar_lea.vmem %s278_s24, 36864 }
  0x2e   : > { %p7908_p10 = scmp.ne.s32.totalorder %s278_s24, %s7907_s19  ;;  %p7915_p9 = scmp.lt.s32.totalorder %s278_s24, %s278_s24 }
  0x2f   : > { %p7916_p13 = scmp.lt.s32.totalorder %s7907_s19, %s7907_s19 }
  0x30   : > { %p7910_p7 = pnand %p7908_p10, %p7846_p12 }
  0x31   : > { %p7917_p4 = por %p7916_p13, %p7915_p9 }
  0x32   : > { %p7911_p1 = pneg %p7910_p7 }
  0x33   : > { %6881 = dma.hbm_to_vmem [thread:$0]  (!%p8162_p11), %s10172_s3, 32, %s292_s22, [#allocation10]  }
  0x34   : > { %p7918_p2 = pnand %p7917_p4, %p7911_p1 }
  0x36   : > { %7921 = shalt.err (!%p7918_p2)
}
  0x37   : > { %s10173_s2 = sld [smem:[#allocation62_spill]]  ;;  %s8055_s22 = smov [#allocation11]  }
  0x38   : > { %s302_s28 = sshll.u32 %s8055_s22, 4  ;;  %s303_s28 = int_to_ptr.vmem [resolvable:$true] %s302_s28 }
  0x39   : > { %s7933_s29 = scalar_lea.vmem %s303_s28, 32  ;;  %p7941_p3 = scmp.lt.s32.totalorder %s303_s28, %s303_s28 }
  0x3a   : > { %p7934_p6 = scmp.ne.s32.totalorder %s303_s28, %s7933_s29  ;;  %p7942_p10 = scmp.lt.s32.totalorder %s7933_s29, %s7933_s29 }
  0x3c   : > { %p7936_p0 = pnand %p7934_p6, %p7846_p12  ;;  %p7943_p4 = por %p7942_p10, %p7941_p3 }
  0x3d   : > { %6878 = dma.hbm_to_vmem [thread:$0]  (!%p8162_p11), %s10173_s2, 36864, %s278_s24, [#allocation7], %s8053_s26, %s8053_s26, %s8054_s27  }
  0x3e   : > { %p7937_p5 = pneg %p7936_p0 }
  0x40   : > { %p7944_p7 = pnand %p7943_p4, %p7937_p5 }
  0x42   : > { %7947 = shalt.err (!%p7944_p7)
}
  0x43   : > { %6884 = dma.hbm_to_vmem [thread:$0]  (!%p8162_p11), %s10059_s4, 32, %s303_s28, [#allocation10]  }
  0x44   : > { %s8201_s24 = sadd.s32 1, %s8048_s12   ;;  %s34_s26 = sadd.s32 1, %s8044_s11 }
  0x45   : > { %s31_s20 = ssub.s32 %s8048_s12, %s8201_s24  ;;  %p41_p12 = scmp.ne.s32.totalorder %s8044_s11, %s8040_s10 }
  0x46   : > { %p32_p1 = scmp.eq.s32.totalorder %s31_s20, 0  ;;  %p42_p9 = scmp.eq.s32.totalorder %s8048_s12, 0 }
  0x47   : > { %p10174_p13 = scmp.eq.s32.totalorder %s8134_s13, 1  ;;  %p6897_p6 = scmp.lt.s32.totalorder %s8048_s12, 2 }
  0x48   : > { %s8217_s21 = scalar_select %p32_p1, %s8044_s11, %s34_s26  }
  0x49   : > { %p8211_p2 = por %p10174_p13, %p41_p12  ;;  %p43_p0 = por %p42_p9, %p41_p12 }
  0x4a   : > { %s325_s19 = sand.u32 1, %s8044_s11   ;;  %s6849_s25 = sshll.u32 %s8048_s12, 11 }
  0x4b   : > { %s10175_s27 = scalar_select %p8211_p2, 1, 0 }
  0x4c   : > { %s6255_s23 = sshll.u32 %s325_s19, 7  ;;  %s8224_s29 = scalar_lea.hbm %s10055_s0, %s6849_s25 }
  0x4d   : > { %s329_s14 = scalar_lea.vmem [#allocation3], %s6255_s23  ;;  %p8228_p11 = pnand %p6897_p6, %p43_p0 }
  0x4e   : > { %s337_s18 = sshll.u32 %s329_s14, 4  ;;  %s8232_s26 = scalar_lea.sflag [#allocation4], %s325_s19  ;;  %s8226_s18 = int_to_ptr.vmem [resolvable:$true] %s337_s18 }
  0x4f   : > { %s7948_s1 = scalar_lea.hbm %s8224_s29, 2048  ;;  %p7950_p3 = pneg %p8228_p11 }
  0x50   : > { %p7949_p5 = scmp.ne.s32.totalorder %s8224_s29, %s7948_s1  ;;  %s7953_s23 = scalar_lea.hbm %s10055_s0, 4096 }
  0x51   : > { %p7954_p7 = scmp.lt.s32.totalorder %s8224_s29, %s10055_s0  ;;  %p7955_p12 = scmp.lt.s32.totalorder %s7953_s23, %s7948_s1 }
  0x52   : > { %p7951_p10 = pnand %p7950_p3, %p7949_p5 }
  0x53   : > { %p7956_p1 = por %p7955_p12, %p7954_p7 }
  0x54   : > { %p7952_p4 = pneg %p7951_p10 }
  0x56   : > { %p7957_p9 = pnand %p7956_p1, %p7952_p4 }
  0x58   : > { %7960 = shalt.err (!%p7957_p9)
}
  0x59   : > { %s7961_s19 = scalar_lea.vmem %s8226_s18, 2048  ;;  %s8056_s2 = smov [#allocation3]  }
  0x5a   : > { %p7962_p13 = scmp.ne.s32.totalorder %s8226_s18, %s7961_s19  ;;  %s7966_s3 = sshll.u32 %s8056_s2, 4  ;;  %s7967_s3 = int_to_ptr.vmem [resolvable:$false] %s7966_s3 }
  0x5b   : > { %s7968_s25 = scalar_lea.vmem %s7967_s3, 4096  ;;  %p7969_p5 = scmp.lt.s32.totalorder %s8226_s18, %s7967_s3 }
  0x5c   : > { %p7964_p6 = pnand %p7962_p13, %p7950_p3  ;;  %p7970_p10 = scmp.lt.s32.totalorder %s7968_s25, %s7961_s19 }
  0x5e   : > { %p7965_p0 = pneg %p7964_p6  ;;  %p7971_p2 = por %p7970_p10, %p7969_p5 }
  0x60   : > { %p7972_p8 = pnand %p7971_p2, %p7965_p0 }
  0x62   : > { %7975 = shalt.err (!%p7972_p8)
}
  0x63   : > { %s8057_s1 = smov 256   ;;  %s8058_s22 = smov 16  }
  0x64   : > { %6888 = dma.hbm_to_vmem [thread:$0]  (!%p8228_p11), %s8224_s29, 2048, %s8226_s18, %s8232_s26, %s8057_s1, %s8057_s1, %s8058_s22  }
  0x65   : > { %p10177_p3 = scmp.ne.s32.totalorder %s10169_s17, 0 }
  0x67   : > { %349 = sbr.rel (%p10177_p3) target bundleno = 1258 (0x4ea), region = 56 }
  0x6c   : > { %s8256_s2 = sand.u32 1, %s8040_s10   ;;  %p10178_p8 = scmp.ne.s32.totalorder %s10167_s15, 0 }
  0x6d   : > { %s6260_s3 = sshll.u32 %s8256_s2, 7  ;;  %s352_s23 = scalar_lea.sflag [#allocation4], %s8256_s2 }
  0x6e   : > { %s8262_s28 = scalar_lea.vmem [#allocation3], %s6260_s3 }
  0x6f   : > { %8019 = dma.done.wait (%p10178_p8), %s352_s23, 2048  }
  0x70   : > { %8021 = vsyncadd (%p10178_p8), %s352_s23, 4294965248  ;;  %p10179_p2 = scmp.eq.s32.totalorder %s8134_s13, 0 }
  0x72   : > { %8023 = dma.done.wait (%p10179_p2), [#allocation7], 73728   ;;  %p10180_p11 = pmov %p10179_p2 }
  0x73   : > { %p10181_p4 = pmov %p10179_p2 }
  0x74   : > { %8025 = vsyncadd (%p10180_p11), [#allocation7], 4294893568 }
  0x75   : > { %8027 = dma.done.wait (%p10181_p4), [#allocation10], 64   ;;  %p10182_p7 = pmov %p10179_p2 }
  0x76   : > { %v8059_v0 = vmov 0   ;;  %v425_v1 = vld [vmem:[%s10060_s5 + $0x8] sm:$0xff]  ;;  %v424_v2 = vld [vmem:[%s10060_s5] sm:$0xff]  ;;  %v6948_v3 = vld [vmem:[#allocation6 + $0x174] ss:$8 sps:$4 sm:$0xff]   ;;  %s9928_s20 = scalar_lea.vmem [#allocation12], %s6260_s3 }
  0x77   : > { %8029 = vsyncadd (%p10182_p7), [#allocation10], 4294967232  ;;  %6947 = vset.pattern.permute.xlu1 %v8059_v0  ;;  %6946 = vset.pattern.permute.xlu0 %v8059_v0  ;;  %v6950_v4 = vld [vmem:[#allocation6 + $0x170] ss:$8 sps:$4 sm:$0xff]   ;;  %v6951_v7 = vld [vmem:[#allocation6 + $0x164] ss:$8 sps:$4 sm:$0xff]  }
  0x78   : > { %498 = vperm.xlu1 %6947, %v425_v1   ;;  %493 = vperm.xlu0 %6946, %v424_v2   ;;  %v426_v5 = vld [vmem:[%s10060_s5 + $0x10] sm:$0xff]  ;;  %v431_v6 = vld [vmem:[%s10060_s5 + $0x38] sm:$0xff]  ;;  %v6953_v8 = vld [vmem:[#allocation6 + $0x160] ss:$8 sps:$4 sm:$0xff]   ;;  %s6851_s3 = sshll.u32 %s8134_s13, 11  ;;  %s6137_s26 = sshll.u32 %s9928_s20, 4  ;;  %s10010_s26 = int_to_ptr.vmem [resolvable:$true] %s6137_s26 }
  0x79   : > { %1309 = vmatprep.subr.bf16.mxu1 %v6948_v3  ;;  %v428_v9 = vld [vmem:[%s10060_s5 + $0x20] sm:$0xff]  ;;  %v427_v10 = vld [vmem:[%s10060_s5 + $0x18] sm:$0xff]  ;;  %v430_v13 = vld [vmem:[%s10060_s5 + $0x30] sm:$0xff]  ;;  %s10008_s25 = scalar_lea.hbm %s10064_s9, %s6851_s3  ;;  %s6123_s1 = scalar_lea.sflag [#allocation5], %s8256_s2 }
  0x7a   : > { %1310 = vmatpush1.bf16.msra.mxu1 %v6950_v4  ;;  %v6954_v11 = vld [vmem:[#allocation6 + $0x154] ss:$8 sps:$4 sm:$0xff]   ;;  %v6956_v12 = vld [vmem:[#allocation6 + $0x150] ss:$8 sps:$4 sm:$0xff]   ;;  %v429_v14 = vld [vmem:[%s10060_s5 + $0x28] sm:$0xff]  ;;  %s7976_s13 = scalar_lea.vmem %s10010_s26, 2048 }
  0x7b   : > { %1311 = vmatprep.subr.bf16.mxu1 %v6951_v7  ;;  %v6957_v15 = vld [vmem:[#allocation6 + $0x144] ss:$8 sps:$4 sm:$0xff]   ;;  %v6959_v16 = vld [vmem:[#allocation6 + $0x140] ss:$8 sps:$4 sm:$0xff]   ;;  %v439_v17 = vld [vmem:[%s10061_s6 + $0x38] sm:$0xff]  ;;  %p7977_p12 = scmp.ne.s32.totalorder %s10010_s26, %s7976_s13  ;;  %p10365_p1 = scmp.ne.s32.totalorder %s10175_s27, 0 }
  0x7c   : > { %503 = vperm.xlu1 %6947, %v426_v5   ;;  %528 = vperm.xlu0 %6946, %v431_v6   ;;  %v432_v18 = vld [vmem:[%s10061_s6] sm:$0xff]  ;;  %v6960_v19 = vld [vmem:[#allocation6 + $0x134] ss:$8 sps:$4 sm:$0xff]   ;;  %v6962_v20 = vld [vmem:[#allocation6 + $0x130] ss:$8 sps:$4 sm:$0xff]  }
  0x7d   : > { %v434_v21 = vld [vmem:[%s10061_s6 + $0x10] sm:$0xff]  ;;  %v433_v22 = vld [vmem:[%s10061_s6 + $0x8] sm:$0xff]  ;;  %v436_v25 = vld [vmem:[%s10061_s6 + $0x20] sm:$0xff]  ;;  %p7978_p9 = pnand %p7977_p12, %p10365_p1 }
  0x7e   : > { %1312 = vmatpush1.bf16.msra.mxu1 %v6953_v8  ;;  %v6963_v23 = vld [vmem:[#allocation6 + $0x124] ss:$8 sps:$4 sm:$0xff]   ;;  %v6965_v24 = vld [vmem:[#allocation6 + $0x120] ss:$8 sps:$4 sm:$0xff]   ;;  %v435_v26 = vld [vmem:[%s10061_s6 + $0x18] sm:$0xff] }
  0x7f   : > { %1313 = vmatprep.subr.bf16.mxu1 %v6954_v11  ;;  %v6966_v27 = vld [vmem:[#allocation6 + $0x114] ss:$8 sps:$4 sm:$0xff]   ;;  %v6968_v28 = vld [vmem:[#allocation6 + $0x110] ss:$8 sps:$4 sm:$0xff]   ;;  %v437_v30 = vld [vmem:[%s10061_s6 + $0x28] sm:$0xff]  ;;  %p7979_p13 = pneg %p7978_p9 }
  0x80   : > { %513 = vperm.xlu1 %6947, %v428_v9   ;;  %508 = vperm.xlu0 %6946, %v427_v10   ;;  %v438_v29 = vld [vmem:[%s10061_s6 + $0x30] sm:$0xff]  ;;  %v6969_v31 = vld [vmem:[#allocation6 + $0x104] ss:$8 sps:$4 sm:$0xff]   ;;  %v6971_v32 = vld [vmem:[#allocation6 + $0x100] ss:$8 sps:$4 sm:$0xff]  }
  0x81   : > { %v446_v33 = vld [vmem:[%s10062_s7 + $0x30] sm:$0xff]  ;;  %v440_v34 = vld [vmem:[%s10062_s7] sm:$0xff]  ;;  %v8331_v37 = vld [vmem:[%s8262_s28 + $0x8] sm:$0xff] }
  0x82   : > { %1314 = vmatpush1.bf16.msra.mxu1 %v6956_v12  ;;  %v6972_v35 = vld [vmem:[#allocation6 + $0x1f4] ss:$8 sps:$4 sm:$0xff]   ;;  %v6974_v36 = vld [vmem:[#allocation6 + $0x1f0] ss:$8 sps:$4 sm:$0xff]   ;;  %v448_v39 = vld [vmem:[%s10063_s8] sm:$0xff] }
  0x83   : > { %1315 = vmatprep.subr.bf16.mxu1 %v6957_v15  ;;  %v8334_v38 = vld [vmem:[%s8262_s28 + $0x78] sm:$0xff]  ;;  %v6975_v42 = vld [vmem:[#allocation6 + $0x1e4] ss:$8 sps:$4 sm:$0xff]   ;;  %v6977_v43 = vld [vmem:[#allocation6 + $0x1e0] ss:$8 sps:$4 sm:$0xff]  }
  0x84   : > { %523 = vperm.xlu1 %6947, %v430_v13   ;;  %518 = vperm.xlu0 %6946, %v429_v14   ;;  %v447_v40 = vld [vmem:[%s10062_s7 + $0x38] sm:$0xff]  ;;  %v8344_v41 = vpack.c.bf16 %v8331_v37, %v8334_v38  ;;  %v454_v47 = vld [vmem:[%s10063_s8 + $0x30] sm:$0xff]  ;;  %v7005_v49 = vld [vmem:[#allocation6 + $0x64] ss:$8 sps:$4 sm:$0xff]  }
  0x85   : > { %v6999_v44 = vld [vmem:[#allocation6 + $0x74] ss:$8 sps:$4 sm:$0xff]   ;;  %v7001_v45 = vld [vmem:[#allocation6 + $0x70] ss:$8 sps:$4 sm:$0xff]   ;;  %v7007_v51 = vld [vmem:[#allocation6 + $0x60] ss:$8 sps:$4 sm:$0xff]  }
  0x86   : > { %1316 = vmatpush1.bf16.msra.mxu1 %v6959_v16  ;;  %1341 = vmatprep.mubr.bf16.mxu1 %v8344_v41  ;;  %v455_v46 = vld [vmem:[%s10063_s8 + $0x38] sm:$0xff]  ;;  %v442_v53 = vld [vmem:[%s10062_s7 + $0x10] sm:$0xff]  ;;  %v441_v54 = vld [vmem:[%s10062_s7 + $0x8] sm:$0xff] }
  0x87   : > { %1317 = vmatprep.subr.bf16.mxu1 %v6960_v19  ;;  %v6978_v48 = vld [vmem:[#allocation6 + $0x1d4] ss:$8 sps:$4 sm:$0xff]   ;;  %1236 = vmatprep.subr.bf16.mxu0 %v6999_v44  ;;  %v6980_v50 = vld [vmem:[#allocation6 + $0x1d0] ss:$8 sps:$4 sm:$0xff]   ;;  %v6981_v55 = vld [vmem:[#allocation6 + $0x1c4] ss:$8 sps:$4 sm:$0xff]  }
  0x88   : > { %617 = vperm.xlu1 %6947, %v439_v17   ;;  %582 = vperm.xlu0 %6946, %v432_v18   ;;  %v7011_v52 = vld [vmem:[#allocation6 + $0x54] ss:$8 sps:$4 sm:$0xff]   ;;  %v6983_v56 = vld [vmem:[#allocation6 + $0x1c0] ss:$8 sps:$4 sm:$0xff]   ;;  %v7013_v57 = vld [vmem:[#allocation6 + $0x50] ss:$8 sps:$4 sm:$0xff]  }
  0x89   : > { %1237 = vmatpush1.bf16.msra.mxu0 %v7001_v45  ;;  %v7017_v58 = vld [vmem:[#allocation6 + $0x44] ss:$8 sps:$4 sm:$0xff]   ;;  %v450_v59 = vld [vmem:[%s10063_s8 + $0x10] sm:$0xff]  ;;  %v7019_v63 = vld [vmem:[#allocation6 + $0x40] ss:$8 sps:$4 sm:$0xff]  }
  0x8a   : > { %1318 = vmatpush1.bf16.msra.mxu1 %v6962_v20  ;;  %1238 = vmatprep.subr.bf16.mxu0 %v7005_v49  ;;  %v449_v60 = vld [vmem:[%s10063_s8 + $0x8] sm:$0xff]  ;;  %v6984_v61 = vld [vmem:[#allocation6 + $0x1b4] ss:$8 sps:$4 sm:$0xff]   ;;  %v6986_v62 = vld [vmem:[#allocation6 + $0x1b0] ss:$8 sps:$4 sm:$0xff]  }
  0x8b   : > { %1319 = vmatprep.subr.bf16.mxu1 %v6963_v23  ;;  %v7023_v0 = vld [vmem:[#allocation6 + $0x34] ss:$8 sps:$4 sm:$0xff]   ;;  %v444_v1 = vld [vmem:[%s10062_s7 + $0x20] sm:$0xff]  ;;  %v7025_v5 = vld [vmem:[#allocation6 + $0x30] ss:$8 sps:$4 sm:$0xff]  }
  0x8c   : > { %592 = vperm.xlu1 %6947, %v434_v21   ;;  %587 = vperm.xlu0 %6946, %v433_v22   ;;  %v443_v2 = vld [vmem:[%s10062_s7 + $0x18] sm:$0xff]  ;;  %v6987_v3 = vld [vmem:[#allocation6 + $0x1a4] ss:$8 sps:$4 sm:$0xff]   ;;  %v6989_v4 = vld [vmem:[#allocation6 + $0x1a0] ss:$8 sps:$4 sm:$0xff]  }
  0x8d   : > { %1239 = vmatpush1.bf16.msra.mxu0 %v7007_v51  ;;  %v7029_v6 = vld [vmem:[#allocation6 + $0x24] ss:$8 sps:$4 sm:$0xff]   ;;  %v451_v8 = vld [vmem:[%s10063_s8 + $0x18] sm:$0xff]  ;;  %v7031_v11 = vld [vmem:[#allocation6 + $0x20] ss:$8 sps:$4 sm:$0xff]  }
  0x8e   : > { %1320 = vmatpush1.bf16.msra.mxu1 %v6965_v24  ;;  %1240 = vmatprep.subr.bf16.mxu0 %v7011_v52  ;;  %v452_v7 = vld [vmem:[%s10063_s8 + $0x20] sm:$0xff]  ;;  %v6990_v9 = vld [vmem:[#allocation6 + $0x194] ss:$8 sps:$4 sm:$0xff]   ;;  %v6992_v10 = vld [vmem:[#allocation6 + $0x190] ss:$8 sps:$4 sm:$0xff]  }
  0x8f   : > { %1321 = vmatprep.subr.bf16.mxu1 %v6966_v27  ;;  %v7035_v12 = vld [vmem:[#allocation6 + $0x14] ss:$8 sps:$4 sm:$0xff]   ;;  %v453_v13 = vld [vmem:[%s10063_s8 + $0x28] sm:$0xff]  ;;  %v7037_v17 = vld [vmem:[#allocation6 + $0x10] ss:$8 sps:$4 sm:$0xff]  }
  0x90   : > { %602 = vperm.xlu1 %6947, %v436_v25   ;;  %597 = vperm.xlu0 %6946, %v435_v26   ;;  %v445_v14 = vld [vmem:[%s10062_s7 + $0x28] sm:$0xff]  ;;  %v8384_v18 = vld [vmem:[%s8262_s28] sm:$0xff]  ;;  %v8387_v19 = vld [vmem:[%s8262_s28 + $0x70] sm:$0xff] }
  0x91   : > { %1241 = vmatpush1.bf16.msra.mxu0 %v7013_v57  ;;  %v6993_v15 = vld [vmem:[#allocation6 + $0x184] ss:$8 sps:$4 sm:$0xff]   ;;  %v6995_v16 = vld [vmem:[#allocation6 + $0x180] ss:$8 sps:$4 sm:$0xff]   ;;  %v6998_v21 = vld [vmem:[#allocation6 + $0x374] ss:$8 sps:$4 sm:$0xff]   ;;  %v8397_v25 = vpack.c.bf16 %v8384_v18, %v8387_v19 }
  0x92   : > { %1322 = vmatpush1.bf16.msra.mxu1 %v6968_v28  ;;  %1242 = vmatprep.subr.bf16.mxu0 %v7017_v58  ;;  %v7041_v20 = vld [vmem:[#allocation6 + $0x4] ss:$8 sps:$4 sm:$0xff]   ;;  %v8390_v22 = vld [vmem:[%s8262_s28 + $0x18] sm:$0xff]  ;;  %v7043_v26 = vld [vmem:[#allocation6] ss:$8 sps:$4 sm:$0xff]  }
  0x93   : > { %1323 = vmatprep.subr.bf16.mxu1 %v6969_v31  ;;  %v8393_v23 = vld [vmem:[%s8262_s28 + $0x28] sm:$0xff]  ;;  %v6996_v24 = vld [vmem:[#allocation6 + $0x370] ss:$8 sps:$4 sm:$0xff]   ;;  %v7047_v27 = vld [vmem:[#allocation6 + $0xf4] ss:$8 sps:$4 sm:$0xff]  }
  0x94   : > { %612 = vperm.xlu1 %6947, %v438_v29   ;;  %607 = vperm.xlu0 %6946, %v437_v30   ;;  %v7004_v28 = vld [vmem:[#allocation6 + $0x364] ss:$8 sps:$4 sm:$0xff]   ;;  %v8401_v29 = vpack.c.bf16 %v8393_v23, %v8390_v22  ;;  %v7002_v30 = vld [vmem:[#allocation6 + $0x360] ss:$8 sps:$4 sm:$0xff]   ;;  %v7049_v31 = vld [vmem:[#allocation6 + $0xf0] ss:$8 sps:$4 sm:$0xff]  }
  0x95   : > { %1243 = vmatpush1.bf16.msra.mxu0 %v7019_v63  ;;  %v7059_v44 = vld [vmem:[#allocation6 + $0xd4] ss:$8 sps:$4 sm:$0xff]   ;;  %v7016_v45 = vld [vmem:[#allocation6 + $0x344] ss:$8 sps:$4 sm:$0xff]  }
  0x96   : > { %1324 = vmatpush1.bf16.msra.mxu1 %v6971_v32  ;;  %1244 = vmatprep.subr.bf16.mxu0 %v7023_v0  ;;  %v7053_v32 = vld [vmem:[#allocation6 + $0xe4] ss:$8 sps:$4 sm:$0xff]   ;;  %v7022_v52 = vld [vmem:[#allocation6 + $0x334] ss:$8 sps:$4 sm:$0xff]  }
  0x97   : > { %1325 = vmatprep.subr.bf16.mxu1 %v6972_v35  ;;  %v7010_v35 = vld [vmem:[#allocation6 + $0x354] ss:$8 sps:$4 sm:$0xff]   ;;  %v7065_v49 = vld [vmem:[#allocation6 + $0xc4] ss:$8 sps:$4 sm:$0xff]  }
  0x98   : > { %1487 = vperm.xlu1 %6947, %v446_v33   ;;  %1457 = vperm.xlu0 %6946, %v440_v34   ;;  %v8405_v33 = vld [vmem:[%s8262_s28 + $0x10] sm:$0xff]  ;;  %v8408_v34 = vld [vmem:[%s8262_s28 + $0x20] sm:$0xff] }
  0x99   : > { %1245 = vmatpush1.bf16.msra.mxu0 %v7025_v5  ;;  %v8430_v51 = vld [vmem:[%s8262_s28 + $0x40] sm:$0xff]  ;;  %v7071_v58 = vld [vmem:[#allocation6 + $0xb4] ss:$8 sps:$4 sm:$0xff]  }
  0x9a   : > { %1326 = vmatpush2.bf16.msra.mxu1 %v6974_v36  ;;  %1246 = vmatprep.subr.bf16.mxu0 %v7029_v6  ;;  %v8412_v36 = vld [vmem:[%s8262_s28 + $0x38] sm:$0xff]  ;;  %v7077_v63 = vld [vmem:[#allocation6 + $0xa4] ss:$8 sps:$4 sm:$0xff]   ;;  %v8449_v0 = vld [vmem:[%s8262_s28 + $0x50] sm:$0xff] }
  0x9b   : > { %1327 = vmatprep.subr.bf16.mxu1 %v6975_v42  ;;  %v7055_v42 = vld [vmem:[#allocation6 + $0xe0] ss:$8 sps:$4 sm:$0xff]   ;;  %v7083_v6 = vld [vmem:[#allocation6 + $0x94] ss:$8 sps:$4 sm:$0xff]  }
  0x9c   : > { %3193 = vperm.xlu1 %6947, %v448_v39   ;;  %1492 = vperm.xlu0 %6946, %v447_v40   ;;  %v8415_v39 = vld [vmem:[%s8262_s28 + $0x48] sm:$0xff]  ;;  %v7008_v40 = vld [vmem:[#allocation6 + $0x350] ss:$8 sps:$4 sm:$0xff]  }
  0x9d   : > { %1247 = vmatpush1.bf16.msra.mxu0 %v7031_v11  ;;  %v7046_v11 = vld [vmem:[#allocation6 + $0x3f4] ss:$8 sps:$4 sm:$0xff]  }
  0x9e   : > { %1328 = vmatpush2.bf16.msra.mxu1 %v6977_v43  ;;  %1248 = vmatprep.subr.bf16.mxu0 %v7035_v12  ;;  %v8419_v43 = vpack.c.bf16 %v8408_v34, %v8405_v33  ;;  %v7044_v12 = vld [vmem:[#allocation6 + $0x3f0] ss:$8 sps:$4 sm:$0xff]  }
  0x9f   : > { %1329 = vmatprep.subr.bf16.mxu1 %v6978_v48  ;;  %v7061_v48 = vld [vmem:[#allocation6 + $0xd0] ss:$8 sps:$4 sm:$0xff]  }
  0xa0   : > { %3228 = vperm.xlu1 %6947, %v455_v46   ;;  %3223 = vperm.xlu0 %6946, %v454_v47   ;;  %v8423_v46 = vpack.c.bf16 %v8415_v39, %v8412_v36  ;;  %v7014_v47 = vld [vmem:[#allocation6 + $0x340] ss:$8 sps:$4 sm:$0xff]  }
  0xa1   : > { %1249 = vmatpush1.bf16.msra.mxu0 %v7037_v17  ;;  %v7058_v17 = vld [vmem:[#allocation6 + $0x3d4] ss:$8 sps:$4 sm:$0xff]  }
  0xa2   : > { %1330 = vmatpush2.bf16.msra.mxu1 %v6980_v50  ;;  %1250 = vmatprep.subr.bf16.mxu0 %v7041_v20  ;;  %v8427_v50 = vld [vmem:[%s8262_s28 + $0x30] sm:$0xff] }
  0xa3   : > { %1331 = vmatprep.subr.bf16.mxu1 %v6981_v55  ;;  %v7020_v55 = vld [vmem:[#allocation6 + $0x330] ss:$8 sps:$4 sm:$0xff]   ;;  %v8441_v57 = vpack.c.bf16 %v8430_v51, %v8427_v50 }
  0xa4   : > { %1467 = vperm.xlu1 %6947, %v442_v53   ;;  %1462 = vperm.xlu0 %6946, %v441_v54   ;;  %v8434_v53 = vld [vmem:[%s8262_s28 + $0x58] sm:$0xff]  ;;  %v8437_v54 = vld [vmem:[%s8262_s28 + $0x68] sm:$0xff] }
  0xa5   : > { %1251 = vmatpush1.bf16.msra.mxu0 %v7043_v26  ;;  %v7056_v20 = vld [vmem:[#allocation6 + $0x3d0] ss:$8 sps:$4 sm:$0xff]   ;;  %v472_v26 = vlaneseq }
  0xa6   : > { %1332 = vmatpush2.bf16.msra.mxu1 %v6983_v56  ;;  %1252 = vmatprep.subr.bf16.mxu0 %v7047_v27  ;;  %v7067_v56 = vld [vmem:[#allocation6 + $0xc0] ss:$8 sps:$4 sm:$0xff]   ;;  %v7070_v27 = vld [vmem:[#allocation6 + $0x3b4] ss:$8 sps:$4 sm:$0xff]  }
  0xa7   : > { %1333 = vmatprep.subr.bf16.mxu1 %v6984_v61  ;;  %v7026_v61 = vld [vmem:[#allocation6 + $0x320] ss:$8 sps:$4 sm:$0xff]  }
  0xa8   : > { %3203 = vperm.xlu1 %6947, %v450_v59   ;;  %3198 = vperm.xlu0 %6946, %v449_v60   ;;  %v7028_v59 = vld [vmem:[#allocation6 + $0x324] ss:$8 sps:$4 sm:$0xff]   ;;  %v8445_v60 = vpack.c.bf16 %v8437_v54, %v8434_v53 }
  0xa9   : > { %1253 = vmatpush2.bf16.msra.mxu0 %v7049_v31  ;;  %v7076_v31 = vld [vmem:[#allocation6 + $0x3a4] ss:$8 sps:$4 sm:$0xff]  }
  0xaa   : > { %1334 = vmatpush2.bf16.msra.mxu1 %v6986_v62  ;;  %1254 = vmatprep.subr.bf16.mxu0 %v7053_v32  ;;  %v7073_v62 = vld [vmem:[#allocation6 + $0xb0] ss:$8 sps:$4 sm:$0xff]   ;;  %v7074_v32 = vld [vmem:[#allocation6 + $0x3a0] ss:$8 sps:$4 sm:$0xff]  }
  0xab   : > { %1335 = vmatprep.subr.bf16.mxu1 %v6987_v3  ;;  %v7032_v3 = vld [vmem:[#allocation6 + $0x310] ss:$8 sps:$4 sm:$0xff]  }
  0xac   : > { %1477 = vperm.xlu1 %6947, %v444_v1   ;;  %1472 = vperm.xlu0 %6946, %v443_v2   ;;  %v8452_v1 = vld [vmem:[%s8262_s28 + $0x60] sm:$0xff]  ;;  %v7034_v2 = vld [vmem:[#allocation6 + $0x314] ss:$8 sps:$4 sm:$0xff]  }
  0xad   : > { %1255 = vmatpush2.bf16.msra.mxu0 %v7055_v42  ;;  %v8457_v5 = vpack.c.bf16 %v8452_v1, %v8449_v0  ;;  %v471_v42 = vrot.slane %v8334_v38, 7 }
  0xae   : > { %1336 = vmatpush2.bf16.msra.mxu1 %v6989_v4  ;;  %1256 = vmatprep.subr.bf16.mxu0 %v7059_v44  ;;  %v7079_v4 = vld [vmem:[#allocation6 + $0xa0] ss:$8 sps:$4 sm:$0xff]   ;;  %v456_v44 = vrot.slane %v8384_v18, 7 }
  0xaf   : > { %1337 = vmatprep.subr.bf16.mxu1 %v6990_v9  ;;  %v7085_v9 = vld [vmem:[#allocation6 + $0x90] ss:$8 sps:$4 sm:$0xff]  }
  0xb0   : > { %3213 = vperm.xlu1 %6947, %v452_v7   ;;  %3208 = vperm.xlu0 %6946, %v451_v8   ;;  %v7040_v7 = vld [vmem:[#allocation6 + $0x304] ss:$8 sps:$4 sm:$0xff]   ;;  %v7038_v8 = vld [vmem:[#allocation6 + $0x300] ss:$8 sps:$4 sm:$0xff]  }
  0xb1   : > { %1257 = vmatpush2.bf16.msra.mxu0 %v7061_v48  ;;  %v470_v48 = vrot.slane %v8387_v19, 7  ;;  %v469_v19 = vrot.slane %v8437_v54, 7 }
  0xb2   : > { %1338 = vmatpush2.bf16.msra.mxu1 %v6992_v10  ;;  %1258 = vmatprep.subr.bf16.mxu0 %v7065_v49  ;;  %v7089_v10 = vld [vmem:[#allocation6 + $0x84] ss:$8 sps:$4 sm:$0xff]   ;;  %v7080_v49 = vld [vmem:[#allocation6 + $0x390] ss:$8 sps:$4 sm:$0xff]  }
  0xb3   : > { %1339 = vmatprep.subr.bf16.mxu1 %v6993_v15  ;;  %v7052_v15 = vld [vmem:[#allocation6 + $0x3e4] ss:$8 sps:$4 sm:$0xff]  }
  0xb4   : > { %3218 = vperm.xlu1 %6947, %v453_v13   ;;  %1482 = vperm.xlu0 %6946, %v445_v14   ;;  %v7091_v13 = vld [vmem:[#allocation6 + $0x80] ss:$8 sps:$4 sm:$0xff]   ;;  %v7097_v14 = vld [vmem:[#allocation6 + $0x274] ss:$8 sps:$4 sm:$0xff]  }
  0xb5   : > { %1259 = vmatpush2.bf16.msra.mxu0 %v7067_v56 }
  0xb6   : > { %1340 = vmatpush2.bf16.msra.mxu1 %v6995_v16  ;;  %1260 = vmatprep.subr.bf16.mxu0 %v7071_v58  ;;  %v7050_v16 = vld [vmem:[#allocation6 + $0x3e0] ss:$8 sps:$4 sm:$0xff]  }
  0xb7   : > { %2128 = vmatprep.subr.bf16.mxu1 %v6998_v21  ;;  %v7064_v21 = vld [vmem:[#allocation6 + $0x3c4] ss:$8 sps:$4 sm:$0xff]  }
  0xb9   : > { %1342 = vmatmul.mubr.bf16.vlgmr.msra.gmra.mxu1 %v8397_v25  ;;  %1261 = vmatpush2.bf16.msra.mxu0 %v7073_v62  ;;  %v7086_v62 = vld [vmem:[#allocation6 + $0x380] ss:$8 sps:$4 sm:$0xff]  }
  0xba   : > { %2129 = vmatpush1.bf16.msra.mxu1 %v6996_v24  ;;  %1351 = vmatprep.mubr.bf16.mxu1 %v8401_v29  ;;  %v7062_v24 = vld [vmem:[#allocation6 + $0x3c0] ss:$8 sps:$4 sm:$0xff]  }
  0xbb   : > { %2130 = vmatprep.subr.bf16.mxu1 %v7004_v28  ;;  %1262 = vmatprep.subr.bf16.mxu0 %v7077_v63  ;;  %v7068_v28 = vld [vmem:[#allocation6 + $0x3b0] ss:$8 sps:$4 sm:$0xff]   ;;  %v460_v63 = vrot.slane %v8408_v34, 7 }
  0xbd   : > { %1263 = vmatpush2.bf16.msra.mxu0 %v7079_v4 }
  0xbe   : > { %2131 = vmatpush1.bf16.msra.mxu1 %v7002_v30  ;;  %1264 = vmatprep.subr.bf16.mxu0 %v7083_v6  ;;  %v8460_v30 = vshrl.u32 %v472_v26, 7  ;;  %v465_v26 = vrot.slane %v8415_v39, 7 }
  0xbf   : > { %2132 = vmatprep.subr.bf16.mxu1 %v7010_v35  ;;  %v7082_v35 = vld [vmem:[#allocation6 + $0x394] ss:$8 sps:$4 sm:$0xff]  }
  0xc0   : > { %10183 = vst [vmem:[#allocation17_spill] sm:$0xff] %v8460_v30  ;;  %vm474_vm0 = vcmp.lt.s32.totalorder %v8460_v30, 1  ;;  %vm563_vm1 = vcmp.lt.s32.totalorder %v8460_v30, 7  ;;  %v7416_v30 = vld [vmem:[#allocation8 + $0x20] ss:$8 sps:$4 sm:$0xff]  }
  0xc1   : > { %1352 = vmatmul.mubr.bf16.gmra.mxu1 %v8419_v43  ;;  %1265 = vmatpush2.bf16.msra.mxu0 %v7085_v9  ;;  %v489_v18 = vsel %vm474_vm0, %v470_v48, %v456_v44 }
  0xc2   : > { %2133 = vmatpush1.bf16.msra.mxu1 %v7008_v40  ;;  %1361 = vmatprep.mubr.bf16.mxu1 %v8423_v46  ;;  %v457_v40 = vrot.slane %v8331_v37, 7 }
  0xc3   : > { %2134 = vmatprep.subr.bf16.mxu1 %v7016_v45  ;;  %1266 = vmatprep.subr.bf16.mxu0 %v7089_v10  ;;  %v458_v45 = vrot.slane %v8405_v33, 7  ;;  %v468_v33 = vrot.slane %v8452_v1, 7  ;;  %v462_v10 = vrot.slane %v8427_v50, 7  ;;  %v7115_v50 = vld [vmem:[#allocation6 + $0x244] ss:$8 sps:$4 sm:$0xff]  }
  0xc5   : > { %1267 = vmatpush2.bf16.msra.mxu0 %v7091_v13  ;;  %v487_v56 = vsel %vm474_vm0, %v456_v44, %v458_v45  ;;  %v475_v9 = vsel %vm474_vm0, %v468_v33, %v470_v48  ;;  %v7095_v44 = vld [vmem:[#allocation6 + $0x270] ss:$8 sps:$4 sm:$0xff]  }
  0xc6   : > { %2135 = vmatpush1.bf16.msra.mxu1 %v7014_v47  ;;  %1382 = vmatprep.subr.bf16.mxu0 %v7097_v14  ;;  %v459_v47 = vrot.slane %v8390_v22, 7  ;;  %v476_v14 = vsel %vm474_vm0, %v469_v19, %v471_v42 }
  0xc7   : > { %2136 = vmatprep.subr.bf16.mxu1 %v7022_v52  ;;  %v490_v52 = vsel %vm474_vm0, %v471_v42, %v457_v40 }
  0xc8   : > { %v488_v58 = vsel %vm474_vm0, %v457_v40, %v459_v47 }
  0xc9   : > { %1362 = vmatmul.mubr.bf16.gmra.mxu1 %v8441_v57 }
  0xca   : > { %2137 = vmatpush1.bf16.msra.mxu1 %v7020_v55  ;;  %1371 = vmatprep.mubr.bf16.mxu1 %v8445_v60  ;;  %v7088_v55 = vld [vmem:[#allocation6 + $0x384] ss:$8 sps:$4 sm:$0xff]  }
  0xcb   : > { %2138 = vmatprep.subr.bf16.mxu1 %v7028_v59 }
  0xce   : > { %2139 = vmatpush1.bf16.msra.mxu1 %v7026_v61 }
  0xcf   : > { %2140 = vmatprep.subr.bf16.mxu1 %v7034_v2  ;;  %v461_v2 = vrot.slane %v8393_v23, 7 }
  0xd1   : > { %1372 = vmatmul.mubr.bf16.gmra.mxu1 %v8457_v5 }
  0xd2   : > { %2141 = vmatpush1.bf16.msra.mxu1 %v7032_v3 }
  0xd3   : > { %2142 = vmatprep.subr.bf16.mxu1 %v7040_v7 }
  0xd6   : > { %2143 = vmatpush1.bf16.msra.mxu1 %v7038_v8  ;;  %v7094_v8 = vld [vmem:[#allocation6 + $0x574] ss:$8 sps:$4 sm:$0xff]  }
  0xd7   : > { %2144 = vmatprep.subr.bf16.mxu1 %v7046_v11  ;;  %v463_v11 = vrot.slane %v8412_v36, 7 }
  0xda   : > { %2145 = vmatpush2.bf16.msra.mxu1 %v7044_v12 }
  0xdb   : > { %2146 = vmatprep.subr.bf16.mxu1 %v7052_v15 }
  0xde   : > { %2147 = vmatpush2.bf16.msra.mxu1 %v7050_v16  ;;  %v485_v16 = vsel %vm474_vm0, %v458_v45, %v460_v63 }
  0xdf   : > { %2148 = vmatprep.subr.bf16.mxu1 %v7058_v17  ;;  %v486_v17 = vsel %vm474_vm0, %v459_v47, %v461_v2 }
  0xe2   : > { %2149 = vmatpush2.bf16.msra.mxu1 %v7056_v20 }
  0xe3   : > { %2150 = vmatprep.subr.bf16.mxu1 %v7064_v21  ;;  %v7092_v21 = vld [vmem:[#allocation6 + $0x570] ss:$8 sps:$4 sm:$0xff]  }
  0xe6   : > { %2151 = vmatpush2.bf16.msra.mxu1 %v7062_v24 }
  0xe7   : > { %2152 = vmatprep.subr.bf16.mxu1 %v7070_v27  ;;  %v7100_v27 = vld [vmem:[#allocation6 + $0x564] ss:$8 sps:$4 sm:$0xff]  }
  0xea   : > { %2153 = vmatpush2.bf16.msra.mxu1 %v7068_v28  ;;  %v483_v28 = vsel %vm474_vm0, %v460_v63, %v462_v10  ;;  %v7106_v63 = vld [vmem:[#allocation6 + $0x554] ss:$8 sps:$4 sm:$0xff]  }
  0xeb   : > { %2154 = vmatprep.subr.bf16.mxu1 %v7076_v31  ;;  %v484_v31 = vsel %vm474_vm0, %v461_v2, %v463_v11  ;;  %v7101_v2 = vld [vmem:[#allocation6 + $0x260] ss:$8 sps:$4 sm:$0xff]  }
  0xee   : > { %2155 = vmatpush2.bf16.msra.mxu1 %v7074_v32 }
  0xef   : > { %2156 = vmatprep.subr.bf16.mxu1 %v7082_v35  ;;  %v467_v35 = vrot.slane %v8434_v53, 7 }
  0xf2   : > { %2157 = vmatpush2.bf16.msra.mxu1 %v7080_v49  ;;  %v7098_v49 = vld [vmem:[#allocation6 + $0x560] ss:$8 sps:$4 sm:$0xff]  }
  0xf3   : > { %v8479_v59 = vpop.permute.xlu1 %498  ;;  %v8481_v61 = vpop.permute.xlu0 %493  ;;  %2158 = vmatprep.subr.bf16.mxu1 %v7088_v55 }
  0xf4   : > { %10184 = vst [vmem:[#allocation18_spill] sm:$0xff] %v8479_v59  ;;  %10185 = vst [vmem:[#allocation19_spill] sm:$0xff] %v8481_v61  ;;  %v8486_v3 = vmul.f32 %v8479_v59, %v487_v56  ;;  %v534_v4 = vmul.f32 %v8479_v59, %v488_v58  ;;  %v531_v6 = vmul.f32 %v8481_v61, %v489_v18  ;;  %v7103_v56 = vld [vmem:[#allocation6 + $0x264] ss:$8 sps:$4 sm:$0xff]   ;;  %v466_v18 = vrot.slane %v8449_v0, 7 }
  0xf5   : > { %v532_v7 = vmul.f32 %v8481_v61, %v490_v52  ;;  %v482_v58 = vsel %vm474_vm0, %v463_v11, %v465_v26  ;;  %v10202_v61 = vrot.slane %v8334_v38, 1 }
  0xf6   : > { %v1527_v12 = vpack.c.bf16 %v8486_v3, %v531_v6  ;;  %2159 = vmatpush2.bf16.msra.mxu1 %v7086_v62  ;;  %v480_v62 = vsel %vm474_vm0, %v465_v26, %v467_v35 }
  0xf7   : > { %v1528_v13 = vpack.c.bf16 %v534_v4, %v532_v7  ;;  %v8502_v15 = vpop.permute.xlu1 %503  ;;  %v8508_v20 = vpop.permute.xlu0 %528  ;;  %2274 = vmatprep.subr.bf16.mxu1 %v7094_v8 }
  0xf8   : > { %10186 = vst [vmem:[#allocation20_spill] sm:$0xff] %v8502_v15  ;;  %10187 = vst [vmem:[#allocation21_spill] sm:$0xff] %v8508_v20  ;;  %v8511_v24 = vmul.f32 %v8508_v20, %v475_v9  ;;  %v8521_v32 = vmul.f32 %v8508_v20, %v476_v14  ;;  %v535_v40 = vmul.f32 %v8502_v15, %v485_v16  ;;  %v464_v9 = vrot.slane %v8430_v51, 7  ;;  %v7109_v14 = vld [vmem:[#allocation6 + $0x254] ss:$8 sps:$4 sm:$0xff]  }
  0xf9   : > { %2160 = vmatprep.mubr.bf16.mxu1 %v1528_v13  ;;  %v536_v42 = vmul.f32 %v8502_v15, %v486_v17  ;;  %v478_v51 = vsel %vm474_vm0, %v467_v35, %v469_v19  ;;  %v7110_v19 = vld [vmem:[#allocation6 + $0x540] ss:$8 sps:$4 sm:$0xff]   ;;  %v7418_v15 = vld [vmem:[#allocation8 + $0x24] ss:$8 sps:$4 sm:$0xff]  }
  0xfa   : > { %2161 = vmatmul.mubr.bf16.vlgmr.msra.gmra.mxu1 %v1527_v12  ;;  %v8527_v45 = vpack.c.bf16 %v531_v6, %v8511_v24  ;;  %v8532_v48 = vpack.c.bf16 %v532_v7, %v8521_v32  ;;  %v7104_v12 = vld [vmem:[#allocation6 + $0x550] ss:$8 sps:$4 sm:$0xff]   ;;  %v479_v16 = vsel %vm474_vm0, %v464_v9, %v466_v18  ;;  %v8565_v26 = vpack.c.bf16 %v535_v40, %v8486_v3 }
  0xfb   : > { %v8529_v47 = vpop.permute.xlu0 %508  ;;  %2275 = vmatpush1.bf16.msra.mxu1 %v7092_v21  ;;  %v8534_v52 = vpop.permute.xlu1 %513  ;;  %v8548_v8 = vpack.c.bf16 %v536_v42, %v534_v4  ;;  %v7112_v4 = vld [vmem:[#allocation6 + $0x544] ss:$8 sps:$4 sm:$0xff]  }
  0xfc   : > { %10188 = vst [vmem:[#allocation22_spill] sm:$0xff] %v8529_v47  ;;  %10189 = vst [vmem:[#allocation23_spill] sm:$0xff] %v8534_v52  ;;  %v8537_v53 = vmul.f32 %v8529_v47, %v483_v28  ;;  %v538_v55 = vmul.f32 %v8529_v47, %v484_v31  ;;  %2276 = vmatprep.subr.bf16.mxu1 %v7100_v27  ;;  %1268 = vmatprep.mubr.bf16.mxu0 %v8532_v48  ;;  %v7107_v28 = vld [vmem:[#allocation6 + $0x250] ss:$8 sps:$4 sm:$0xff]  }
  0xfd   : > { %1269 = vmatmul.mubr.bf16.vlgmr.msra.gmra.mxu0 %v8527_v45  ;;  %v540_v0 = vmul.f32 %v8534_v52, %v482_v58  ;;  %v481_v27 = vsel %vm474_vm0, %v462_v10, %v464_v9  ;;  %v550_v58 = vrot.slane %v8390_v22, 1 }
  0xfe   : > { %v1534_v6 = vpack.c.bf16 %v538_v55, %v536_v42  ;;  %v1533_v7 = vpack.c.bf16 %v8537_v53, %v535_v40  ;;  %1383 = vmatpush1.bf16.msra.mxu0 %v7095_v44  ;;  %1278 = vmatprep.mubr.bf16.mxu0 %v8548_v8  ;;  %v7118_v40 = vld [vmem:[#allocation6 + $0x534] ss:$8 sps:$4 sm:$0xff]   ;;  %v539_v10 = vmul.f32 %v8534_v52, %v481_v27  ;;  %v552_v44 = vrot.slane %v8393_v23, 1  ;;  %v7185_v23 = vld [vmem:[#allocation6 + $0x280] ss:$8 sps:$4 sm:$0xff]  }
  0xff   : > { %v8551_v11 = vpop.permute.xlu0 %518  ;;  %2277 = vmatpush1.bf16.msra.mxu1 %v7098_v49  ;;  %1384 = vmatprep.subr.bf16.mxu0 %v7103_v56  ;;  %v8557_v17 = vpop.permute.xlu1 %523  ;;  %v8577_v3 = vpack.c.bf16 %v540_v0, %v538_v55  ;;  %v7113_v49 = vld [vmem:[#allocation6 + $0x240] ss:$8 sps:$4 sm:$0xff]   ;;  %v548_v56 = vrot.slane %v8331_v37, 1  ;;  %v10070_v37 = vrot.slane %v8334_v38, 1 }
 0x100   : > { %10190 = vst [vmem:[#allocation24_spill] sm:$0xff] %v8551_v11  ;;  %v542_v13 = vmul.f32 %v8551_v11, %v480_v62  ;;  %2170 = vmatprep.mubr.bf16.mxu1 %v1534_v6  ;;  %2278 = vmatprep.subr.bf16.mxu1 %v7106_v63  ;;  %10191 = vst [vmem:[#allocation25_spill] sm:$0xff] %v8557_v17  ;;  %v8572_v31 = vmul.f32 %v8551_v11, %v479_v16  ;;  %v7116_v62 = vld [vmem:[#allocation6 + $0x530] ss:$8 sps:$4 sm:$0xff]   ;;  %v7121_v6 = vld [vmem:[#allocation6 + $0x234] ss:$8 sps:$4 sm:$0xff]  }
 0x101   : > { %v544_v35 = vmul.f32 %v8557_v17, %v478_v51  ;;  %v477_v63 = vsel %vm474_vm0, %v466_v18, %v468_v33  ;;  %v575_v1 = vsel %vm563_vm1, %v550_v58, %v552_v44  ;;  %v7119_v33 = vld [vmem:[#allocation6 + $0x230] ss:$8 sps:$4 sm:$0xff]   ;;  %v8603_v9 = vpack.c.bf16 %v539_v10, %v8537_v53  ;;  %v7127_v16 = vld [vmem:[#allocation6 + $0x224] ss:$8 sps:$4 sm:$0xff]   ;;  %v7125_v53 = vld [vmem:[#allocation6 + $0x220] ss:$8 sps:$4 sm:$0xff]  }
 0x102   : > { %2171 = vmatmul.mubr.bf16.gmra.mxu1 %v1533_v7  ;;  %v1540_v21 = vpack.c.bf16 %v542_v13, %v540_v0  ;;  %1385 = vmatpush1.bf16.msra.mxu0 %v7101_v2  ;;  %v1539_v55 = vpack.c.bf16 %v8572_v31, %v539_v10  ;;  %v7124_v7 = vld [vmem:[#allocation6 + $0x524] ss:$8 sps:$4 sm:$0xff]   ;;  %v543_v18 = vmul.f32 %v8557_v17, %v477_v63  ;;  %v7131_v10 = vld [vmem:[#allocation6 + $0x210] ss:$8 sps:$4 sm:$0xff]   ;;  %v10203_v17 = vrot.slane %v8437_v54, 1 }
 0x103   : > { %2279 = vmatpush1.bf16.msra.mxu1 %v7104_v12  ;;  %v8574_v42 = vpop.permute.xlu0 %582  ;;  %1386 = vmatprep.subr.bf16.mxu0 %v7109_v14  ;;  %v1546_v2 = vpack.c.bf16 %v8521_v32, %v544_v35  ;;  %v577_v32 = vsel %vm563_vm1, %v548_v56, %v550_v58  ;;  %v7122_v12 = vld [vmem:[#allocation6 + $0x520] ss:$8 sps:$4 sm:$0xff]   ;;  %v8608_v14 = vpack.c.bf16 %v544_v35, %v542_v13  ;;  %v8610_v51 = vpop.permute.xlu1 %617  ;;  %v7128_v13 = vld [vmem:[#allocation6 + $0x510] ss:$8 sps:$4 sm:$0xff]  }
 0x104   : > { %10192 = vst [vmem:[#allocation26_spill] sm:$0xff] %v8574_v42  ;;  %2180 = vmatprep.mubr.bf16.mxu1 %v1540_v21  ;;  %2280 = vmatprep.subr.bf16.mxu1 %v7112_v4  ;;  %v7130_v4 = vld [vmem:[#allocation6 + $0x514] ss:$8 sps:$4 sm:$0xff]   ;;  %10194 = vst [vmem:[#allocation28_spill] sm:$0xff] %v8610_v51  ;;  %v579_v21 = vsel %vm563_vm1, %v10070_v37, %v548_v56  ;;  %v621_v27 = vmul.f32 %v8574_v42, %v577_v32  ;;  %v7140_v63 = vld [vmem:[#allocation6 + $0x5f0] ss:$8 sps:$4 sm:$0xff]  }
 0x105   : > { %1279 = vmatmul.mubr.bf16.gmra.mxu0 %v8565_v26  ;;  %v8621_v35 = vmul.f32 %v8610_v51, %v579_v21  ;;  %v8625_v56 = vpack.c.bf16 %v543_v18, %v8572_v31  ;;  %v7143_v31 = vld [vmem:[#allocation6 + $0x2f0] ss:$8 sps:$4 sm:$0xff]   ;;  %v7158_v21 = vld [vmem:[#allocation6 + $0x5c0] ss:$8 sps:$4 sm:$0xff]  }
 0x106   : > { %1387 = vmatpush1.bf16.msra.mxu0 %v7107_v28  ;;  %1288 = vmatprep.mubr.bf16.mxu0 %v8577_v3  ;;  %v1545_v28 = vpack.c.bf16 %v8511_v24, %v543_v18  ;;  %v7139_v24 = vld [vmem:[#allocation6 + $0x204] ss:$8 sps:$4 sm:$0xff]   ;;  %v7149_v18 = vld [vmem:[#allocation6 + $0x2e0] ss:$8 sps:$4 sm:$0xff]   ;;  %v7152_v32 = vld [vmem:[#allocation6 + $0x5d0] ss:$8 sps:$4 sm:$0xff]  }
 0x107   : > { %2281 = vmatpush1.bf16.msra.mxu1 %v7110_v19  ;;  %1388 = vmatprep.subr.bf16.mxu0 %v7115_v50  ;;  %v8593_v22 = vpop.permute.xlu0 %587  ;;  %v7133_v19 = vld [vmem:[#allocation6 + $0x214] ss:$8 sps:$4 sm:$0xff]   ;;  %v8628_v58 = vpack.c.bf16 %v621_v27, %v8621_v35  ;;  %v7188_v37 = vld [vmem:[#allocation6 + $0x470] ss:$8 sps:$4 sm:$0xff]  }
 0x108   : > { %2282 = vmatprep.subr.bf16.mxu1 %v7118_v40  ;;  %10193 = vst [vmem:[#allocation27_spill] sm:$0xff] %v8593_v22  ;;  %v8606_v0 = vmul.f32 %v8593_v22, %v575_v1  ;;  %v7136_v40 = vld [vmem:[#allocation6 + $0x504] ss:$8 sps:$4 sm:$0xff]  }
 0x109   : > { %v7151_v1 = vld [vmem:[#allocation6 + $0x2e4] ss:$8 sps:$4 sm:$0xff]  }
 0x10a   : > { %2181 = vmatmul.mubr.bf16.gmra.mxu1 %v1539_v55  ;;  %1389 = vmatpush1.bf16.msra.mxu0 %v7113_v49  ;;  %v1532_v50 = vpack.c.bf16 %v8606_v0, %v621_v27  ;;  %v7134_v49 = vld [vmem:[#allocation6 + $0x500] ss:$8 sps:$4 sm:$0xff]   ;;  %v7142_v55 = vld [vmem:[#allocation6 + $0x5f4] ss:$8 sps:$4 sm:$0xff]  }
 0x10b   : > { %2190 = vmatprep.mubr.bf16.mxu1 %v1546_v2  ;;  %2283 = vmatpush1.bf16.msra.mxu1 %v7116_v62  ;;  %v7137_v62 = vld [vmem:[#allocation6 + $0x200] ss:$8 sps:$4 sm:$0xff]   ;;  %v7145_v2 = vld [vmem:[#allocation6 + $0x2f4] ss:$8 sps:$4 sm:$0xff]  }
 0x10c   : > { %1390 = vmatprep.subr.bf16.mxu0 %v7121_v6  ;;  %2284 = vmatprep.subr.bf16.mxu1 %v7124_v7  ;;  %v7148_v6 = vld [vmem:[#allocation6 + $0x5e4] ss:$8 sps:$4 sm:$0xff]   ;;  %v7146_v7 = vld [vmem:[#allocation6 + $0x5e0] ss:$8 sps:$4 sm:$0xff]   ;;  %v7166_v27 = vld [vmem:[#allocation6 + $0x5b4] ss:$8 sps:$4 sm:$0xff]  }
 0x10d   : > { %1289 = vmatmul.mubr.bf16.gmra.mxu0 %v8603_v9 }
 0x10e   : > { %1391 = vmatpush1.bf16.msra.mxu0 %v7119_v33  ;;  %1298 = vmatprep.mubr.bf16.mxu0 %v8608_v14  ;;  %v7154_v33 = vld [vmem:[#allocation6 + $0x5d4] ss:$8 sps:$4 sm:$0xff]  }
 0x10f   : > { %2285 = vmatpush1.bf16.msra.mxu1 %v7122_v12  ;;  %1392 = vmatprep.subr.bf16.mxu0 %v7127_v16  ;;  %v7157_v12 = vld [vmem:[#allocation6 + $0x2d4] ss:$8 sps:$4 sm:$0xff]   ;;  %v7160_v16 = vld [vmem:[#allocation6 + $0x5c4] ss:$8 sps:$4 sm:$0xff]  }
 0x110   : > { %2286 = vmatprep.subr.bf16.mxu1 %v7130_v4  ;;  %v7155_v4 = vld [vmem:[#allocation6 + $0x2d0] ss:$8 sps:$4 sm:$0xff]  }
 0x112   : > { %2191 = vmatmul.mubr.bf16.gmra.mxu1 %v1545_v28  ;;  %1393 = vmatpush1.bf16.msra.mxu0 %v7125_v53  ;;  %v7163_v53 = vld [vmem:[#allocation6 + $0x2c4] ss:$8 sps:$4 sm:$0xff]   ;;  %v7164_v28 = vld [vmem:[#allocation6 + $0x5b0] ss:$8 sps:$4 sm:$0xff]  }
 0x113   : > { %2306 = vmatprep.mubr.bf16.mxu1 %v1532_v50  ;;  %2287 = vmatpush1.bf16.msra.mxu1 %v7128_v13  ;;  %v7161_v13 = vld [vmem:[#allocation6 + $0x2c0] ss:$8 sps:$4 sm:$0xff]   ;;  %v7172_v50 = vld [vmem:[#allocation6 + $0x5a4] ss:$8 sps:$4 sm:$0xff]  }
 0x114   : > { %1394 = vmatprep.subr.bf16.mxu0 %v7133_v19  ;;  %2288 = vmatprep.subr.bf16.mxu1 %v7136_v40  ;;  %v7169_v19 = vld [vmem:[#allocation6 + $0x2b4] ss:$8 sps:$4 sm:$0xff]   ;;  %v7167_v40 = vld [vmem:[#allocation6 + $0x2b0] ss:$8 sps:$4 sm:$0xff]  }
 0x115   : > { %1299 = vmatmul.mubr.bf16.gmra.mxu0 %v8625_v56 }
 0x116   : > { %1395 = vmatpush1.bf16.msra.mxu0 %v7131_v10  ;;  %1414 = vmatprep.mubr.bf16.mxu0 %v8628_v58  ;;  %v7170_v10 = vld [vmem:[#allocation6 + $0x5a0] ss:$8 sps:$4 sm:$0xff]  }
 0x117   : > { %2289 = vmatpush1.bf16.msra.mxu1 %v7134_v49  ;;  %1396 = vmatprep.subr.bf16.mxu0 %v7139_v24  ;;  %v7175_v49 = vld [vmem:[#allocation6 + $0x2a4] ss:$8 sps:$4 sm:$0xff]   ;;  %v7178_v24 = vld [vmem:[#allocation6 + $0x594] ss:$8 sps:$4 sm:$0xff]  }
 0x118   : > { %2290 = vmatprep.subr.bf16.mxu1 %v7142_v55  ;;  %v8633_v55 = vld [vmem:[%s8262_s28] sm:$0xff] }
 0x11a   : > { %1397 = vmatpush1.bf16.msra.mxu0 %v7137_v62  ;;  %v547_v62 = vrot.slane %v8633_v55, 1 }
 0x11b   : > { %2291 = vmatpush2.bf16.msra.mxu1 %v7140_v63  ;;  %1398 = vmatprep.subr.bf16.mxu0 %v7145_v2  ;;  %v551_v63 = vrot.slane %v8408_v34, 1  ;;  %v10071_v2 = vrot.slane %v8415_v39, 1 }
 0x11c   : > { %2292 = vmatprep.subr.bf16.mxu1 %v7148_v6  ;;  %v7173_v6 = vld [vmem:[#allocation6 + $0x2a0] ss:$8 sps:$4 sm:$0xff]  }
 0x11e   : > { %1399 = vmatpush2.bf16.msra.mxu0 %v7143_v31  ;;  %v7176_v31 = vld [vmem:[#allocation6 + $0x590] ss:$8 sps:$4 sm:$0xff]  }
 0x11f   : > { %2293 = vmatpush2.bf16.msra.mxu1 %v7146_v7  ;;  %1400 = vmatprep.subr.bf16.mxu0 %v7151_v1  ;;  %v8639_v7 = vld [vmem:[%s8262_s28 + $0x10] sm:$0xff] }
 0x120   : > { %2294 = vmatprep.subr.bf16.mxu1 %v7154_v33  ;;  %v549_v1 = vrot.slane %v8639_v7, 1  ;;  %v7181_v33 = vld [vmem:[#allocation6 + $0x294] ss:$8 sps:$4 sm:$0xff]  }
 0x122   : > { %1401 = vmatpush2.bf16.msra.mxu0 %v7149_v18  ;;  %v7184_v18 = vld [vmem:[#allocation6 + $0x584] ss:$8 sps:$4 sm:$0xff]   ;;  %v574_v34 = vsel %vm563_vm1, %v549_v1, %v551_v63 }
 0x123   : > { %2295 = vmatpush2.bf16.msra.mxu1 %v7152_v32  ;;  %1402 = vmatprep.subr.bf16.mxu0 %v7157_v12  ;;  %v8643_v32 = vld [vmem:[%s8262_s28 + $0x70] sm:$0xff] }
 0x124   : > { %2296 = vmatprep.subr.bf16.mxu1 %v7160_v16  ;;  %v10069_v12 = vrot.slane %v8643_v32, 1  ;;  %v554_v16 = vrot.slane %v8412_v36, 1  ;;  %v7187_v36 = vld [vmem:[#allocation6 + $0x284] ss:$8 sps:$4 sm:$0xff]  }
 0x126   : > { %1403 = vmatpush2.bf16.msra.mxu0 %v7155_v4  ;;  %v8649_v4 = vpop.permute.xlu0 %597 }
 0x127   : > { %2297 = vmatpush2.bf16.msra.mxu1 %v7158_v21  ;;  %1404 = vmatprep.subr.bf16.mxu0 %v7163_v53  ;;  %10195 = vst [vmem:[#allocation29_spill] sm:$0xff] %v8649_v4  ;;  %v571_v21 = vsel %vm563_vm1, %v554_v16, %v10071_v2  ;;  %v7179_v53 = vld [vmem:[#allocation6 + $0x290] ss:$8 sps:$4 sm:$0xff]  }
 0x128   : > { %2298 = vmatprep.subr.bf16.mxu1 %v7166_v27  ;;  %v7182_v27 = vld [vmem:[#allocation6 + $0x580] ss:$8 sps:$4 sm:$0xff]  }
 0x12a   : > { %1405 = vmatpush2.bf16.msra.mxu0 %v7161_v13  ;;  %v576_v13 = vsel %vm563_vm1, %v547_v62, %v549_v1  ;;  %v7190_v1 = vld [vmem:[#allocation6 + $0x474] ss:$8 sps:$4 sm:$0xff]  }
 0x12b   : > { %2299 = vmatpush2.bf16.msra.mxu1 %v7164_v28  ;;  %1406 = vmatprep.subr.bf16.mxu0 %v7169_v19  ;;  %v7241_v28 = vld [vmem:[#allocation6 + $0x774] ss:$8 sps:$4 sm:$0xff]   ;;  %v578_v19 = vsel %vm563_vm1, %v10069_v12, %v547_v62  ;;  %v620_v62 = vmul.f32 %v8574_v42, %v576_v13  ;;  %v10199_v42 = vrot.slane %v8415_v39, 1 }
 0x12c   : > { %2300 = vmatprep.subr.bf16.mxu1 %v7172_v50  ;;  %v8661_v50 = vpop.permute.xlu1 %592  ;;  %v8689_v12 = vld [vmem:[%s8262_s28 + $0x58] sm:$0xff] }
 0x12d   : > { %10196 = vst [vmem:[#allocation30_spill] sm:$0xff] %v8661_v50  ;;  %v7196_v39 = vld [vmem:[#allocation6 + $0x454] ss:$8 sps:$4 sm:$0xff]  }
 0x12e   : > { %1407 = vmatpush2.bf16.msra.mxu0 %v7167_v40  ;;  %v573_v40 = vsel %vm563_vm1, %v552_v44, %v554_v16  ;;  %v8680_v44 = vmul.f32 %v8610_v51, %v578_v19 }
 0x12f   : > { %2301 = vmatpush2.bf16.msra.mxu1 %v7170_v10  ;;  %1408 = vmatprep.subr.bf16.mxu0 %v7175_v49  ;;  %v8668_v10 = vmul.f32 %v8593_v22, %v574_v34  ;;  %v8671_v49 = vld [vmem:[%s8262_s28 + $0x40] sm:$0xff]  ;;  %v625_v16 = vmul.f32 %v8661_v50, %v573_v40  ;;  %v7239_v34 = vld [vmem:[#allocation6 + $0x770] ss:$8 sps:$4 sm:$0xff]  }
 0x130   : > { %2302 = vmatprep.subr.bf16.mxu1 %v7178_v24  ;;  %v10074_v24 = vrot.slane %v8671_v49, 1  ;;  %v7193_v40 = vld [vmem:[#allocation6 + $0x464] ss:$8 sps:$4 sm:$0xff]   ;;  %v8708_v51 = vpop.permute.xlu1 %602 }
 0x131   : > { %v1531_v13 = vpack.c.bf16 %v8668_v10, %v620_v62  ;;  %10198 = vst [vmem:[#allocation32_spill] sm:$0xff] %v8708_v51 }
 0x132   : > { %1409 = vmatpush2.bf16.msra.mxu0 %v7173_v6  ;;  %v8675_v6 = vmul.f32 %v8649_v4, %v571_v21  ;;  %v7247_v21 = vld [vmem:[#allocation6 + $0x764] ss:$8 sps:$4 sm:$0xff]  }
 0x133   : > { %2303 = vmatpush2.bf16.msra.mxu1 %v7176_v31  ;;  %1410 = vmatprep.subr.bf16.mxu0 %v7181_v33  ;;  %v10081_v31 = vrot.slane %v8437_v54, 1  ;;  %v8683_v33 = vld [vmem:[%s8262_s28 + $0x30] sm:$0xff] }
 0x134   : > { %2304 = vmatprep.subr.bf16.mxu1 %v7184_v18  ;;  %v553_v18 = vrot.slane %v8683_v33, 1  ;;  %v1538_v2 = vpack.c.bf16 %v8675_v6, %v625_v16  ;;  %v7263_v54 = vld [vmem:[#allocation6 + $0x730] ss:$8 sps:$4 sm:$0xff]  }
 0x136   : > { %1411 = vmatpush2.bf16.msra.mxu0 %v7179_v53  ;;  %v558_v53 = vrot.slane %v8689_v12, 1  ;;  %v570_v19 = vsel %vm563_vm1, %v553_v18, %v10074_v24  ;;  %v572_v22 = vsel %vm563_vm1, %v551_v63, %v553_v18  ;;  %v7245_v24 = vld [vmem:[#allocation6 + $0x760] ss:$8 sps:$4 sm:$0xff]  }
 0x137   : > { %2305 = vmatpush2.bf16.msra.mxu1 %v7182_v27  ;;  %1412 = vmatprep.subr.bf16.mxu0 %v7187_v36  ;;  %v8697_v27 = vpop.permute.xlu0 %607  ;;  %v8719_v63 = vld [vmem:[%s8262_s28 + $0x60] sm:$0xff] }
 0x138   : > { %3045 = vmatprep.subr.bf16.mxu1 %v7241_v28  ;;  %10197 = vst [vmem:[#allocation31_spill] sm:$0xff] %v8697_v27  ;;  %v567_v36 = vsel %vm563_vm1, %v558_v53, %v10081_v31  ;;  %v8704_v28 = vpack.c.bf16 %v620_v62, %v8680_v44  ;;  %v569_v20 = vsel %vm563_vm1, %v10199_v42, %v558_v53  ;;  %v7191_v62 = vld [vmem:[#allocation6 + $0x460] ss:$8 sps:$4 sm:$0xff]   ;;  %v7253_v31 = vld [vmem:[#allocation6 + $0x754] ss:$8 sps:$4 sm:$0xff]  }
 0x139   : > { %v624_v42 = vmul.f32 %v8661_v50, %v572_v22  ;;  %v7199_v22 = vld [vmem:[#allocation6 + $0x444] ss:$8 sps:$4 sm:$0xff]  }
 0x13a   : > { %1413 = vmatpush2.bf16.msra.mxu0 %v7185_v23  ;;  %2307 = vmatmul.mubr.bf16.vlgmr.msra.gmra.mxu1 %v1531_v13  ;;  %v626_v23 = vmul.f32 %v8649_v4, %v570_v19  ;;  %v8716_v13 = vpack.c.bf16 %v625_v16, %v8606_v0  ;;  %v8727_v0 = vld [vmem:[%s8262_s28 + $0x50] sm:$0xff]  ;;  %v629_v16 = vmul.f32 %v8708_v51, %v569_v20 }
 0x13b   : > { %2316 = vmatprep.mubr.bf16.mxu1 %v1538_v2  ;;  %2201 = vmatprep.subr.bf16.mxu0 %v7190_v1  ;;  %v559_v2 = vrot.slane %v8719_v63, 1  ;;  %v631_v1 = vmul.f32 %v8697_v27, %v567_v36  ;;  %v557_v18 = vrot.slane %v8727_v0, 1  ;;  %v7194_v19 = vld [vmem:[#allocation6 + $0x450] ss:$8 sps:$4 sm:$0xff]   ;;  %v7259_v36 = vld [vmem:[#allocation6 + $0x744] ss:$8 sps:$4 sm:$0xff]   ;;  %v8738_v20 = vpack.c.bf16 %v624_v42, %v8668_v10 }
 0x13c   : > { %3046 = vmatpush1.bf16.msra.mxu1 %v7239_v34  ;;  %v7251_v34 = vld [vmem:[#allocation6 + $0x750] ss:$8 sps:$4 sm:$0xff]   ;;  %v1537_v53 = vpack.c.bf16 %v626_v23, %v624_v42  ;;  %v7265_v10 = vld [vmem:[#allocation6 + $0x734] ss:$8 sps:$4 sm:$0xff]  }
 0x13d   : > { %1415 = vmatmul.mubr.bf16.vlgmr.msra.gmra.mxu0 %v8704_v28  ;;  %3047 = vmatprep.subr.bf16.mxu1 %v7247_v21  ;;  %v566_v21 = vsel %vm563_vm1, %v557_v18, %v559_v2  ;;  %v1544_v4 = vpack.c.bf16 %v631_v1, %v629_v16 }
 0x13e   : > { %1424 = vmatprep.mubr.bf16.mxu0 %v8716_v13  ;;  %2202 = vmatpush1.bf16.msra.mxu0 %v7188_v37  ;;  %v10200_v37 = vrot.slane %v8671_v49, 1 }
 0x13f   : > { %2203 = vmatprep.subr.bf16.mxu0 %v7193_v40  ;;  %v8740_v40 = vpop.permute.xlu1 %612 }
 0x140   : > { %3048 = vmatpush1.bf16.msra.mxu1 %v7245_v24  ;;  %v568_v50 = vsel %vm563_vm1, %v10200_v37, %v557_v18  ;;  %v7257_v24 = vld [vmem:[#allocation6 + $0x740] ss:$8 sps:$4 sm:$0xff]   ;;  %10201 = vst [vmem:[#allocation33_spill] sm:$0xff] %v8740_v40  ;;  %v7277_v37 = vld [vmem:[#allocation6 + $0x714] ss:$8 sps:$4 sm:$0xff]  }
 0x141   : > { %3049 = vmatprep.subr.bf16.mxu1 %v7253_v31  ;;  %v565_v31 = vsel %vm563_vm1, %v10203_v17, %v10202_v61  ;;  %v628_v42 = vmul.f32 %v8708_v51, %v568_v50  ;;  %v7200_v17 = vld [vmem:[#allocation6 + $0x430] ss:$8 sps:$4 sm:$0xff]  }
 0x142   : > { %2204 = vmatpush1.bf16.msra.mxu0 %v7191_v62  ;;  %2317 = vmatmul.mubr.bf16.gmra.mxu1 %v1537_v53  ;;  %v630_v62 = vmul.f32 %v8697_v27, %v566_v21  ;;  %v8750_v53 = vpack.c.bf16 %v629_v16, %v8675_v6  ;;  %v633_v38 = vmul.f32 %v8740_v40, %v565_v31  ;;  %v7271_v6 = vld [vmem:[#allocation6 + $0x724] ss:$8 sps:$4 sm:$0xff]   ;;  %v7412_v27 = vld [vmem:[#allocation8 + $0x34] ss:$8 sps:$4 sm:$0xff]  }
 0x143   : > { %2326 = vmatprep.mubr.bf16.mxu1 %v1544_v4  ;;  %2205 = vmatprep.subr.bf16.mxu0 %v7196_v39  ;;  %v7197_v4 = vld [vmem:[#allocation6 + $0x440] ss:$8 sps:$4 sm:$0xff]   ;;  %v7202_v39 = vld [vmem:[#allocation6 + $0x434] ss:$8 sps:$4 sm:$0xff]   ;;  %v7205_v16 = vld [vmem:[#allocation6 + $0x424] ss:$8 sps:$4 sm:$0xff]  }
 0x144   : > { %3050 = vmatpush1.bf16.msra.mxu1 %v7251_v34  ;;  %v1543_v61 = vpack.c.bf16 %v630_v62, %v628_v42  ;;  %v1550_v18 = vpack.c.bf16 %v8621_v35, %v633_v38  ;;  %v10204_v34 = vrot.slane %v8643_v32, 1  ;;  %v8763_v21 = vpack.c.bf16 %v633_v38, %v631_v1  ;;  %v7208_v35 = vld [vmem:[#allocation6 + $0x414] ss:$8 sps:$4 sm:$0xff]   ;;  %v7206_v1 = vld [vmem:[#allocation6 + $0x410] ss:$8 sps:$4 sm:$0xff]  }
 0x145   : > { %1425 = vmatmul.mubr.bf16.gmra.mxu0 %v8738_v20  ;;  %3051 = vmatprep.subr.bf16.mxu1 %v7259_v36  ;;  %v7269_v36 = vld [vmem:[#allocation6 + $0x720] ss:$8 sps:$4 sm:$0xff]   ;;  %v7283_v31 = vld [vmem:[#allocation6 + $0x704] ss:$8 sps:$4 sm:$0xff]  }
 0x146   : > { %1434 = vmatprep.mubr.bf16.mxu0 %v8750_v53  ;;  %2206 = vmatpush1.bf16.msra.mxu0 %v7194_v19  ;;  %v564_v50 = vsel %vm563_vm1, %v559_v2, %v10204_v34  ;;  %v8761_v19 = vpack.c.bf16 %v628_v42, %v626_v23  ;;  %v7275_v23 = vld [vmem:[#allocation6 + $0x710] ss:$8 sps:$4 sm:$0xff]   ;;  %v7293_v34 = vld [vmem:[#allocation6 + $0x7e0] ss:$8 sps:$4 sm:$0xff]  }
 0x147   : > { %2207 = vmatprep.subr.bf16.mxu0 %v7199_v22  ;;  %v7203_v22 = vld [vmem:[#allocation6 + $0x420] ss:$8 sps:$4 sm:$0xff]  }
 0x148   : > { %3052 = vmatpush1.bf16.msra.mxu1 %v7257_v24  ;;  %v632_v24 = vmul.f32 %v8740_v40, %v564_v50  ;;  %v7301_v50 = vld [vmem:[#allocation6 + $0x7d4] ss:$8 sps:$4 sm:$0xff]  }
 0x149   : > { %3053 = vmatprep.subr.bf16.mxu1 %v7265_v10  ;;  %v7820_v10 = vld [vmem:[%s8262_s28 + $0x8] sm:$0xff] }
 0x14a   : > { %2208 = vmatpush1.bf16.msra.mxu0 %v7197_v4  ;;  %2327 = vmatmul.mubr.bf16.gmra.mxu1 %v1543_v61  ;;  %v1549_v2 = vpack.c.bf16 %v8680_v44, %v632_v24  ;;  %v7211_v4 = vld [vmem:[#allocation6 + $0x404] ss:$8 sps:$4 sm:$0xff]   ;;  %v8771_v38 = vpack.c.bf16 %v632_v24, %v630_v62  ;;  %v7209_v61 = vld [vmem:[#allocation6 + $0x400] ss:$8 sps:$4 sm:$0xff]   ;;  %v7214_v44 = vld [vmem:[#allocation6 + $0x4f4] ss:$8 sps:$4 sm:$0xff]  }
 0x14b   : > { %2336 = vmatprep.mubr.bf16.mxu1 %v1550_v18  ;;  %2209 = vmatprep.subr.bf16.mxu0 %v7202_v39  ;;  %v7821_v39 = vld [vmem:[%s8262_s28 + $0x18] sm:$0xff]  ;;  %v7217_v62 = vld [vmem:[#allocation6 + $0x4e4] ss:$8 sps:$4 sm:$0xff]  }
 0x14c   : > { %3054 = vmatpush1.bf16.msra.mxu1 %v7263_v54  ;;  %v1530_v42 = vpack.c.bf16 %v7821_v39, %v7820_v10  ;;  %v7281_v54 = vld [vmem:[#allocation6 + $0x700] ss:$8 sps:$4 sm:$0xff]   ;;  %v7212_v18 = vld [vmem:[#allocation6 + $0x4f0] ss:$8 sps:$4 sm:$0xff]   ;;  %v7223_v24 = vld [vmem:[#allocation6 + $0x4c4] ss:$8 sps:$4 sm:$0xff]  }
 0x14d   : > { %1435 = vmatmul.mubr.bf16.gmra.mxu0 %v8761_v19  ;;  %3055 = vmatprep.subr.bf16.mxu1 %v7271_v6  ;;  %v7287_v6 = vld [vmem:[#allocation6 + $0x7f0] ss:$8 sps:$4 sm:$0xff]   ;;  %v7319_v10 = vld [vmem:[#allocation6 + $0x7a4] ss:$8 sps:$4 sm:$0xff]  }
 0x14e   : > { %1444 = vmatprep.mubr.bf16.mxu0 %v8763_v21  ;;  %2210 = vmatpush1.bf16.msra.mxu0 %v7200_v17  ;;  %v7289_v17 = vld [vmem:[#allocation6 + $0x7f4] ss:$8 sps:$4 sm:$0xff]   ;;  %v7224_v39 = vld [vmem:[#allocation6 + $0x4b0] ss:$8 sps:$4 sm:$0xff]  }
 0x14f   : > { %2211 = vmatprep.subr.bf16.mxu0 %v7205_v16  ;;  %v7295_v16 = vld [vmem:[#allocation6 + $0x7e4] ss:$8 sps:$4 sm:$0xff]  }
 0x150   : > { %3056 = vmatpush1.bf16.msra.mxu1 %v7269_v36  ;;  %v7220_v36 = vld [vmem:[#allocation6 + $0x4d4] ss:$8 sps:$4 sm:$0xff]  }
 0x151   : > { %3057 = vmatprep.subr.bf16.mxu1 %v7277_v37  ;;  %v7307_v37 = vld [vmem:[#allocation6 + $0x7c4] ss:$8 sps:$4 sm:$0xff]  }
 0x152   : > { %2212 = vmatpush1.bf16.msra.mxu0 %v7203_v22  ;;  %2337 = vmatmul.mubr.bf16.gmra.mxu1 %v1549_v2  ;;  %v7299_v22 = vld [vmem:[#allocation6 + $0x7d0] ss:$8 sps:$4 sm:$0xff]   ;;  %v7313_v2 = vld [vmem:[#allocation6 + $0x7b4] ss:$8 sps:$4 sm:$0xff]  }
 0x153   : > { %2213 = vmatprep.subr.bf16.mxu0 %v7208_v35  ;;  %3077 = vmatprep.mubr.bf16.mxu1 %v8401_v29  ;;  %v7215_v29 = vld [vmem:[#allocation6 + $0x4e0] ss:$8 sps:$4 sm:$0xff]   ;;  %v7218_v35 = vld [vmem:[#allocation6 + $0x4d0] ss:$8 sps:$4 sm:$0xff]  }
 0x154   : > { %3058 = vmatpush1.bf16.msra.mxu1 %v7275_v23  ;;  %v7305_v23 = vld [vmem:[#allocation6 + $0x7c0] ss:$8 sps:$4 sm:$0xff]  }
 0x155   : > { %1445 = vmatmul.mubr.bf16.gmra.mxu0 %v8771_v38  ;;  %3059 = vmatprep.subr.bf16.mxu1 %v7283_v31  ;;  %v7226_v31 = vld [vmem:[#allocation6 + $0x4b4] ss:$8 sps:$4 sm:$0xff]  }
 0x156   : > { %2214 = vmatpush1.bf16.msra.mxu0 %v7206_v1  ;;  %2233 = vmatprep.mubr.bf16.mxu0 %v1530_v42  ;;  %v7221_v1 = vld [vmem:[#allocation6 + $0x4c0] ss:$8 sps:$4 sm:$0xff]   ;;  %v7229_v42 = vld [vmem:[#allocation6 + $0x4a4] ss:$8 sps:$4 sm:$0xff]  }
 0x157   : > { %2215 = vmatprep.subr.bf16.mxu0 %v7211_v4  ;;  %v7311_v4 = vld [vmem:[#allocation6 + $0x7b0] ss:$8 sps:$4 sm:$0xff]  }
 0x158   : > { %3060 = vmatpush1.bf16.msra.mxu1 %v7281_v54  ;;  %v7317_v54 = vld [vmem:[#allocation6 + $0x7a0] ss:$8 sps:$4 sm:$0xff]  }
 0x159   : > { %3061 = vmatprep.subr.bf16.mxu1 %v7289_v17  ;;  %v7227_v17 = vld [vmem:[#allocation6 + $0x4a0] ss:$8 sps:$4 sm:$0xff]  }
 0x15a   : > { %2216 = vmatpush1.bf16.msra.mxu0 %v7209_v61  ;;  %v7325_v61 = vld [vmem:[#allocation6 + $0x794] ss:$8 sps:$4 sm:$0xff]  }
 0x15b   : > { %2217 = vmatprep.subr.bf16.mxu0 %v7214_v44  ;;  %v7232_v44 = vld [vmem:[#allocation6 + $0x494] ss:$8 sps:$4 sm:$0xff]  }
 0x15c   : > { %3062 = vmatpush2.bf16.msra.mxu1 %v7287_v6  ;;  %v7323_v6 = vld [vmem:[#allocation6 + $0x790] ss:$8 sps:$4 sm:$0xff]  }
 0x15d   : > { %3063 = vmatprep.subr.bf16.mxu1 %v7295_v16  ;;  %v7230_v16 = vld [vmem:[#allocation6 + $0x490] ss:$8 sps:$4 sm:$0xff]  }
 0x15e   : > { %2218 = vmatpush2.bf16.msra.mxu0 %v7212_v18  ;;  %v7331_v18 = vld [vmem:[#allocation6 + $0x784] ss:$8 sps:$4 sm:$0xff]  }
 0x15f   : > { %2219 = vmatprep.subr.bf16.mxu0 %v7217_v62  ;;  %v7235_v62 = vld [vmem:[#allocation6 + $0x484] ss:$8 sps:$4 sm:$0xff]  }
 0x160   : > { %3064 = vmatpush2.bf16.msra.mxu1 %v7293_v34  ;;  %v7329_v34 = vld [vmem:[#allocation6 + $0x780] ss:$8 sps:$4 sm:$0xff]  }
 0x161   : > { %3065 = vmatprep.subr.bf16.mxu1 %v7301_v50  ;;  %v7238_v50 = vld [vmem:[#allocation6 + $0x674] ss:$8 sps:$4 sm:$0xff]  }
 0x162   : > { %2220 = vmatpush2.bf16.msra.mxu0 %v7215_v29  ;;  %v7233_v29 = vld [vmem:[#allocation6 + $0x480] ss:$8 sps:$4 sm:$0xff]  }
 0x163   : > { %2221 = vmatprep.subr.bf16.mxu0 %v7220_v36  ;;  %v7236_v36 = vld [vmem:[#allocation6 + $0x670] ss:$8 sps:$4 sm:$0xff]  }
 0x164   : > { %3066 = vmatpush2.bf16.msra.mxu1 %v7299_v22  ;;  %v1529_v22 = vpack.c.bf16 %v8639_v7, %v8633_v55  ;;  %v7824_v55 = vld [vmem:[%s8262_s28 + $0x20] sm:$0xff] }
 0x165   : > { %3067 = vmatprep.subr.bf16.mxu1 %v7307_v37  ;;  %v7244_v37 = vld [vmem:[#allocation6 + $0x664] ss:$8 sps:$4 sm:$0xff]   ;;  %v1535_v7 = vpack.c.bf16 %v8683_v33, %v7824_v55  ;;  %v1541_v33 = vpack.c.bf16 %v8727_v0, %v8671_v49  ;;  %v1547_v49 = vpack.c.bf16 %v8643_v32, %v8719_v63  ;;  %v7296_v32 = vld [vmem:[#allocation6 + $0x6d0] ss:$8 sps:$4 sm:$0xff]   ;;  %v7334_v55 = vld [vmem:[#allocation6 + $0x874] ss:$8 sps:$4 sm:$0xff]  }
 0x166   : > { %2222 = vmatpush2.bf16.msra.mxu0 %v7218_v35  ;;  %v7822_v35 = vld [vmem:[%s8262_s28 + $0x28] sm:$0xff] }
 0x167   : > { %2223 = vmatprep.subr.bf16.mxu0 %v7223_v24  ;;  %v7823_v24 = vld [vmem:[%s8262_s28 + $0x38] sm:$0xff]  ;;  %v7280_v0 = vld [vmem:[#allocation6 + $0x604] ss:$8 sps:$4 sm:$0xff]  }
 0x168   : > { %3068 = vmatpush2.bf16.msra.mxu1 %v7305_v23  ;;  %v1536_v23 = vpack.c.bf16 %v7823_v24, %v7822_v35  ;;  %v7304_v63 = vld [vmem:[#allocation6 + $0x6c4] ss:$8 sps:$4 sm:$0xff]   ;;  %v7322_v35 = vld [vmem:[#allocation6 + $0x694] ss:$8 sps:$4 sm:$0xff]  }
 0x169   : > { %3069 = vmatprep.subr.bf16.mxu1 %v7313_v2  ;;  %v7242_v2 = vld [vmem:[#allocation6 + $0x660] ss:$8 sps:$4 sm:$0xff]  }
 0x16a   : > { %2224 = vmatpush2.bf16.msra.mxu0 %v7221_v1  ;;  %v7250_v1 = vld [vmem:[#allocation6 + $0x654] ss:$8 sps:$4 sm:$0xff]  }
 0x16b   : > { %2225 = vmatprep.subr.bf16.mxu0 %v7226_v31  ;;  %v7248_v31 = vld [vmem:[#allocation6 + $0x650] ss:$8 sps:$4 sm:$0xff]  }
 0x16c   : > { %3070 = vmatpush2.bf16.msra.mxu1 %v7311_v4  ;;  %v7256_v4 = vld [vmem:[#allocation6 + $0x644] ss:$8 sps:$4 sm:$0xff]  }
 0x16d   : > { %3071 = vmatprep.subr.bf16.mxu1 %v7319_v10  ;;  %v7825_v10 = vld [vmem:[%s8262_s28 + $0x48] sm:$0xff] }
 0x16e   : > { %2226 = vmatpush2.bf16.msra.mxu0 %v7224_v39  ;;  %v1542_v39 = vpack.c.bf16 %v8689_v12, %v7825_v10  ;;  %v7337_v10 = vld [vmem:[#allocation6 + $0x864] ss:$8 sps:$4 sm:$0xff]  }
 0x16f   : > { %2227 = vmatprep.subr.bf16.mxu0 %v7229_v42  ;;  %v7260_v42 = vld [vmem:[#allocation6 + $0x630] ss:$8 sps:$4 sm:$0xff]  }
 0x170   : > { %3072 = vmatpush2.bf16.msra.mxu1 %v7317_v54  ;;  %v7268_v54 = vld [vmem:[#allocation6 + $0x624] ss:$8 sps:$4 sm:$0xff]  }
 0x171   : > { %3073 = vmatprep.subr.bf16.mxu1 %v7325_v61  ;;  %v7826_v61 = vld [vmem:[%s8262_s28 + $0x78] sm:$0xff] }
 0x172   : > { %2228 = vmatpush2.bf16.msra.mxu0 %v7227_v17  ;;  %v7827_v17 = vld [vmem:[%s8262_s28 + $0x68] sm:$0xff] }
 0x173   : > { %2229 = vmatprep.subr.bf16.mxu0 %v7232_v44  ;;  %v1548_v12 = vpack.c.bf16 %v7826_v61, %v7827_v17  ;;  %v7272_v44 = vld [vmem:[#allocation6 + $0x610] ss:$8 sps:$4 sm:$0xff]   ;;  %v7343_v17 = vld [vmem:[#allocation6 + $0x844] ss:$8 sps:$4 sm:$0xff]  }
 0x174   : > { %3074 = vmatpush2.bf16.msra.mxu1 %v7323_v6  ;;  %v7278_v6 = vld [vmem:[#allocation6 + $0x600] ss:$8 sps:$4 sm:$0xff]  }
 0x175   : > { %3075 = vmatprep.subr.bf16.mxu1 %v7331_v18  ;;  %v7292_v18 = vld [vmem:[#allocation6 + $0x6e4] ss:$8 sps:$4 sm:$0xff]  }
 0x176   : > { %2230 = vmatpush2.bf16.msra.mxu0 %v7230_v16  ;;  %v7290_v16 = vld [vmem:[#allocation6 + $0x6e0] ss:$8 sps:$4 sm:$0xff]  }
 0x177   : > { %2231 = vmatprep.subr.bf16.mxu0 %v7235_v62  ;;  %v7298_v62 = vld [vmem:[#allocation6 + $0x6d4] ss:$8 sps:$4 sm:$0xff]  }
 0x178   : > { %3076 = vmatpush2.bf16.msra.mxu1 %v7329_v34  ;;  %v7302_v34 = vld [vmem:[#allocation6 + $0x6c0] ss:$8 sps:$4 sm:$0xff]  }
 0x17a   : > { %2232 = vmatpush2.bf16.msra.mxu0 %v7233_v29  ;;  %v7310_v29 = vld [vmem:[#allocation6 + $0x6b4] ss:$8 sps:$4 sm:$0xff]  }
 0x17b   : > { %2972 = vmatprep.subr.bf16.mxu0 %v7238_v50  ;;  %3078 = vmatmul.mubr.bf16.vlgmr.msra.gmra.mxu1 %v8419_v43  ;;  %v7254_v43 = vld [vmem:[#allocation6 + $0x640] ss:$8 sps:$4 sm:$0xff]   ;;  %v7308_v50 = vld [vmem:[#allocation6 + $0x6b0] ss:$8 sps:$4 sm:$0xff]  }
 0x17c   : > { %3087 = vmatprep.mubr.bf16.mxu1 %v8423_v46  ;;  %v7262_v46 = vld [vmem:[#allocation6 + $0x634] ss:$8 sps:$4 sm:$0xff]  }
 0x17d   : > { %2234 = vmatmul.mubr.bf16.vlgmr.msra.gmra.mxu0 %v1529_v22 }
 0x17e   : > { %2973 = vmatpush1.bf16.msra.mxu0 %v7236_v36  ;;  %2243 = vmatprep.mubr.bf16.mxu0 %v1536_v23  ;;  %v7316_v36 = vld [vmem:[#allocation6 + $0x6a4] ss:$8 sps:$4 sm:$0xff]   ;;  %v7320_v23 = vld [vmem:[#allocation6 + $0x690] ss:$8 sps:$4 sm:$0xff]  }
 0x17f   : > { %2974 = vmatprep.subr.bf16.mxu0 %v7244_v37  ;;  %v7314_v37 = vld [vmem:[#allocation6 + $0x6a0] ss:$8 sps:$4 sm:$0xff]  }
 0x182   : > { %2975 = vmatpush1.bf16.msra.mxu0 %v7242_v2  ;;  %v7328_v2 = vld [vmem:[#allocation6 + $0x684] ss:$8 sps:$4 sm:$0xff]  }
 0x183   : > { %2976 = vmatprep.subr.bf16.mxu0 %v7250_v1  ;;  %3088 = vmatmul.mubr.bf16.gmra.mxu1 %v8441_v57  ;;  %v7266_v57 = vld [vmem:[#allocation6 + $0x620] ss:$8 sps:$4 sm:$0xff]  }
 0x184   : > { %3097 = vmatprep.mubr.bf16.mxu1 %v8445_v60  ;;  %v7274_v60 = vld [vmem:[#allocation6 + $0x614] ss:$8 sps:$4 sm:$0xff]  }
 0x185   : > { %2244 = vmatmul.mubr.bf16.gmra.mxu0 %v1535_v7 }
 0x186   : > { %2977 = vmatpush1.bf16.msra.mxu0 %v7248_v31  ;;  %2253 = vmatprep.mubr.bf16.mxu0 %v1542_v39  ;;  %v7326_v31 = vld [vmem:[#allocation6 + $0x680] ss:$8 sps:$4 sm:$0xff]  }
 0x187   : > { %2978 = vmatprep.subr.bf16.mxu0 %v7256_v4  ;;  %v7332_v4 = vld [vmem:[#allocation6 + $0x870] ss:$8 sps:$4 sm:$0xff]  }
 0x18a   : > { %2979 = vmatpush1.bf16.msra.mxu0 %v7254_v43  ;;  %v7335_v43 = vld [vmem:[#allocation6 + $0x860] ss:$8 sps:$4 sm:$0xff]  }
 0x18b   : > { %2980 = vmatprep.subr.bf16.mxu0 %v7262_v46  ;;  %3098 = vmatmul.mubr.bf16.gmra.mxu1 %v8457_v5  ;;  %v7286_v5 = vld [vmem:[#allocation6 + $0x6f4] ss:$8 sps:$4 sm:$0xff]  }
 0x18c   : > { %3107 = vmatprep.mubr.bf16.mxu1 %v8344_v41  ;;  %v7284_v41 = vld [vmem:[#allocation6 + $0x6f0] ss:$8 sps:$4 sm:$0xff]  }
 0x18d   : > { %2254 = vmatmul.mubr.bf16.gmra.mxu0 %v1541_v33 }
 0x18e   : > { %2981 = vmatpush1.bf16.msra.mxu0 %v7260_v42  ;;  %2263 = vmatprep.mubr.bf16.mxu0 %v1548_v12  ;;  %v7340_v42 = vld [vmem:[#allocation6 + $0x854] ss:$8 sps:$4 sm:$0xff]  }
 0x18f   : > { %2982 = vmatprep.subr.bf16.mxu0 %v7268_v54  ;;  %v7338_v54 = vld [vmem:[#allocation6 + $0x850] ss:$8 sps:$4 sm:$0xff]  }
 0x192   : > { %2983 = vmatpush1.bf16.msra.mxu0 %v7266_v57  ;;  %v7346_v57 = vld [vmem:[#allocation6 + $0x834] ss:$8 sps:$4 sm:$0xff]  }
 0x193   : > { %2984 = vmatprep.subr.bf16.mxu0 %v7274_v60  ;;  %3108 = vmatmul.mubr.bf16.gmra.mxu1 %v8397_v25  ;;  %v8797_v25 = vpop.f32.mrf.mxu1 }
 0x195   : > { %2264 = vmatmul.mubr.bf16.gmra.mxu0 %v1547_v49 }
 0x196   : > { %2985 = vmatpush1.bf16.msra.mxu0 %v7272_v44  ;;  %3004 = vmatprep.mubr.bf16.mxu0 %v8548_v8  ;;  %v8799_v8 = vpop.f32.mrf.mxu1  ;;  %v7344_v44 = vld [vmem:[#allocation6 + $0x830] ss:$8 sps:$4 sm:$0xff]  }
 0x197   : > { %2986 = vmatprep.subr.bf16.mxu0 %v7280_v0  ;;  %v7349_v0 = vld [vmem:[#allocation6 + $0x824] ss:$8 sps:$4 sm:$0xff]  }
 0x198   : > { %v8801_v22 = vpop.f32.mrf.mxu1 }
 0x19a   : > { %2987 = vmatpush1.bf16.msra.mxu0 %v7278_v6  ;;  %v8803_v24 = vpop.f32.mrf.mxu1 }
 0x19b   : > { %2988 = vmatprep.subr.bf16.mxu0 %v7286_v5  ;;  %v7352_v5 = vld [vmem:[#allocation6 + $0x814] ss:$8 sps:$4 sm:$0xff]  }
 0x19c   : > { %v8805_v1 = vpop.f32.mrf.mxu1 }
 0x19e   : > { %2989 = vmatpush2.bf16.msra.mxu0 %v7284_v41  ;;  %v8807_v7 = vpop.f32.mrf.mxu1 }
 0x19f   : > { %2990 = vmatprep.subr.bf16.mxu0 %v7292_v18  ;;  %v7350_v18 = vld [vmem:[#allocation6 + $0x810] ss:$8 sps:$4 sm:$0xff]  }
 0x1a0   : > { %v8809_v39 = vpop.f32.mrf.mxu1 }
 0x1a2   : > { %2991 = vmatpush2.bf16.msra.mxu0 %v7290_v16  ;;  %v8815_v33 = vpop.f32.mrf.mxu1 }
 0x1a3   : > { %2992 = vmatprep.subr.bf16.mxu0 %v7298_v62  ;;  %v7355_v62 = vld [vmem:[#allocation6 + $0x804] ss:$8 sps:$4 sm:$0xff]  }
 0x1a4   : > { %v8819_v12 = vpop.f32.mrf.mxu1 }
 0x1a6   : > { %2993 = vmatpush2.bf16.msra.mxu0 %v7296_v32  ;;  %v8825_v60 = vpop.f32.mrf.mxu1 }
 0x1a7   : > { %2994 = vmatprep.subr.bf16.mxu0 %v7304_v63  ;;  %v7358_v63 = vld [vmem:[#allocation6 + $0x8f4] ss:$8 sps:$4 sm:$0xff]  }
 0x1a8   : > { %v8829_v6 = vpop.f32.mrf.mxu1 }
 0x1aa   : > { %2995 = vmatpush2.bf16.msra.mxu0 %v7302_v34  ;;  %v8835_v41 = vpop.f32.mrf.mxu1 }
 0x1ab   : > { %2996 = vmatprep.subr.bf16.mxu0 %v7310_v29  ;;  %v7356_v29 = vld [vmem:[#allocation6 + $0x8f0] ss:$8 sps:$4 sm:$0xff]  }
 0x1ac   : > { %v8839_v32 = vpop.f32.mrf.mxu1 }
 0x1ae   : > { %2997 = vmatpush2.bf16.msra.mxu0 %v7308_v50  ;;  %v8845_v34 = vpop.f32.mrf.mxu1 }
 0x1af   : > { %2998 = vmatprep.subr.bf16.mxu0 %v7316_v36  ;;  %v7361_v36 = vld [vmem:[#allocation6 + $0x8e4] ss:$8 sps:$4 sm:$0xff]  }
 0x1b2   : > { %2999 = vmatpush2.bf16.msra.mxu0 %v7314_v37  ;;  %v8849_v37 = vpop.f32.mrf.mxu1 }
 0x1b3   : > { %3000 = vmatprep.subr.bf16.mxu0 %v7322_v35 }
 0x1b6   : > { %3001 = vmatpush2.bf16.msra.mxu0 %v7320_v23  ;;  %v8853_v23 = vpop.f32.mrf.mxu1 }
 0x1b7   : > { %3002 = vmatprep.subr.bf16.mxu0 %v7328_v2  ;;  %v7362_v2 = vld [vmem:[#allocation6 + $0x8d0] ss:$8 sps:$4 sm:$0xff]  }
 0x1ba   : > { %3003 = vmatpush2.bf16.msra.mxu0 %v7326_v31 }
 0x1bb   : > { %3118 = vmatprep.subr.bf16.mxu0 %v7334_v55  ;;  %v7367_v55 = vld [vmem:[#allocation6 + $0x8c4] ss:$8 sps:$4 sm:$0xff]  }
 0x1bd   : > { %3005 = vmatmul.mubr.bf16.vlgmr.msra.gmra.mxu0 %v8565_v26  ;;  %v8813_v46 = vpop.f32.mrf.mxu0  ;;  %v7341_v26 = vld [vmem:[#allocation6 + $0x840] ss:$8 sps:$4 sm:$0xff]  }
 0x1be   : > { %3014 = vmatprep.mubr.bf16.mxu0 %v8577_v3  ;;  %3119 = vmatpush1.bf16.msra.mxu0 %v7332_v4  ;;  %v8857_v4 = vpop.f32.mrf.mxu1 }
 0x1bf   : > { %3120 = vmatprep.subr.bf16.mxu0 %v7337_v10  ;;  %v8817_v61 = vpop.f32.mrf.mxu0  ;;  %v7365_v10 = vld [vmem:[#allocation6 + $0x8c0] ss:$8 sps:$4 sm:$0xff]  }
 0x1c1   : > { %v8823_v3 = vpop.f32.mrf.mxu0 }
 0x1c2   : > { %3121 = vmatpush1.bf16.msra.mxu0 %v7335_v43 }
 0x1c3   : > { %3122 = vmatprep.subr.bf16.mxu0 %v7340_v42  ;;  %v8827_v49 = vpop.f32.mrf.mxu0  ;;  %v7370_v42 = vld [vmem:[#allocation6 + $0x8b4] ss:$8 sps:$4 sm:$0xff]  }
 0x1c5   : > { %3015 = vmatmul.mubr.bf16.gmra.mxu0 %v8603_v9  ;;  %v7347_v9 = vld [vmem:[#allocation6 + $0x820] ss:$8 sps:$4 sm:$0xff]  }
 0x1c6   : > { %3024 = vmatprep.mubr.bf16.mxu0 %v8608_v14  ;;  %3123 = vmatpush1.bf16.msra.mxu0 %v7338_v54  ;;  %v8833_v14 = vpop.f32.mrf.mxu0  ;;  %v8861_v54 = vpop.f32.mrf.mxu1 }
 0x1c7   : > { %3124 = vmatprep.subr.bf16.mxu0 %v7343_v17  ;;  %v7368_v17 = vld [vmem:[#allocation6 + $0x8b0] ss:$8 sps:$4 sm:$0xff]  }
 0x1c8   : > { %v8837_v16 = vpop.f32.mrf.mxu0 }
 0x1ca   : > { %3125 = vmatpush1.bf16.msra.mxu0 %v7341_v26 }
 0x1cb   : > { %3126 = vmatprep.subr.bf16.mxu0 %v7346_v57  ;;  %v7373_v57 = vld [vmem:[#allocation6 + $0x8a4] ss:$8 sps:$4 sm:$0xff]  }
 0x1cd   : > { %3025 = vmatmul.mubr.bf16.gmra.mxu0 %v8625_v56  ;;  %v8843_v56 = vpop.f32.mrf.mxu0 }
 0x1ce   : > { %3034 = vmatprep.mubr.bf16.mxu0 %v8532_v48  ;;  %3127 = vmatpush1.bf16.msra.mxu0 %v7344_v44  ;;  %v7353_v48 = vld [vmem:[#allocation6 + $0x800] ss:$8 sps:$4 sm:$0xff]   ;;  %v8865_v44 = vpop.f32.mrf.mxu1 }
 0x1cf   : > { %3128 = vmatprep.subr.bf16.mxu0 %v7349_v0  ;;  %v8847_v50 = vpop.f32.mrf.mxu0  ;;  %v7371_v0 = vld [vmem:[#allocation6 + $0x8a0] ss:$8 sps:$4 sm:$0xff]  }
 0x1d1   : > { %v8851_v35 = vpop.f32.mrf.mxu0 }
 0x1d2   : > { %3129 = vmatpush1.bf16.msra.mxu0 %v7347_v9 }
 0x1d3   : > { %3130 = vmatprep.subr.bf16.mxu0 %v7352_v5  ;;  %v8855_v31 = vpop.f32.mrf.mxu0  ;;  %v7376_v5 = vld [vmem:[#allocation6 + $0x894] ss:$8 sps:$4 sm:$0xff]  }
 0x1d5   : > { %3035 = vmatmul.mubr.bf16.gmra.mxu0 %v8527_v45  ;;  %v7359_v45 = vld [vmem:[#allocation6 + $0x8e0] ss:$8 sps:$4 sm:$0xff]   ;;  %v8859_v43 = vpop.f32.mrf.mxu0 }
 0x1d6   : > { %3131 = vmatpush1.bf16.msra.mxu0 %v7350_v18  ;;  %3150 = vmatprep.mubr.bf16.mxu0 %v8716_v13  ;;  %v7364_v13 = vld [vmem:[#allocation6 + $0x8d4] ss:$8 sps:$4 sm:$0xff]   ;;  %v8867_v18 = vpop.f32.mrf.mxu1 }
 0x1d7   : > { %3132 = vmatprep.subr.bf16.mxu0 %v7355_v62  ;;  %v8863_v26 = vpop.f32.mrf.mxu0  ;;  %v7374_v62 = vld [vmem:[#allocation6 + $0x890] ss:$8 sps:$4 sm:$0xff]  }
 0x1d9   : > { %v1300_v9 = vpop.f32.mrf.mxu0 }
 0x1da   : > { %3133 = vmatpush1.bf16.msra.mxu0 %v7353_v48 }
 0x1db   : > { %3134 = vmatprep.subr.bf16.mxu0 %v7358_v63  ;;  %v1302_v48 = vpop.f32.mrf.mxu0  ;;  %v7379_v63 = vld [vmem:[#allocation6 + $0x884] ss:$8 sps:$4 sm:$0xff]  }
 0x1de   : > { %3135 = vmatpush2.bf16.msra.mxu0 %v7356_v29  ;;  %v8869_v29 = vpop.f32.mrf.mxu1 }
 0x1df   : > { %3136 = vmatprep.subr.bf16.mxu0 %v7361_v36  ;;  %v7377_v36 = vld [vmem:[#allocation6 + $0x880] ss:$8 sps:$4 sm:$0xff]  }
 0x1e2   : > { %3137 = vmatpush2.bf16.msra.mxu0 %v7359_v45  ;;  %v1304_v45 = vpop.f32.mrf.mxu0 }
 0x1e3   : > { %3138 = vmatprep.subr.bf16.mxu0 %v7364_v13  ;;  %v8871_v13 = vpop.f32.mrf.mxu1 }
 0x1e6   : > { %3139 = vmatpush2.bf16.msra.mxu0 %v7362_v2  ;;  %v8873_v2 = vpop.f32.mrf.mxu0 }
 0x1e7   : > { %3140 = vmatprep.subr.bf16.mxu0 %v7367_v55  ;;  %v1344_v55 = vadd.f32 %v8797_v25, %v8813_v46 }
 0x1ea   : > { %3141 = vmatpush2.bf16.msra.mxu0 %v7365_v10  ;;  %v8877_v10 = vpop.f32.mrf.mxu1 }
 0x1eb   : > { %3142 = vmatprep.subr.bf16.mxu0 %v7370_v42 }
 0x1ee   : > { %3143 = vmatpush2.bf16.msra.mxu0 %v7368_v17  ;;  %v1346_v17 = vadd.f32 %v8799_v8, %v8817_v61 }
 0x1ef   : > { %3144 = vmatprep.subr.bf16.mxu0 %v7373_v57 }
 0x1f2   : > { %3145 = vmatpush2.bf16.msra.mxu0 %v7371_v0 }
 0x1f3   : > { %3146 = vmatprep.subr.bf16.mxu0 %v7376_v5  ;;  %v1348_v5 = vadd.f32 %v8801_v22, %v8823_v3 }
 0x1f6   : > { %3147 = vmatpush2.bf16.msra.mxu0 %v7374_v62 }
 0x1f7   : > { %3148 = vmatprep.subr.bf16.mxu0 %v7379_v63  ;;  %v8889_v63 = vpop.f32.mrf.mxu1 }
 0x1f9   : > { %v8897_v8 = vpop.f32.mrf.mxu1 }
 0x1fa   : > { %3149 = vmatpush2.bf16.msra.mxu0 %v7377_v36 }
 0x1fd   : > { %v1416_v42 = vpop.f32.mrf.mxu0  ;;  %3151 = vmatmul.mubr.bf16.vlgmr.msra.gmra.mxu0 %v8738_v20  ;;  %v1354_v20 = vadd.f32 %v8805_v1, %v8833_v14 }
 0x1fe   : > { %v8882_v57 = vadd.f32 %v1416_v42, %v1344_v55  ;;  %3160 = vmatprep.mubr.bf16.mxu0 %v8750_v53  ;;  %v1356_v53 = vadd.f32 %v8807_v7, %v8837_v16  ;;  %v1358_v55 = vadd.f32 %v8809_v39, %v8843_v56 }
 0x1ff   : > { %v1418_v0 = vpop.f32.mrf.mxu0 }
 0x200   : > { %v8887_v62 = vadd.f32 %v1418_v0, %v1346_v17  ;;  %v8909_v17 = vpop.f32.mrf.mxu1 }
 0x201   : > { %v1420_v25 = vpop.f32.mrf.mxu0 }
 0x202   : > { %v8891_v46 = vadd.f32 %v1420_v25, %v1348_v5  ;;  %v8917_v7 = vpop.f32.mrf.mxu1  ;;  %v1368_v5 = vadd.f32 %v8829_v6, %v8859_v43  ;;  %v1378_v43 = vadd.f32 %v8849_v37, %v1304_v45  ;;  %v7391_v37 = vld [vmem:[#allocation8 + $0x154] ss:$8 sps:$4 sm:$0xff]   ;;  %v7392_v45 = vld [vmem:[#allocation8 + $0x60] ss:$8 sps:$4 sm:$0xff]  }
 0x203   : > { %v8893_v36 = vpop.f32.mrf.mxu0 }
 0x205   : > { %v1426_v61 = vpop.f32.mrf.mxu0  ;;  %3161 = vmatmul.mubr.bf16.gmra.mxu0 %v8761_v19  ;;  %v1364_v19 = vadd.f32 %v8819_v12, %v8851_v35 }
 0x206   : > { %v8902_v22 = vadd.f32 %v1426_v61, %v1354_v20  ;;  %3170 = vmatprep.mubr.bf16.mxu0 %v8763_v21  ;;  %v1366_v21 = vadd.f32 %v8825_v60, %v8855_v31  ;;  %v8929_v20 = vpop.f32.mrf.mxu1 }
 0x207   : > { %v1428_v3 = vpop.f32.mrf.mxu0 }
 0x208   : > { %v8907_v42 = vadd.f32 %v1428_v3, %v1356_v53  ;;  %v8936_v60 = vpop.f32.mrf.mxu1 }
 0x209   : > { %v1430_v1 = vpop.f32.mrf.mxu0 }
 0x20a   : > { %v8911_v14 = vadd.f32 %v1430_v1, %v1358_v55  ;;  %v8945_v55 = vpop.f32.mrf.mxu1 }
 0x20b   : > { %v8913_v0 = vpop.f32.mrf.mxu0 }
 0x20d   : > { %v1436_v16 = vpop.f32.mrf.mxu0  ;;  %3171 = vmatmul.mubr.bf16.gmra.mxu0 %v8771_v38  ;;  %v1374_v38 = vadd.f32 %v8839_v32, %v1300_v9  ;;  %v7380_v32 = vld [vmem:[#allocation8 + $0x170] ss:$8 sps:$4 sm:$0xff]   ;;  %v7382_v9 = vld [vmem:[#allocation8 + $0x174] ss:$8 sps:$4 sm:$0xff]  }
 0x20e   : > { %v8922_v39 = vadd.f32 %v1436_v16, %v1364_v19  ;;  %3180 = vmatprep.mubr.bf16.mxu0 %v8628_v58  ;;  %v1376_v58 = vadd.f32 %v8845_v34, %v1302_v48  ;;  %v8949_v16 = vpop.f32.mrf.mxu1  ;;  %4124 = vmatprep.subr.bf16.mxu0 %v7382_v9  ;;  %v7383_v34 = vld [vmem:[#allocation8 + $0x160] ss:$8 sps:$4 sm:$0xff]   ;;  %v7394_v48 = vld [vmem:[#allocation8 + $0x64] ss:$8 sps:$4 sm:$0xff]   ;;  %v8953_v9 = vpop.permute.xlu0 %1457 }
 0x20f   : > { %v1438_v56 = vpop.f32.mrf.mxu0  ;;  %4125 = vmatpush1.bf16.msra.mxu0 %v7380_v32  ;;  %v7395_v32 = vld [vmem:[#allocation8 + $0x140] ss:$8 sps:$4 sm:$0xff]   ;;  %10206 = vst [vmem:[#allocation35_spill] sm:$0xff] %v8953_v9 }
 0x210   : > { %v8927_v25 = vadd.f32 %v1438_v56, %v1366_v21  ;;  %v7385_v21 = vld [vmem:[#allocation8 + $0x164] ss:$8 sps:$4 sm:$0xff]   ;;  %v7388_v56 = vld [vmem:[#allocation8 + $0x74] ss:$8 sps:$4 sm:$0xff]  }
 0x211   : > { %v1440_v12 = vpop.f32.mrf.mxu0  ;;  %4051 = vmatprep.subr.bf16.mxu1 %v7388_v56  ;;  %4126 = vmatprep.subr.bf16.mxu0 %v7385_v21  ;;  %v7403_v21 = vld [vmem:[#allocation8 + $0x134] ss:$8 sps:$4 sm:$0xff]  }
 0x212   : > { %v8931_v35 = vadd.f32 %v1440_v12, %v1368_v5  ;;  %v8951_v5 = vpop.f32.mrf.mxu1  ;;  %v7400_v12 = vld [vmem:[#allocation8 + $0x54] ss:$8 sps:$4 sm:$0xff]  }
 0x213   : > { %v8933_v61 = vpop.f32.mrf.mxu0  ;;  %10205 = vst [vmem:[#allocation34_spill] sm:$0xff] %v8951_v5  ;;  %4127 = vmatpush1.bf16.msra.mxu0 %v7383_v34  ;;  %v7401_v34 = vld [vmem:[#allocation8 + $0x130] ss:$8 sps:$4 sm:$0xff]  }
 0x214   : > { %4128 = vmatprep.subr.bf16.mxu0 %v7391_v37  ;;  %v8955_v37 = vpop.permute.xlu0 %1492 }
 0x215   : > { %v1446_v31 = vpop.f32.mrf.mxu0  ;;  %3181 = vmatmul.mubr.bf16.gmra.mxu0 %v8704_v28  ;;  %v7386_v28 = vld [vmem:[#allocation8 + $0x70] ss:$8 sps:$4 sm:$0xff]   ;;  %10207 = vst [vmem:[#allocation36_spill] sm:$0xff] %v8955_v37 }
 0x216   : > { %v8940_v53 = vadd.f32 %v1446_v31, %v1374_v38  ;;  %4052 = vmatpush1.bf16.msra.mxu1 %v7386_v28  ;;  %v2308_v38 = vpop.f32.mrf.mxu1  ;;  %v7389_v31 = vld [vmem:[#allocation8 + $0x150] ss:$8 sps:$4 sm:$0xff]   ;;  %v7404_v28 = vld [vmem:[#allocation8 + $0x40] ss:$8 sps:$4 sm:$0xff]  }
 0x217   : > { %v1448_v6 = vpop.f32.mrf.mxu0  ;;  %4053 = vmatprep.subr.bf16.mxu1 %v7394_v48  ;;  %4129 = vmatpush1.bf16.msra.mxu0 %v7389_v31  ;;  %v7409_v48 = vld [vmem:[#allocation8 + $0x124] ss:$8 sps:$4 sm:$0xff]   ;;  %v8959_v31 = vpop.permute.xlu1 %1487 }
 0x218   : > { %v8943_v3 = vadd.f32 %v1448_v6, %v1376_v58  ;;  %v7397_v58 = vld [vmem:[#allocation8 + $0x144] ss:$8 sps:$4 sm:$0xff]   ;;  %v7398_v6 = vld [vmem:[#allocation8 + $0x50] ss:$8 sps:$4 sm:$0xff]   ;;  %10209 = vst [vmem:[#allocation38_spill] sm:$0xff] %v8959_v31 }
 0x219   : > { %v1450_v1 = vpop.f32.mrf.mxu0  ;;  %4130 = vmatprep.subr.bf16.mxu0 %v7397_v58 }
 0x21a   : > { %v8947_v19 = vadd.f32 %v1450_v1, %v1378_v43  ;;  %4054 = vmatpush1.bf16.msra.mxu1 %v7392_v45  ;;  %v7406_v43 = vld [vmem:[#allocation8 + $0x44] ss:$8 sps:$4 sm:$0xff]   ;;  %v2310_v1 = vpop.f32.mrf.mxu1 }
 0x21b   : > { %4055 = vmatprep.subr.bf16.mxu1 %v7400_v12  ;;  %4131 = vmatpush1.bf16.msra.mxu0 %v7395_v32  ;;  %v7407_v12 = vld [vmem:[#allocation8 + $0x120] ss:$8 sps:$4 sm:$0xff]  }
 0x21c   : > { %v2312_v56 = vpop.f32.mrf.mxu1  ;;  %4132 = vmatprep.subr.bf16.mxu0 %v7403_v21 }
 0x21e   : > { %4056 = vmatpush1.bf16.msra.mxu1 %v7398_v6  ;;  %v8957_v45 = vpop.f32.mrf.mxu1  ;;  %v8961_v6 = vpop.permute.xlu0 %3223 }
 0x21f   : > { %4057 = vmatprep.subr.bf16.mxu1 %v7406_v43  ;;  %10208 = vst [vmem:[#allocation37_spill] sm:$0xff] %v8957_v45  ;;  %4133 = vmatpush1.bf16.msra.mxu0 %v7401_v34  ;;  %10210 = vst [vmem:[#allocation39_spill] sm:$0xff] %v8961_v6  ;;  %v8963_v43 = vpop.permute.xlu1 %3193  ;;  %v7410_v34 = vld [vmem:[#allocation8 + $0x30] ss:$8 sps:$4 sm:$0xff]  }
 0x220   : > { %4134 = vmatprep.subr.bf16.mxu0 %v7409_v48  ;;  %v2318_v58 = vpop.f32.mrf.mxu1  ;;  %10211 = vst [vmem:[#allocation40_spill] sm:$0xff] %v8963_v43  ;;  %v7413_v6 = vld [vmem:[#allocation8 + $0x110] ss:$8 sps:$4 sm:$0xff]   ;;  %v1495_v43 = vmul.f32 %v8953_v9, %v8882_v57 }
 0x222   : > { %4058 = vmatpush1.bf16.msra.mxu1 %v7404_v28  ;;  %v2320_v32 = vpop.f32.mrf.mxu1  ;;  %v8965_v40 = vpop.permute.xlu0 %1462 }
 0x223   : > { %4135 = vmatpush1.bf16.msra.mxu0 %v7407_v12  ;;  %10212 = vst [vmem:[#allocation41_spill] sm:$0xff] %v8965_v40  ;;  %v8969_v28 = vpop.f32.mrf.mxu0  ;;  %v8971_v51 = vpop.permute.xlu1 %3228  ;;  %4059 = vmatprep.subr.bf16.mxu1 %v7412_v27  ;;  %v7415_v12 = vld [vmem:[#allocation8 + $0x114] ss:$8 sps:$4 sm:$0xff]  }
 0x224   : > { %v8967_v21 = vpop.f32.mrf.mxu1  ;;  %10213 = vst [vmem:[#allocation42_spill] sm:$0xff] %v8971_v51  ;;  %4136 = vmatprep.subr.bf16.mxu0 %v7415_v12  ;;  %v7424_v12 = vld [vmem:[#allocation8 + $0x14] ss:$8 sps:$4 sm:$0xff]  }
 0x226   : > { %4060 = vmatpush1.bf16.msra.mxu1 %v7410_v34  ;;  %v8974_v52 = vpop.f32.mrf.mxu1  ;;  %v8976_v59 = vpop.permute.xlu0 %3198 }
 0x227   : > { %10214 = vst [vmem:[#allocation43_spill] sm:$0xff] %v8974_v52  ;;  %10215 = vst [vmem:[#allocation44_spill] sm:$0xff] %v8976_v59  ;;  %4061 = vmatprep.subr.bf16.mxu1 %v7418_v15  ;;  %4137 = vmatpush1.bf16.msra.mxu0 %v7413_v6 }
 0x228   : > { %v2328_v57 = vpop.f32.mrf.mxu1 }
 0x22a   : > { %4062 = vmatpush1.bf16.msra.mxu1 %v7416_v30 }
 0x22b   : > { %4063 = vmatprep.subr.bf16.mxu1 %v7424_v12 }
 0x23d   : > { %v2235_v11 = vpop.f32.mrf.mxu0 }
 0x23e   : > { %v2236_v48 = vadd.f32 %v2235_v11, %v8857_v4  ;;  %v8981_v11 = vpop.permute.xlu1 %1467  ;;  %v1496_v4 = vmul.f32 %v8953_v9, %v8887_v62  ;;  %v7422_v62 = vld [vmem:[#allocation8 + $0x10] ss:$8 sps:$4 sm:$0xff]  }
 0x23f   : > { %v2237_v47 = vpop.f32.mrf.mxu0  ;;  %10216 = vst [vmem:[#allocation45_spill] sm:$0xff] %v8981_v11  ;;  %4064 = vmatpush1.bf16.msra.mxu1 %v7422_v62 }
 0x240   : > { %v2309_v45 = vadd.f32 %v2308_v38, %v2236_v48  ;;  %v2238_v51 = vadd.f32 %v2237_v47, %v8861_v54  ;;  %v7421_v47 = vld [vmem:[#allocation8 + $0x104] ss:$8 sps:$4 sm:$0xff]   ;;  %v1497_v54 = vmul.f32 %v8965_v40, %v8891_v46  ;;  %v7419_v48 = vld [vmem:[#allocation8 + $0x100] ss:$8 sps:$4 sm:$0xff]   ;;  %v7427_v46 = vld [vmem:[#allocation8 + $0x1f4] ss:$8 sps:$4 sm:$0xff]  }
 0x241   : > { %v2239_v27 = vpop.f32.mrf.mxu0  ;;  %4138 = vmatprep.subr.bf16.mxu0 %v7421_v47  ;;  %v1500_v47 = vmul.f32 %v8981_v11, %v8907_v42 }
 0x242   : > { %v8985_v34 = vadd.f32 %v2309_v45, %v1495_v43  ;;  %v2311_v52 = vadd.f32 %v2310_v1, %v2238_v51  ;;  %v2240_v59 = vadd.f32 %v2239_v27, %v8865_v44  ;;  %v8994_v45 = vpop.permute.xlu0 %1472  ;;  %4139 = vmatpush1.bf16.msra.mxu0 %v7419_v48  ;;  %v2330_v44 = vpop.f32.mrf.mxu1  ;;  %v7425_v27 = vld [vmem:[#allocation8 + $0x1f0] ss:$8 sps:$4 sm:$0xff]  }
 0x243   : > { %v8988_v38 = vpop.f32.mrf.mxu0  ;;  %10217 = vst [vmem:[#allocation46_spill] sm:$0xff] %v8994_v45  ;;  %4140 = vmatprep.subr.bf16.mxu0 %v7427_v46  ;;  %v1501_v42 = vmul.f32 %v8994_v45, %v8911_v14 }
 0x244   : > { %v8992_v15 = vadd.f32 %v2311_v52, %v1496_v4  ;;  %v2313_v6 = vadd.f32 %v2312_v56, %v2240_v59  ;;  %v8999_v52 = vpop.permute.xlu1 %3203  ;;  %v1499_v59 = vmul.f32 %v8981_v11, %v8902_v22  ;;  %v7430_v4 = vld [vmem:[#allocation8 + $0x4] ss:$8 sps:$4 sm:$0xff]   ;;  %v2332_v12 = vpop.f32.mrf.mxu1 }
 0x245   : > { %v2245_v5 = vpop.f32.mrf.mxu0  ;;  %10218 = vst [vmem:[#allocation47_spill] sm:$0xff] %v8999_v52  ;;  %4065 = vmatprep.subr.bf16.mxu1 %v7430_v4  ;;  %v7439_v4 = vld [vmem:[#allocation8 + $0x1d4] ss:$8 sps:$4 sm:$0xff]   ;;  %v10234_v52 = vld [vmem:[#allocation37_spill] sm:$0xff] }
 0x246   : > { %v8996_v51 = vadd.f32 %v2313_v6, %v1497_v54  ;;  %v2246_v30 = vadd.f32 %v2245_v5, %v8869_v29  ;;  %v7428_v5 = vld [vmem:[#allocation8] ss:$8 sps:$4 sm:$0xff]   ;;  %4141 = vmatpush2.bf16.msra.mxu0 %v7425_v27  ;;  %v9023_v27 = vpop.f32.mrf.mxu1 }
 0x247   : > { %v2247_v1 = vpop.f32.mrf.mxu0  ;;  %4066 = vmatpush1.bf16.msra.mxu1 %v7428_v5  ;;  %v7437_v5 = vld [vmem:[#allocation8 + $0x1d0] ss:$8 sps:$4 sm:$0xff]  }
 0x248   : > { %v2319_v56 = vadd.f32 %v2318_v58, %v2246_v30  ;;  %v2248_v43 = vadd.f32 %v2247_v1, %v8871_v13  ;;  %v7433_v13 = vld [vmem:[#allocation8 + $0x1e4] ss:$8 sps:$4 sm:$0xff]   ;;  %v9011_v58 = vpop.permute.xlu0 %3208  ;;  %v7431_v1 = vld [vmem:[#allocation8 + $0x1e0] ss:$8 sps:$4 sm:$0xff]  }
 0x249   : > { %v2249_v29 = vpop.f32.mrf.mxu0  ;;  %10220 = vst [vmem:[#allocation49_spill] sm:$0xff] %v9011_v58  ;;  %4142 = vmatprep.subr.bf16.mxu0 %v7433_v13 }
 0x24a   : > { %v9006_v54 = vadd.f32 %v2319_v56, %v1499_v59  ;;  %v2321_v6 = vadd.f32 %v2320_v32, %v2248_v43  ;;  %v2250_v48 = vadd.f32 %v2249_v29, %v8877_v10  ;;  %v7436_v32 = vld [vmem:[#allocation8 + $0xf4] ss:$8 sps:$4 sm:$0xff]   ;;  %v7434_v10 = vld [vmem:[#allocation8 + $0xf0] ss:$8 sps:$4 sm:$0xff]   ;;  %v9018_v59 = vpop.permute.xlu1 %1477  ;;  %4143 = vmatpush2.bf16.msra.mxu0 %v7431_v1 }
 0x24b   : > { %v9009_v22 = vpop.f32.mrf.mxu0  ;;  %10222 = vst [vmem:[#allocation51_spill] sm:$0xff] %v9018_v59  ;;  %4067 = vmatprep.subr.bf16.mxu1 %v7436_v32  ;;  %4144 = vmatprep.subr.bf16.mxu0 %v7439_v4 }
 0x24c   : > { %10219 = vst [vmem:[#allocation48_spill] sm:$0xff] %v9006_v54  ;;  %v9015_v62 = vadd.f32 %v2321_v6, %v1500_v47  ;;  %v2323_v30 = vadd.f32 %v8967_v21, %v2250_v48  ;;  %4068 = vmatpush2.bf16.msra.mxu1 %v7434_v10  ;;  %v1503_v21 = vmul.f32 %v9018_v59, %v8922_v39  ;;  %v7442_v6 = vld [vmem:[#allocation8 + $0xe4] ss:$8 sps:$4 sm:$0xff]   ;;  %v2338_v39 = vpop.f32.mrf.mxu1 }
 0x24d   : > { %v2255_v46 = vpop.f32.mrf.mxu0  ;;  %v1504_v48 = vmul.f32 %v9018_v59, %v8927_v25  ;;  %4069 = vmatprep.subr.bf16.mxu1 %v7442_v6 }
 0x24e   : > { %10221 = vst [vmem:[#allocation50_spill] sm:$0xff] %v9015_v62  ;;  %v9020_v56 = vadd.f32 %v2323_v30, %v1501_v42  ;;  %v2256_v43 = vadd.f32 %v2255_v46, %v8897_v8  ;;  %v7440_v8 = vld [vmem:[#allocation8 + $0xe0] ss:$8 sps:$4 sm:$0xff]   ;;  %v9030_v42 = vpop.permute.xlu0 %1482  ;;  %4145 = vmatpush2.bf16.msra.mxu0 %v7437_v5  ;;  %v7451_v5 = vld [vmem:[#allocation8 + $0x1b4] ss:$8 sps:$4 sm:$0xff]   ;;  %v2252_v62 = vadd.f32 %v9009_v22, %v8889_v63 }
 0x24f   : > { %v2257_v14 = vpop.f32.mrf.mxu0  ;;  %10224 = vst [vmem:[#allocation53_spill] sm:$0xff] %v9030_v42  ;;  %v1505_v25 = vmul.f32 %v9030_v42, %v8931_v35  ;;  %v1507_v35 = vmul.f32 %v8959_v31, %v8940_v53  ;;  %v7457_v53 = vld [vmem:[#allocation8 + $0x1a4] ss:$8 sps:$4 sm:$0xff]   ;;  %v10235_v22 = vld [vmem:[#allocation43_spill] sm:$0xff] }
 0x250   : > { %10223 = vst [vmem:[#allocation52_spill] sm:$0xff] %v9020_v56  ;;  %v2329_v47 = vadd.f32 %v2328_v57, %v2256_v43  ;;  %v2258_v29 = vadd.f32 %v2257_v14, %v8909_v17  ;;  %4070 = vmatpush2.bf16.msra.mxu1 %v7440_v8  ;;  %v7445_v17 = vld [vmem:[#allocation8 + $0x1c4] ss:$8 sps:$4 sm:$0xff]   ;;  %v7443_v43 = vld [vmem:[#allocation8 + $0x1c0] ss:$8 sps:$4 sm:$0xff]   ;;  %v1508_v8 = vmul.f32 %v8959_v31, %v8943_v3 }
 0x251   : > { %v2259_v13 = vpop.f32.mrf.mxu0  ;;  %v7448_v14 = vld [vmem:[#allocation8 + $0xd4] ss:$8 sps:$4 sm:$0xff]   ;;  %4146 = vmatprep.subr.bf16.mxu0 %v7445_v17  ;;  %v7455_v3 = vld [vmem:[#allocation8 + $0x1a0] ss:$8 sps:$4 sm:$0xff]   ;;  %v2242_v56 = vadd.f32 %v8988_v38, %v8867_v18 }
 0x252   : > { %v9032_v30 = vadd.f32 %v2329_v47, %v1503_v21  ;;  %v2331_v1 = vadd.f32 %v2330_v44, %v2258_v29  ;;  %v2260_v32 = vadd.f32 %v2259_v13, %v8917_v7  ;;  %v7446_v44 = vld [vmem:[#allocation8 + $0xd0] ss:$8 sps:$4 sm:$0xff]   ;;  %4071 = vmatprep.subr.bf16.mxu1 %v7448_v14  ;;  %4147 = vmatpush2.bf16.msra.mxu0 %v7443_v43  ;;  %v2340_v47 = vpop.f32.mrf.mxu1  ;;  %v7454_v13 = vld [vmem:[#allocation8 + $0xc4] ss:$8 sps:$4 sm:$0xff]   ;;  %v7460_v14 = vld [vmem:[#allocation8 + $0xb4] ss:$8 sps:$4 sm:$0xff]  }
 0x253   : > { %v9035_v57 = vpop.f32.mrf.mxu0  ;;  %4148 = vmatprep.subr.bf16.mxu0 %v7451_v5  ;;  %v7467_v5 = vld [vmem:[#allocation8 + $0x180] ss:$8 sps:$4 sm:$0xff]   ;;  %v2315_v63 = vadd.f32 %v10234_v52, %v2242_v56 }
 0x254   : > { %10225 = vst [vmem:[#allocation54_spill] sm:$0xff] %v9032_v30  ;;  %v9039_v46 = vadd.f32 %v2331_v1, %v1504_v48  ;;  %v2333_v10 = vadd.f32 %v2332_v12, %v2260_v32  ;;  %4072 = vmatpush2.bf16.msra.mxu1 %v7446_v44  ;;  %v7449_v48 = vld [vmem:[#allocation8 + $0x1b0] ss:$8 sps:$4 sm:$0xff]   ;;  %v1380_v30 = vadd.f32 %v8853_v23, %v8873_v2  ;;  %v10233_v18 = vld [vmem:[#allocation17_spill] sm:$0xff] }
 0x255   : > { %v2265_v4 = vpop.f32.mrf.mxu0  ;;  %4073 = vmatprep.subr.bf16.mxu1 %v7454_v13  ;;  %v7476_v13 = vld [vmem:[#allocation8 + $0x80] ss:$8 sps:$4 sm:$0xff]   ;;  %v2262_v58 = vadd.f32 %v9035_v57, %v8929_v20  ;;  %v10123_v38 = vsub.s32 0, %v10233_v18 }
 0x256   : > { %10226 = vst [vmem:[#allocation55_spill] sm:$0xff] %v9039_v46  ;;  %v9041_v21 = vadd.f32 %v2333_v10, %v1505_v25  ;;  %v2266_v7 = vadd.f32 %v2265_v4, %v8936_v60  ;;  %v7452_v60 = vld [vmem:[#allocation8 + $0xc0] ss:$8 sps:$4 sm:$0xff]   ;;  %4149 = vmatpush2.bf16.msra.mxu0 %v7449_v48  ;;  %v2342_v10 = vpop.f32.mrf.mxu1  ;;  %v7458_v4 = vld [vmem:[#allocation8 + $0xb0] ss:$8 sps:$4 sm:$0xff]   ;;  %v1370_v46 = vadd.f32 %v8835_v41, %v8863_v26 }
 0x257   : > { %v2267_v29 = vpop.f32.mrf.mxu0  ;;  %4150 = vmatprep.subr.bf16.mxu0 %v7457_v53  ;;  %v7478_v48 = vld [vmem:[#allocation8 + $0x84] ss:$8 sps:$4 sm:$0xff]   ;;  %v1453_v41 = vadd.f32 %v8969_v28, %v1380_v30  ;;  %v2335_v20 = vadd.f32 %v9023_v27, %v2262_v58 }
 0x258   : > { %10227 = vst [vmem:[#allocation56_spill] sm:$0xff] %v9041_v21  ;;  %v2339_v6 = vadd.f32 %v2338_v39, %v2266_v7  ;;  %v2268_v12 = vadd.f32 %v2267_v29, %v8945_v55  ;;  %4074 = vmatpush2.bf16.msra.mxu1 %v7452_v60  ;;  %v1509_v55 = vmul.f32 %v8955_v37, %v8947_v19  ;;  %v7461_v7 = vld [vmem:[#allocation8 + $0x190] ss:$8 sps:$4 sm:$0xff]   ;;  %v7464_v29 = vld [vmem:[#allocation8 + $0xa0] ss:$8 sps:$4 sm:$0xff]  }
 0x259   : > { %v2269_v1 = vpop.f32.mrf.mxu0  ;;  %4075 = vmatprep.subr.bf16.mxu1 %v7460_v14  ;;  %v7469_v19 = vld [vmem:[#allocation8 + $0x184] ss:$8 sps:$4 sm:$0xff]   ;;  %v1360_v21 = vadd.f32 %v8815_v33, %v8847_v50 }
 0x25a   : > { %v9049_v32 = vadd.f32 %v2339_v6, %v1507_v35  ;;  %v2341_v17 = vadd.f32 %v2340_v47, %v2268_v12  ;;  %v2270_v25 = vadd.f32 %v2269_v1, %v8949_v16  ;;  %4151 = vmatpush2.bf16.msra.mxu0 %v7455_v3  ;;  %v7463_v16 = vld [vmem:[#allocation8 + $0x194] ss:$8 sps:$4 sm:$0xff]   ;;  %v7466_v47 = vld [vmem:[#allocation8 + $0xa4] ss:$8 sps:$4 sm:$0xff]   ;;  %v7470_v6 = vld [vmem:[#allocation8 + $0x90] ss:$8 sps:$4 sm:$0xff]  }
 0x25b   : > { %4152 = vmatprep.subr.bf16.mxu0 %v7463_v16  ;;  %v7472_v35 = vld [vmem:[#allocation8 + $0x94] ss:$8 sps:$4 sm:$0xff]   ;;  %v2271_v1 = vpop.f32.mrf.mxu0  ;;  %v1433_v33 = vadd.f32 %v8913_v0, %v1360_v21  ;;  %v10232_v50 = vld [vmem:[#allocation34_spill] sm:$0xff]  ;;  %v10122_v0 = vsub.s32 1, %v10233_v18 }
 0x25c   : > { %10228 = vst [vmem:[#allocation57_spill] sm:$0xff] %v9049_v32  ;;  %v9054_v39 = vadd.f32 %v2341_v17, %v1508_v8  ;;  %v2343_v43 = vadd.f32 %v2342_v10, %v2270_v25  ;;  %4076 = vmatpush2.bf16.msra.mxu1 %v7458_v4  ;;  %v7475_v12 = vld [vmem:[#allocation8 + $0x374] ss:$8 sps:$4 sm:$0xff]   ;;  %v2344_v25 = vpop.f32.mrf.mxu1  ;;  %v1350_v32 = vadd.f32 %v8803_v24, %v8827_v49 }
 0x25d   : > { %4077 = vmatprep.subr.bf16.mxu1 %v7466_v47  ;;  %v7484_v8 = vld [vmem:[#allocation8 + $0x274] ss:$8 sps:$4 sm:$0xff]   ;;  %v1443_v49 = vadd.f32 %v8933_v61, %v1370_v46  ;;  %v2272_v23 = vadd.f32 %v2271_v1, %v10232_v50  ;;  %v1502_v46 = vmul.f32 %v8994_v45, %v1433_v33  ;;  %v1510_v1 = vmul.f32 %v8955_v37, %v1453_v41 }
 0x25e   : > { %10229 = vst [vmem:[#allocation58_spill] sm:$0xff] %v9054_v39  ;;  %v9056_v44 = vadd.f32 %v2343_v43, %v1509_v55  ;;  %4153 = vmatpush2.bf16.msra.mxu0 %v7461_v7  ;;  %v3079_v53 = vpop.f32.mrf.mxu1  ;;  %v1423_v24 = vadd.f32 %v8893_v36, %v1350_v32  ;;  %v3311_v32 = vld [vmem:[#allocation9] sm:$0x3] }
 0x25f   : > { %4154 = vmatprep.subr.bf16.mxu0 %v7469_v19  ;;  %v1506_v21 = vmul.f32 %v9030_v42, %v1443_v49  ;;  %v2345_v52 = vadd.f32 %v2344_v25, %v2272_v23  ;;  %v9119_v27 = vrot.slane %v3311_v32, %v10123_v38  ;;  %v9127_v33 = vrot.slane %v3311_v32, %v10122_v0  ;;  %v10237_v32 = vld [vmem:[#allocation44_spill] sm:$0xff] }
 0x260   : > { %10230 = vst [vmem:[#allocation59_spill] sm:$0xff] %v9056_v44  ;;  %4078 = vmatpush2.bf16.msra.mxu1 %v7464_v29  ;;  %v3081_v43 = vpop.f32.mrf.mxu1  ;;  %v1498_v61 = vmul.f32 %v8965_v40, %v1423_v24 }
 0x261   : > { %4079 = vmatprep.subr.bf16.mxu1 %v7472_v35  ;;  %v9132_v23 = vadd.f32 %v2345_v52, %v1510_v1 }
 0x262   : > { %4155 = vmatpush2.bf16.msra.mxu0 %v7467_v5  ;;  %v3083_v14 = vpop.f32.mrf.mxu1  ;;  %v2366_v50 = vadd.f32 %v2315_v63, %v1498_v61 }
 0x263   : > { %4903 = vmatprep.subr.bf16.mxu0 %v7475_v12 }
 0x264   : > { %4080 = vmatpush2.bf16.msra.mxu1 %v7470_v6  ;;  %v3085_v16 = vpop.f32.mrf.mxu1 }
 0x265   : > { %4081 = vmatprep.subr.bf16.mxu1 %v7478_v48 }
 0x266   : > { %v3089_v47 = vpop.f32.mrf.mxu1 }
 0x268   : > { %4082 = vmatpush2.bf16.msra.mxu1 %v7476_v13  ;;  %v3091_v19 = vpop.f32.mrf.mxu1 }
 0x269   : > { %4197 = vmatprep.subr.bf16.mxu1 %v7484_v8 }
 0x26a   : > { %v3093_v35 = vpop.f32.mrf.mxu1 }
 0x26c   : > { %v9072_v12 = vpop.f32.mrf.mxu1 }
 0x26e   : > { %v9076_v13 = vpop.f32.mrf.mxu1 }
 0x270   : > { %v3101_v31 = vpop.f32.mrf.mxu1 }
 0x272   : > { %v3103_v11 = vpop.f32.mrf.mxu1 }
 0x274   : > { %v9084_v44 = vpop.f32.mrf.mxu1 }
 0x276   : > { %v3109_v54 = vpop.f32.mrf.mxu1 }
 0x278   : > { %v3111_v57 = vpop.f32.mrf.mxu1 }
 0x27d   : > { %v3006_v60 = vpop.f32.mrf.mxu0 }
 0x27e   : > { %v3080_v2 = vadd.f32 %v3079_v53, %v3006_v60  ;;  %v10236_v60 = vld [vmem:[#allocation40_spill] sm:$0xff] }
 0x27f   : > { %v3008_v17 = vpop.f32.mrf.mxu0 }
 0x280   : > { %v3082_v28 = vadd.f32 %v3081_v43, %v3008_v17  ;;  %v9123_v17 = vadd.f32 %v2335_v20, %v1506_v21  ;;  %v3113_v43 = vpop.f32.mrf.mxu1 }
 0x281   : > { %v3010_v10 = vpop.f32.mrf.mxu0 }
 0x283   : > { %v9058_v55 = vpop.f32.mrf.mxu0 }
 0x285   : > { %v9060_v3 = vpop.f32.mrf.mxu0 }
 0x287   : > { %v9062_v4 = vpop.f32.mrf.mxu0 }
 0x289   : > { %v9064_v7 = vpop.f32.mrf.mxu0 }
 0x28a   : > { %v3094_v63 = vadd.f32 %v3093_v35, %v9064_v7 }
 0x28b   : > { %v9066_v29 = vpop.f32.mrf.mxu0 }
 0x28d   : > { %v9068_v5 = vpop.f32.mrf.mxu0 }
 0x28e   : > { %v3100_v61 = vadd.f32 %v9076_v13, %v9068_v5 }
 0x28f   : > { %v9070_v6 = vpop.f32.mrf.mxu0 }
 0x291   : > { %v9074_v48 = vpop.f32.mrf.mxu0 }
 0x293   : > { %v9078_v8 = vpop.f32.mrf.mxu0 }
 0x295   : > { %v9080_v59 = vpop.f32.mrf.mxu0 }
 0x296   : > { %v9156_v5 = vadd.f32 %v3109_v54, %v9080_v59 }
 0x297   : > { %v9082_v9 = vpop.f32.mrf.mxu0 }
 0x299   : > { %v9086_v39 = vpop.f32.mrf.mxu0 }
 0x29a   : > { %10231 = vst [vmem:[#allocation60_spill] sm:$0xff] %v9086_v39  ;;  %v2325_v39 = vadd.f32 %v10235_v22, %v2252_v62  ;;  %v3084_v62 = vadd.f32 %v3083_v14, %v3010_v10  ;;  %v3086_v10 = vadd.f32 %v3085_v16, %v9058_v55 }
 0x29b   : > { %v3042_v26 = vpop.f32.mrf.mxu0 }
 0x29c   : > { %v9121_v24 = vadd.f32 %v2325_v39, %v1502_v46  ;;  %v3090_v39 = vadd.f32 %v3089_v47, %v9060_v3  ;;  %v3102_v3 = vadd.f32 %v3101_v31, %v9070_v6  ;;  %v3115_v47 = vpop.f32.mrf.mxu1  ;;  %v9159_v31 = vadd.f32 %v3111_v57, %v9082_v9  ;;  %v10240_v46 = vld [vmem:[#allocation47_spill] sm:$0xff] }
 0x29d   : > { %v9164_v13 = vadd.f32 %v3115_v47, %v3042_v26 }
 0x2bd   : > { %v3152_v36 = vpop.f32.mrf.mxu0 }
 0x2be   : > { %v3153_v30 = vadd.f32 %v3152_v36, %v3080_v2  ;;  %v3092_v2 = vadd.f32 %v3091_v19, %v9062_v4  ;;  %v3104_v4 = vadd.f32 %v3103_v11, %v9074_v48 }
 0x2bf   : > { %v3154_v56 = vpop.f32.mrf.mxu0 }
 0x2c0   : > { %v3231_v58 = vmul.f32 %v10236_v60, %v3153_v30  ;;  %v3155_v53 = vadd.f32 %v3154_v56, %v3082_v28  ;;  %v10242_v56 = vld [vmem:[#allocation48_spill] sm:$0xff] }
 0x2c1   : > { %v3156_v25 = vpop.f32.mrf.mxu0 }
 0x2c2   : > { %v3263_v14 = vadd.f32 %v3231_v58, %v8985_v34  ;;  %v3232_v49 = vmul.f32 %v10236_v60, %v3155_v53  ;;  %v3157_v41 = vadd.f32 %v3156_v25, %v3084_v62  ;;  %v3096_v34 = vadd.f32 %v9072_v12, %v9066_v29  ;;  %v10239_v12 = vld [vmem:[#allocation60_spill] sm:$0xff]  ;;  %v10243_v25 = vld [vmem:[#allocation49_spill] sm:$0xff] }
 0x2c3   : > { %v3158_v22 = vpop.f32.mrf.mxu0  ;;  %v9153_v29 = vadd.f32 %v9084_v44, %v9078_v8  ;;  %v9162_v48 = vadd.f32 %v3113_v43, %v10239_v12 }
 0x2c4   : > { %v3323_v20 = vadd.f32 %v9119_v27, %v3263_v14  ;;  %v3264_v36 = vadd.f32 %v3232_v49, %v8992_v15  ;;  %v3233_v55 = vmul.f32 %v10237_v32, %v3157_v41  ;;  %v3159_v16 = vadd.f32 %v3158_v22, %v3086_v10 }
 0x2c5   : > { %v3162_v7 = vpop.f32.mrf.mxu0 }
 0x2c6   : > { %v9146_v19 = vmax.f32 %v3323_v20, 0.0  ;;  %v3324_v35 = vadd.f32 %v9127_v33, %v3264_v36  ;;  %v3265_v15 = vadd.f32 %v3233_v55, %v8996_v51  ;;  %v3234_v28 = vmul.f32 %v10237_v32, %v3159_v16  ;;  %v9188_v36 = vpop.permute.xlu1 %3213  ;;  %v10246_v55 = vld [vmem:[#allocation52_spill] sm:$0xff] }
 0x2c7   : > { %v3163_v11 = vadd.f32 %v3162_v7, %v3090_v39  ;;  %v3164_v6 = vpop.f32.mrf.mxu0  ;;  %10245 = vst [vmem:[#allocation37_spill] sm:$0xff] %v9188_v36 }
 0x2c8   : > { %10238 = vst [vmem:[#allocation34_spill] sm:$0xff] %v9146_v19  ;;  %v9166_v51 = vmax.f32 %v3324_v35, 0.0  ;;  %v3325_v30 = vadd.f32 %v9119_v27, %v3265_v15  ;;  %v3355_v44 = vrot.slane %v9146_v19, 7  ;;  %v3266_v8 = vadd.f32 %v3234_v28, %v2366_v50 }
 0x2c9   : > { %v3235_v54 = vmul.f32 %v10240_v46, %v3163_v11  ;;  %v3165_v59 = vadd.f32 %v3164_v6, %v3092_v2  ;;  %v3166_v21 = vpop.f32.mrf.mxu0  ;;  %v10244_v2 = vld [vmem:[#allocation50_spill] sm:$0xff] }
 0x2ca   : > { %v9172_v57 = vmax.f32 %v3325_v30, 0.0  ;;  %v3167_v1 = vadd.f32 %v3166_v21, %v3094_v63  ;;  %v10124_v52 = vrot.slane %v9166_v51, 7  ;;  %v3326_v26 = vadd.f32 %v9127_v33, %v3266_v8  ;;  %v10247_v6 = vld [vmem:[#allocation18_spill] sm:$0xff] }
 0x2cb   : > { %v3267_v62 = vadd.f32 %v3235_v54, %v10242_v56  ;;  %v3236_v58 = vmul.f32 %v10240_v46, %v3165_v59  ;;  %v3168_v53 = vpop.f32.mrf.mxu0 }
 0x2cc   : > { %10241 = vst [vmem:[#allocation17_spill] sm:$0xff] %v9172_v57  ;;  %v3237_v10 = vmul.f32 %v10243_v25, %v3167_v1  ;;  %v3169_v14 = vadd.f32 %v3168_v53, %v3096_v34  ;;  %v3357_v49 = vrot.slane %v9172_v57, 7  ;;  %v9182_v41 = vmax.f32 %v3326_v26, 0.0 }
 0x2cd   : > { %v3327_v39 = vadd.f32 %v9119_v27, %v3267_v62  ;;  %v3268_v63 = vadd.f32 %v3236_v58, %v10244_v2  ;;  %v3172_v22 = vpop.f32.mrf.mxu0  ;;  %v10249_v58 = vld [vmem:[#allocation54_spill] sm:$0xff] }
 0x2ce   : > { %v3269_v16 = vadd.f32 %v3237_v10, %v10246_v55  ;;  %v3238_v47 = vmul.f32 %v10243_v25, %v3169_v14  ;;  %v3173_v7 = vadd.f32 %v3172_v22, %v3100_v61  ;;  %v3383_v34 = vsel %vm474_vm0, %v3355_v44, %v3357_v49  ;;  %v9230_v22 = vpop.permute.xlu1 %3218 }
 0x2cf   : > { %v9196_v35 = vmax.f32 %v3327_v39, 0.0  ;;  %v3328_v15 = vadd.f32 %v9127_v33, %v3268_v63  ;;  %v3174_v28 = vpop.f32.mrf.mxu0  ;;  %v3358_v11 = vrot.slane %v9182_v41, 7  ;;  %v9201_v12 = vmul.f32 %v3383_v34, %v10247_v6  ;;  %10251 = vst [vmem:[#allocation48_spill] sm:$0xff] %v9230_v22 }
 0x2d0   : > { %v3329_v30 = vadd.f32 %v9119_v27, %v3269_v16  ;;  %v3270_v8 = vadd.f32 %v3238_v47, %v9121_v24  ;;  %v3239_v61 = vmul.f32 %v9188_v36, %v3173_v7  ;;  %v3175_v54 = vadd.f32 %v3174_v28, %v3102_v3  ;;  %v10252_v47 = vld [vmem:[#allocation55_spill] sm:$0xff] }
 0x2d1   : > { %v9206_v59 = vmax.f32 %v3328_v15, 0.0  ;;  %v3176_v21 = vpop.f32.mrf.mxu0  ;;  %v3384_v1 = vsel %vm474_vm0, %v10124_v52, %v3358_v11  ;;  %v9214_v26 = vpack.c.bf16 %v9196_v35, %v9172_v57  ;;  %v3359_v56 = vrot.slane %v9196_v35, 7 }
 0x2d2   : > { %v9217_v62 = vmax.f32 %v3329_v30, 0.0  ;;  %v3330_v24 = vadd.f32 %v9127_v33, %v3270_v8  ;;  %v3271_v3 = vadd.f32 %v3239_v61, %v10249_v58  ;;  %v3240_v53 = vmul.f32 %v9188_v36, %v3175_v54  ;;  %v10254_v58 = vld [vmem:[#allocation20_spill] sm:$0xff] }
 0x2d3   : > { %10248 = vst [vmem:[#allocation43_spill] sm:$0xff] %v9214_v26  ;;  %v3177_v10 = vadd.f32 %v3176_v21, %v3104_v4  ;;  %v3178_v14 = vpop.f32.mrf.mxu0  ;;  %v9224_v39 = vpack.c.bf16 %v9206_v59, %v9182_v41  ;;  %v3360_v2 = vrot.slane %v9206_v59, 7  ;;  %v9228_v63 = vmul.f32 %v3384_v1, %v10247_v6 }
 0x2d4   : > { %v9232_v55 = vmax.f32 %v3330_v24, 0.0  ;;  %v3331_v16 = vadd.f32 %v9119_v27, %v3271_v3  ;;  %v3272_v7 = vadd.f32 %v3240_v53, %v10252_v47  ;;  %v3179_v4 = vadd.f32 %v3178_v14, %v9153_v29  ;;  %v10253_v29 = vld [vmem:[#allocation56_spill] sm:$0xff]  ;;  %v10257_v14 = vld [vmem:[#allocation39_spill] sm:$0xff] }
 0x2d5   : > { %10250 = vst [vmem:[#allocation60_spill] sm:$0xff] %v9224_v39  ;;  %v3241_v34 = vmul.f32 %v9230_v22, %v3177_v10  ;;  %v3182_v15 = vpop.f32.mrf.mxu0  ;;  %v3382_v28 = vsel %vm474_vm0, %v3358_v11, %v3360_v2  ;;  %v3381_v6 = vsel %vm474_vm0, %v3357_v49, %v3359_v56  ;;  %v3361_v30 = vrot.slane %v9217_v62, 7 }
 0x2d6   : > { %v9243_v8 = vmax.f32 %v3331_v16, 0.0  ;;  %v3332_v61 = vadd.f32 %v9127_v33, %v3272_v7  ;;  %v3242_v54 = vmul.f32 %v9230_v22, %v3179_v4  ;;  %v3183_v21 = vadd.f32 %v3182_v15, %v9156_v5  ;;  %v10278_v22 = vld [vmem:[#allocation21_spill] sm:$0xff] }
 0x2d7   : > { %v3273_v1 = vadd.f32 %v3241_v34, %v10253_v29  ;;  %v3184_v24 = vpop.f32.mrf.mxu0  ;;  %v9250_v3 = vmul.f32 %v3382_v28, %v10254_v58  ;;  %v9253_v11 = vmul.f32 %v3381_v6, %v10254_v58  ;;  %v3362_v49 = vrot.slane %v9232_v55, 7  ;;  %v10260_v28 = vld [vmem:[#allocation57_spill] sm:$0xff] }
 0x2d8   : > { %v9256_v53 = vmax.f32 %v3332_v61, 0.0  ;;  %v3274_v10 = vadd.f32 %v3242_v54, %v9123_v17  ;;  %v3243_v16 = vmul.f32 %v10257_v14, %v3183_v21  ;;  %v3185_v47 = vadd.f32 %v3184_v24, %v9159_v31  ;;  %v10262_v24 = vld [vmem:[#allocation22_spill] sm:$0xff] }
 0x2d9   : > { %10255 = vst [vmem:[#allocation50_spill] sm:$0xff] %v9250_v3  ;;  %10256 = vst [vmem:[#allocation52_spill] sm:$0xff] %v9253_v11  ;;  %v3333_v5 = vadd.f32 %v9119_v27, %v3273_v1  ;;  %v3186_v7 = vpop.f32.mrf.mxu0  ;;  %v9264_v4 = vpack.c.bf16 %v9250_v3, %v9228_v63  ;;  %v9268_v34 = vpack.c.bf16 %v9253_v11, %v9201_v12  ;;  %v3408_v42 = vrot.slane %v9206_v59, 1  ;;  %v7496_v11 = vld [vmem:[#allocation8 + $0x254] ss:$8 sps:$4 sm:$0xff]  }
 0x2da   : > { %v3380_v15 = vsel %vm474_vm0, %v3360_v2, %v3362_v49  ;;  %v3334_v17 = vadd.f32 %v9127_v33, %v3274_v10  ;;  %v3275_v6 = vadd.f32 %v3243_v16, %v10260_v28  ;;  %v3244_v31 = vmul.f32 %v10257_v14, %v3185_v47  ;;  %v10263_v16 = vld [vmem:[#allocation58_spill] sm:$0xff] }
 0x2db   : > { %10258 = vst [vmem:[#allocation18_spill] sm:$0xff] %v9264_v4  ;;  %10259 = vst [vmem:[#allocation54_spill] sm:$0xff] %v9268_v34  ;;  %v3187_v61 = vadd.f32 %v3186_v7, %v9162_v48  ;;  %v9276_v54 = vmax.f32 %v3333_v5, 0.0  ;;  %v3188_v21 = vpop.f32.mrf.mxu0  ;;  %v9280_v29 = vpack.c.bf16 %v9256_v53, %v9232_v55  ;;  %v3364_v1 = vrot.slane %v9256_v53, 7  ;;  %v10264_v28 = vld [vmem:[#allocation42_spill] sm:$0xff] }
 0x2dc   : > { %v9284_v58 = vmul.f32 %v3380_v15, %v10262_v24  ;;  %v9286_v2 = vmax.f32 %v3334_v17, 0.0  ;;  %v3335_v10 = vadd.f32 %v9119_v27, %v3275_v6  ;;  %v3276_v47 = vadd.f32 %v3244_v31, %v10263_v16  ;;  %v10265_v6 = vld [vmem:[#allocation59_spill] sm:$0xff] }
 0x2dd   : > { %10261 = vst [vmem:[#allocation55_spill] sm:$0xff] %v9280_v29  ;;  %v3245_v48 = vmul.f32 %v10264_v28, %v3187_v61  ;;  %v3189_v5 = vadd.f32 %v3188_v21, %v9164_v13  ;;  %v3378_v7 = vsel %vm474_vm0, %v3362_v49, %v3364_v1  ;;  %v9296_v0 = vpack.c.bf16 %v9243_v8, %v9217_v62  ;;  %v10266_v31 = vld [vmem:[#allocation23_spill] sm:$0xff] }
 0x2de   : > { %v3363_v15 = vrot.slane %v9243_v8, 7  ;;  %v9299_v38 = vmax.f32 %v3335_v10, 0.0  ;;  %v3336_v17 = vadd.f32 %v9127_v33, %v3276_v47  ;;  %v9304_v16 = vmul.f32 %v3378_v7, %v10266_v31  ;;  %v7473_v14 = vld [vmem:[#allocation8 + $0x370] ss:$8 sps:$4 sm:$0xff]  }
 0x2df   : > { %v3277_v20 = vadd.f32 %v3245_v48, %v10265_v6  ;;  %v3246_v13 = vmul.f32 %v10264_v28, %v3189_v5  ;;  %v3379_v61 = vsel %vm474_vm0, %v3359_v56, %v3361_v30  ;;  %v3366_v21 = vrot.slane %v9286_v2, 7 }
 0x2e0   : > { %10267 = vst [vmem:[#allocation56_spill] sm:$0xff] %v9304_v16  ;;  %v3377_v49 = vsel %vm474_vm0, %v3361_v30, %v3363_v15  ;;  %v3367_v10 = vrot.slane %v9299_v38, 7  ;;  %v9313_v9 = vmax.f32 %v3336_v17, 0.0  ;;  %v9318_v48 = vpack.c.bf16 %v9304_v16, %v9284_v58 }
 0x2e1   : > { %v3337_v47 = vadd.f32 %v9119_v27, %v3277_v20  ;;  %v3278_v5 = vadd.f32 %v3246_v13, %v9132_v23  ;;  %v9322_v7 = vmul.f32 %v3379_v61, %v10262_v24  ;;  %v9325_v6 = vmul.f32 %v3377_v49, %v10266_v31  ;;  %v10270_v20 = vld [vmem:[#allocation24_spill] sm:$0xff] }
 0x2e2   : > { %10268 = vst [vmem:[#allocation20_spill] sm:$0xff] %v9318_v48  ;;  %v3376_v56 = vsel %vm474_vm0, %v3364_v1, %v3366_v21  ;;  %v3368_v17 = vrot.slane %v9313_v9, 7  ;;  %v9334_v27 = vpack.c.bf16 %v9313_v9, %v9286_v2  ;;  %v9346_v1 = vpack.c.bf16 %v9299_v38, %v9276_v54 }
 0x2e3   : > { %10269 = vst [vmem:[#allocation57_spill] sm:$0xff] %v9325_v6  ;;  %v9329_v30 = vmax.f32 %v3337_v47, 0.0  ;;  %v9337_v43 = vmul.f32 %v3376_v56, %v10270_v20  ;;  %v3338_v23 = vadd.f32 %v9127_v33, %v3278_v5  ;;  %v9342_v24 = vpack.c.bf16 %v9325_v6, %v9322_v7  ;;  %v10273_v5 = vld [vmem:[#allocation25_spill] sm:$0xff]  ;;  %v10297_v6 = vld [vmem:[#allocation32_spill] sm:$0xff] }
 0x2e4   : > { %v3365_v31 = vrot.slane %v9276_v54, 7  ;;  %v3374_v33 = vsel %vm474_vm0, %v3366_v21, %v3368_v17  ;;  %v10294_v16 = vrot.slane %v9172_v57, 1 }
 0x2e5   : > { %10271 = vst [vmem:[#allocation22_spill] sm:$0xff] %v9337_v43  ;;  %v3369_v13 = vrot.slane %v9329_v30, 7  ;;  %v9353_v61 = vpack.c.bf16 %v9146_v19, %v9329_v30  ;;  %v9357_v47 = vmax.f32 %v3338_v23, 0.0  ;;  %v9360_v56 = vmul.f32 %v3374_v33, %v10273_v5 }
 0x2e6   : > { %v3373_v50 = vsel %vm474_vm0, %v3365_v31, %v3367_v10  ;;  %v3375_v52 = vsel %vm474_vm0, %v3363_v15, %v3365_v31  ;;  %v10277_v31 = vld [vmem:[#allocation19_spill] sm:$0xff]  ;;  %v10290_v40 = vrot.slane %v9329_v30, 1 }
 0x2e7   : > { %10272 = vst [vmem:[#allocation58_spill] sm:$0xff] %v9353_v61  ;;  %v3371_v49 = vsel %vm474_vm0, %v3367_v10, %v3369_v13  ;;  %v3385_v28 = vsel %vm474_vm0, %v3369_v13, %v3355_v44  ;;  %v9373_v21 = vmul.f32 %v3375_v52, %v10270_v20  ;;  %v9376_v23 = vmul.f32 %v3373_v50, %v10273_v5  ;;  %v7481_v44 = vld [vmem:[#allocation8 + $0x364] ss:$8 sps:$4 sm:$0xff]  }
 0x2e8   : > { %v9380_v33 = vpack.c.bf16 %v9166_v51, %v9357_v47  ;;  %v3370_v15 = vrot.slane %v9357_v47, 7  ;;  %v9384_v10 = vmul.f32 %v3385_v28, %v10277_v31  ;;  %v9387_v36 = vmul.f32 %v3371_v49, %v10278_v22 }
 0x2e9   : > { %10274 = vst [vmem:[#allocation59_spill] sm:$0xff] %v9373_v21  ;;  %10275 = vst [vmem:[#allocation23_spill] sm:$0xff] %v9376_v23  ;;  %v9391_v52 = vpack.c.bf16 %v9360_v56, %v9337_v43  ;;  %v9395_v50 = vpack.c.bf16 %v9376_v23, %v9373_v21  ;;  %v3406_v20 = vrot.slane %v9182_v41, 1  ;;  %v10279_v49 = vrot.slane %v9166_v51, 7 }
 0x2ea   : > { %10276 = vst [vmem:[#allocation24_spill] sm:$0xff] %v9380_v33  ;;  %4156 = vmatprep.mubr.bf16.mxu0 %v9380_v33  ;;  %v3372_v28 = vsel %vm474_vm0, %v3368_v17, %v3370_v15  ;;  %v9408_v25 = vpack.c.bf16 %v9384_v10, %v9387_v36  ;;  %v10281_v17 = vrot.slane %v9166_v51, 1  ;;  %v10283_v60 = vrot.slane %v9357_v47, 1  ;;  %v7490_v33 = vld [vmem:[#allocation8 + $0x264] ss:$8 sps:$4 sm:$0xff]  }
 0x2eb   : > { %v3386_v5 = vsel %vm474_vm0, %v3370_v15, %v10279_v49  ;;  %4157 = vmatmul.mubr.bf16.vlgmr.msra.gmra.mxu0 %v9353_v61  ;;  %v9417_v32 = vmul.f32 %v3372_v28, %v10278_v22  ;;  %v10285_v22 = vld [vmem:[#allocation28_spill] sm:$0xff]  ;;  %v3415_v23 = vrot.slane %v9299_v38, 1 }
 0x2ec   : > { %10280 = vst [vmem:[#allocation25_spill] sm:$0xff] %v9408_v25  ;;  %v9414_v13 = vmul.f32 %v3386_v5, %v10277_v31  ;;  %v3432_v15 = vsel %vm563_vm1, %v10281_v17, %v3406_v20  ;;  %v10282_v49 = vmov %v10281_v17  ;;  %4904 = vmatpush1.bf16.msra.mxu0 %v7473_v14  ;;  %4166 = vmatprep.mubr.bf16.mxu0 %v9224_v39  ;;  %v7479_v31 = vld [vmem:[#allocation8 + $0x360] ss:$8 sps:$4 sm:$0xff]   ;;  %v10284_v5 = vld [vmem:[#allocation26_spill] sm:$0xff]  ;;  %v7487_v61 = vld [vmem:[#allocation8 + $0x354] ss:$8 sps:$4 sm:$0xff]  }
 0x2ed   : > { %v3434_v46 = vsel %vm563_vm1, %v10283_v60, %v10282_v49  ;;  %v9431_v37 = vmul.f32 %v3432_v15, %v10284_v5  ;;  %4905 = vmatprep.subr.bf16.mxu0 %v7481_v44  ;;  %v7482_v60 = vld [vmem:[#allocation8 + $0x270] ss:$8 sps:$4 sm:$0xff]   ;;  %v10287_v15 = vrot.slane %v9172_v57, 1  ;;  %v10288_v49 = vrot.slane %v9146_v19, 1 }
 0x2ee   : > { %v9434_v28 = vmul.f32 %v3434_v46, %v10285_v22  ;;  %v9441_v45 = vpack.c.bf16 %v9414_v13, %v9417_v32  ;;  %v3407_v19 = vrot.slane %v9196_v35, 1  ;;  %v3411_v57 = vrot.slane %v9243_v8, 1 }
 0x2ef   : > { %v3431_v46 = vsel %vm563_vm1, %v10288_v49, %v10287_v15  ;;  %v10289_v17 = vmov %v10288_v49  ;;  %v3410_v15 = vrot.slane %v9232_v55, 1  ;;  %v3430_v49 = vsel %vm563_vm1, %v3406_v20, %v3408_v42  ;;  %v10292_v20 = vld [vmem:[#allocation27_spill] sm:$0xff] }
 0x2f0   : > { %10286 = vst [vmem:[#allocation19_spill] sm:$0xff] %v9441_v45  ;;  %v3433_v44 = vsel %vm563_vm1, %v10290_v40, %v10289_v17  ;;  %v9459_v39 = vpack.c.bf16 %v9431_v37, %v9434_v28  ;;  %v9462_v14 = vmul.f32 %v3431_v46, %v10284_v5  ;;  %4083 = vmatprep.mubr.bf16.mxu1 %v9441_v45  ;;  %v7485_v5 = vld [vmem:[#allocation8 + $0x350] ss:$8 sps:$4 sm:$0xff]   ;;  %v3409_v40 = vrot.slane %v9217_v62, 1  ;;  %v7488_v17 = vld [vmem:[#allocation8 + $0x260] ss:$8 sps:$4 sm:$0xff]  }
 0x2f1   : > { %v9465_v3 = vmul.f32 %v3433_v44, %v10285_v22  ;;  %4906 = vmatpush1.bf16.msra.mxu0 %v7479_v31  ;;  %4084 = vmatmul.mubr.bf16.vlgmr.msra.gmra.mxu1 %v9408_v25  ;;  %v3428_v46 = vsel %vm563_vm1, %v3408_v42, %v3410_v15  ;;  %v9484_v44 = vmul.f32 %v3430_v49, %v10292_v20  ;;  %v7493_v31 = vld [vmem:[#allocation8 + $0x344] ss:$8 sps:$4 sm:$0xff]   ;;  %v3412_v42 = vrot.slane %v9256_v53, 1 }
 0x2f2   : > { %10291 = vst [vmem:[#allocation21_spill] sm:$0xff] %v9462_v14  ;;  %4198 = vmatpush1.bf16.msra.mxu1 %v7482_v60  ;;  %4093 = vmatprep.mubr.bf16.mxu1 %v9264_v4  ;;  %v10293_v45 = vld [vmem:[#allocation30_spill] sm:$0xff]  ;;  %v3429_v43 = vsel %vm563_vm1, %v10294_v16, %v3407_v19  ;;  %v3414_v49 = vrot.slane %v9286_v2, 1  ;;  %v3427_v60 = vsel %vm563_vm1, %v3407_v19, %v3409_v40 }
 0x2f3   : > { %v9479_v22 = vpack.c.bf16 %v9462_v14, %v9465_v3  ;;  %v9489_v25 = vmul.f32 %v3428_v46, %v10293_v45  ;;  %4907 = vmatprep.subr.bf16.mxu0 %v7487_v61  ;;  %4199 = vmatprep.subr.bf16.mxu1 %v7490_v33  ;;  %v9500_v4 = vmul.f32 %v3429_v43, %v10292_v20  ;;  %v7491_v33 = vld [vmem:[#allocation8 + $0x340] ss:$8 sps:$4 sm:$0xff]   ;;  %v7502_v20 = vld [vmem:[#allocation8 + $0x244] ss:$8 sps:$4 sm:$0xff]  }
 0x2f4   : > { %4167 = vmatmul.mubr.bf16.gmra.mxu0 %v9214_v26  ;;  %v9511_v61 = vmul.f32 %v3427_v60, %v10293_v45  ;;  %v3424_v19 = vsel %vm563_vm1, %v3412_v42, %v3414_v49  ;;  %v3426_v43 = vsel %vm563_vm1, %v3410_v15, %v3412_v42  ;;  %v10296_v46 = vld [vmem:[#allocation29_spill] sm:$0xff]  ;;  %v3413_v45 = vrot.slane %v9276_v54, 1  ;;  %v7494_v60 = vld [vmem:[#allocation8 + $0x250] ss:$8 sps:$4 sm:$0xff]  }
 0x2f5   : > { %10295 = vst [vmem:[#allocation26_spill] sm:$0xff] %v9500_v4  ;;  %v9508_v16 = vpack.c.bf16 %v9489_v25, %v9484_v44  ;;  %4908 = vmatpush1.bf16.msra.mxu0 %v7485_v5  ;;  %4176 = vmatprep.mubr.bf16.mxu0 %v9280_v29  ;;  %v9521_v26 = vmul.f32 %v3426_v43, %v10296_v46  ;;  %v3416_v43 = vrot.slane %v9313_v9, 1 }
 0x2f6   : > { %v9524_v21 = vmul.f32 %v3424_v19, %v10297_v6  ;;  %4200 = vmatpush1.bf16.msra.mxu1 %v7488_v17  ;;  %4909 = vmatprep.subr.bf16.mxu0 %v7493_v31  ;;  %v9529_v15 = vpack.c.bf16 %v9511_v61, %v9500_v4  ;;  %v3425_v42 = vsel %vm563_vm1, %v3409_v40, %v3411_v57  ;;  %v7499_v19 = vld [vmem:[#allocation8 + $0x334] ss:$8 sps:$4 sm:$0xff]  }
 0x2f7   : > { %4201 = vmatprep.subr.bf16.mxu1 %v7496_v11  ;;  %v3423_v31 = vsel %vm563_vm1, %v3411_v57, %v3413_v45  ;;  %v9543_v29 = vmul.f32 %v3425_v42, %v10296_v46  ;;  %v10298_v11 = vrot.slane %v9357_v47, 1  ;;  %v3422_v4 = vsel %vm563_vm1, %v3414_v49, %v3416_v43  ;;  %v7497_v46 = vld [vmem:[#allocation8 + $0x330] ss:$8 sps:$4 sm:$0xff]   ;;  %v7500_v49 = vld [vmem:[#allocation8 + $0x240] ss:$8 sps:$4 sm:$0xff]  }
 0x2f8   : > { %v9538_v17 = vpack.c.bf16 %v9524_v21, %v9521_v26  ;;  %v9548_v40 = vmul.f32 %v3423_v31, %v10297_v6  ;;  %v10299_v42 = vld [vmem:[#allocation31_spill] sm:$0xff]  ;;  %v10300_v6 = vld [vmem:[#allocation33_spill] sm:$0xff] }
 0x2f9   : > { %v3420_v14 = vsel %vm563_vm1, %v3416_v43, %v10298_v11  ;;  %4910 = vmatpush1.bf16.msra.mxu0 %v7491_v33  ;;  %4094 = vmatmul.mubr.bf16.gmra.mxu1 %v9268_v34  ;;  %v9560_v5 = vmul.f32 %v3422_v4, %v10299_v42  ;;  %v7505_v43 = vld [vmem:[#allocation8 + $0x324] ss:$8 sps:$4 sm:$0xff]   ;;  %v7508_v57 = vld [vmem:[#allocation8 + $0x234] ss:$8 sps:$4 sm:$0xff]   ;;  %v10301_v11 = vrot.slane %v9329_v30, 1  ;;  %v3421_v34 = vsel %vm563_vm1, %v3413_v45, %v3415_v23 }
 0x2fa   : > { %v9563_v31 = vmul.f32 %v3420_v14, %v10300_v6  ;;  %4202 = vmatpush1.bf16.msra.mxu1 %v7494_v60  ;;  %4103 = vmatprep.mubr.bf16.mxu1 %v9318_v48  ;;  %v9571_v33 = vpack.c.bf16 %v9548_v40, %v9543_v29  ;;  %v9589_v4 = vmul.f32 %v3421_v34, %v10299_v42  ;;  %v7506_v45 = vld [vmem:[#allocation8 + $0x230] ss:$8 sps:$4 sm:$0xff]   ;;  %v7514_v14 = vld [vmem:[#allocation8 + $0x224] ss:$8 sps:$4 sm:$0xff]  }
 0x2fb   : > { %4911 = vmatprep.subr.bf16.mxu0 %v7499_v19  ;;  %4203 = vmatprep.subr.bf16.mxu1 %v7502_v20  ;;  %v3419_v48 = vsel %vm563_vm1, %v3415_v23, %v10301_v11  ;;  %v7503_v11 = vld [vmem:[#allocation8 + $0x320] ss:$8 sps:$4 sm:$0xff]   ;;  %v7511_v23 = vld [vmem:[#allocation8 + $0x314] ss:$8 sps:$4 sm:$0xff]   ;;  %v7526_v34 = vld [vmem:[#allocation8 + $0x204] ss:$8 sps:$4 sm:$0xff]  }
 0x2fc   : > { %v9579_v60 = vpack.c.bf16 %v9563_v31, %v9560_v5  ;;  %4177 = vmatmul.mubr.bf16.gmra.mxu0 %v9296_v0  ;;  %v9592_v20 = vmul.f32 %v3419_v48, %v10300_v6  ;;  %v7509_v48 = vld [vmem:[#allocation8 + $0x310] ss:$8 sps:$4 sm:$0xff]   ;;  %v7512_v6 = vld [vmem:[#allocation8 + $0x220] ss:$8 sps:$4 sm:$0xff]   ;;  %v7544_v19 = vld [vmem:[#allocation8 + $0x2d4] ss:$8 sps:$4 sm:$0xff]  }
 0x2fd   : > { %4912 = vmatpush1.bf16.msra.mxu0 %v7497_v46  ;;  %4186 = vmatprep.mubr.bf16.mxu0 %v9334_v27  ;;  %v7520_v46 = vld [vmem:[#allocation8 + $0x214] ss:$8 sps:$4 sm:$0xff]  }
 0x2fe   : > { %4204 = vmatpush1.bf16.msra.mxu1 %v7500_v49  ;;  %4913 = vmatprep.subr.bf16.mxu0 %v7505_v43  ;;  %v9607_v42 = vpack.c.bf16 %v9592_v20, %v9589_v4  ;;  %v10302_v49 = vpack.c.bf16 %v9228_v63, %v9414_v13  ;;  %v7515_v43 = vld [vmem:[#allocation8 + $0x300] ss:$8 sps:$4 sm:$0xff]   ;;  %v7532_v63 = vld [vmem:[#allocation8 + $0x2f4] ss:$8 sps:$4 sm:$0xff]  }
 0x2ff   : > { %4205 = vmatprep.subr.bf16.mxu1 %v7508_v57  ;;  %v7517_v57 = vld [vmem:[#allocation8 + $0x304] ss:$8 sps:$4 sm:$0xff]   ;;  %v7527_v13 = vld [vmem:[#allocation8 + $0x3e0] ss:$8 sps:$4 sm:$0xff]  }
 0x301   : > { %4914 = vmatpush1.bf16.msra.mxu0 %v7503_v11  ;;  %4104 = vmatmul.mubr.bf16.gmra.mxu1 %v9342_v24  ;;  %v7518_v11 = vld [vmem:[#allocation8 + $0x210] ss:$8 sps:$4 sm:$0xff]  }
 0x302   : > { %4206 = vmatpush1.bf16.msra.mxu1 %v7506_v45  ;;  %4113 = vmatprep.mubr.bf16.mxu1 %v9391_v52  ;;  %v7523_v45 = vld [vmem:[#allocation8 + $0x3f4] ss:$8 sps:$4 sm:$0xff]  }
 0x303   : > { %4915 = vmatprep.subr.bf16.mxu0 %v7511_v23  ;;  %4207 = vmatprep.subr.bf16.mxu1 %v7514_v14  ;;  %v7521_v23 = vld [vmem:[#allocation8 + $0x3f0] ss:$8 sps:$4 sm:$0xff]   ;;  %v7524_v14 = vld [vmem:[#allocation8 + $0x200] ss:$8 sps:$4 sm:$0xff]  }
 0x304   : > { %4187 = vmatmul.mubr.bf16.gmra.mxu0 %v9346_v1 }
 0x305   : > { %4916 = vmatpush1.bf16.msra.mxu0 %v7509_v48  ;;  %4935 = vmatprep.mubr.bf16.mxu0 %v10302_v49  ;;  %v7529_v48 = vld [vmem:[#allocation8 + $0x3e4] ss:$8 sps:$4 sm:$0xff]  }
 0x306   : > { %4208 = vmatpush1.bf16.msra.mxu1 %v7512_v6  ;;  %4917 = vmatprep.subr.bf16.mxu0 %v7517_v57  ;;  %v7530_v6 = vld [vmem:[#allocation8 + $0x2f0] ss:$8 sps:$4 sm:$0xff]   ;;  %v7538_v49 = vld [vmem:[#allocation8 + $0x2e4] ss:$8 sps:$4 sm:$0xff]   ;;  %v7536_v57 = vld [vmem:[#allocation8 + $0x2e0] ss:$8 sps:$4 sm:$0xff]  }
 0x307   : > { %4209 = vmatprep.subr.bf16.mxu1 %v7520_v46  ;;  %v7535_v46 = vld [vmem:[#allocation8 + $0x3d4] ss:$8 sps:$4 sm:$0xff]  }
 0x309   : > { %4918 = vmatpush1.bf16.msra.mxu0 %v7515_v43  ;;  %4114 = vmatmul.mubr.bf16.gmra.mxu1 %v9395_v50  ;;  %v7533_v43 = vld [vmem:[#allocation8 + $0x3d0] ss:$8 sps:$4 sm:$0xff]  }
 0x30a   : > { %4210 = vmatpush1.bf16.msra.mxu1 %v7518_v11  ;;  %4229 = vmatprep.mubr.bf16.mxu1 %v9459_v39  ;;  %v7541_v11 = vld [vmem:[#allocation8 + $0x3c4] ss:$8 sps:$4 sm:$0xff]  }
 0x30b   : > { %4919 = vmatprep.subr.bf16.mxu0 %v7523_v45  ;;  %4211 = vmatprep.subr.bf16.mxu1 %v7526_v34  ;;  %v7539_v45 = vld [vmem:[#allocation8 + $0x3c0] ss:$8 sps:$4 sm:$0xff]   ;;  %v7542_v34 = vld [vmem:[#allocation8 + $0x2d0] ss:$8 sps:$4 sm:$0xff]  }
 0x30d   : > { %4920 = vmatpush2.bf16.msra.mxu0 %v7521_v23  ;;  %v7547_v23 = vld [vmem:[#allocation8 + $0x3b4] ss:$8 sps:$4 sm:$0xff]  }
 0x30e   : > { %4212 = vmatpush1.bf16.msra.mxu1 %v7524_v14  ;;  %4921 = vmatprep.subr.bf16.mxu0 %v7529_v48  ;;  %v7550_v14 = vld [vmem:[#allocation8 + $0x2c4] ss:$8 sps:$4 sm:$0xff]   ;;  %v7545_v48 = vld [vmem:[#allocation8 + $0x3b0] ss:$8 sps:$4 sm:$0xff]  }
 0x30f   : > { %4213 = vmatprep.subr.bf16.mxu1 %v7532_v63  ;;  %v7548_v63 = vld [vmem:[#allocation8 + $0x2c0] ss:$8 sps:$4 sm:$0xff]  }
 0x311   : > { %4922 = vmatpush2.bf16.msra.mxu0 %v7527_v13  ;;  %v7553_v13 = vld [vmem:[#allocation8 + $0x3a4] ss:$8 sps:$4 sm:$0xff]  }
 0x312   : > { %4214 = vmatpush2.bf16.msra.mxu1 %v7530_v6  ;;  %4923 = vmatprep.subr.bf16.mxu0 %v7535_v46  ;;  %v7556_v6 = vld [vmem:[#allocation8 + $0x2b4] ss:$8 sps:$4 sm:$0xff]   ;;  %v7551_v46 = vld [vmem:[#allocation8 + $0x3a0] ss:$8 sps:$4 sm:$0xff]  }
 0x313   : > { %4215 = vmatprep.subr.bf16.mxu1 %v7538_v49  ;;  %v7554_v49 = vld [vmem:[#allocation8 + $0x2b0] ss:$8 sps:$4 sm:$0xff]  }
 0x315   : > { %4924 = vmatpush2.bf16.msra.mxu0 %v7533_v43  ;;  %v7559_v43 = vld [vmem:[#allocation8 + $0x394] ss:$8 sps:$4 sm:$0xff]  }
 0x316   : > { %4216 = vmatpush2.bf16.msra.mxu1 %v7536_v57  ;;  %4925 = vmatprep.subr.bf16.mxu0 %v7541_v11  ;;  %v7562_v57 = vld [vmem:[#allocation8 + $0x2a4] ss:$8 sps:$4 sm:$0xff]   ;;  %v7557_v11 = vld [vmem:[#allocation8 + $0x390] ss:$8 sps:$4 sm:$0xff]  }
 0x317   : > { %4217 = vmatprep.subr.bf16.mxu1 %v7544_v19  ;;  %v7560_v19 = vld [vmem:[#allocation8 + $0x2a0] ss:$8 sps:$4 sm:$0xff]  }
 0x319   : > { %4926 = vmatpush2.bf16.msra.mxu0 %v7539_v45  ;;  %v7565_v45 = vld [vmem:[#allocation8 + $0x384] ss:$8 sps:$4 sm:$0xff]  }
 0x31a   : > { %4218 = vmatpush2.bf16.msra.mxu1 %v7542_v34  ;;  %4927 = vmatprep.subr.bf16.mxu0 %v7547_v23  ;;  %v7568_v34 = vld [vmem:[#allocation8 + $0x294] ss:$8 sps:$4 sm:$0xff]   ;;  %v7563_v23 = vld [vmem:[#allocation8 + $0x380] ss:$8 sps:$4 sm:$0xff]  }
 0x31b   : > { %4219 = vmatprep.subr.bf16.mxu1 %v7550_v14  ;;  %v7566_v14 = vld [vmem:[#allocation8 + $0x290] ss:$8 sps:$4 sm:$0xff]  }
 0x31d   : > { %4928 = vmatpush2.bf16.msra.mxu0 %v7545_v48  ;;  %v7571_v48 = vld [vmem:[#allocation8 + $0x574] ss:$8 sps:$4 sm:$0xff]  }
 0x31e   : > { %4220 = vmatpush2.bf16.msra.mxu1 %v7548_v63  ;;  %4929 = vmatprep.subr.bf16.mxu0 %v7553_v13  ;;  %v7574_v63 = vld [vmem:[#allocation8 + $0x284] ss:$8 sps:$4 sm:$0xff]   ;;  %v7569_v13 = vld [vmem:[#allocation8 + $0x570] ss:$8 sps:$4 sm:$0xff]  }
 0x31f   : > { %4221 = vmatprep.subr.bf16.mxu1 %v7556_v6  ;;  %v7572_v6 = vld [vmem:[#allocation8 + $0x280] ss:$8 sps:$4 sm:$0xff]  }
 0x321   : > { %4930 = vmatpush2.bf16.msra.mxu0 %v7551_v46  ;;  %v7577_v46 = vld [vmem:[#allocation8 + $0x564] ss:$8 sps:$4 sm:$0xff]  }
 0x322   : > { %4222 = vmatpush2.bf16.msra.mxu1 %v7554_v49  ;;  %4931 = vmatprep.subr.bf16.mxu0 %v7559_v43  ;;  %v7580_v49 = vld [vmem:[#allocation8 + $0x474] ss:$8 sps:$4 sm:$0xff]   ;;  %v10303_v43 = vpack.c.bf16 %v9201_v12, %v9384_v10  ;;  %v7584_v12 = vld [vmem:[#allocation8 + $0x460] ss:$8 sps:$4 sm:$0xff]   ;;  %v7589_v10 = vld [vmem:[#allocation8 + $0x544] ss:$8 sps:$4 sm:$0xff]  }
 0x323   : > { %4223 = vmatprep.subr.bf16.mxu1 %v7562_v57  ;;  %v10304_v57 = vld [vmem:[#allocation50_spill] sm:$0xff] }
 0x325   : > { %4932 = vmatpush2.bf16.msra.mxu0 %v7557_v11  ;;  %v10305_v11 = vpack.c.bf16 %v9284_v58, %v10304_v57  ;;  %v7592_v58 = vld [vmem:[#allocation8 + $0x454] ss:$8 sps:$4 sm:$0xff]  }
 0x326   : > { %4224 = vmatpush2.bf16.msra.mxu1 %v7560_v19  ;;  %4933 = vmatprep.subr.bf16.mxu0 %v7565_v45  ;;  %v7575_v19 = vld [vmem:[#allocation8 + $0x560] ss:$8 sps:$4 sm:$0xff]   ;;  %v7578_v45 = vld [vmem:[#allocation8 + $0x470] ss:$8 sps:$4 sm:$0xff]   ;;  %v7595_v57 = vld [vmem:[#allocation8 + $0x534] ss:$8 sps:$4 sm:$0xff]  }
 0x327   : > { %4225 = vmatprep.subr.bf16.mxu1 %v7568_v34  ;;  %v7583_v34 = vld [vmem:[#allocation8 + $0x554] ss:$8 sps:$4 sm:$0xff]  }
 0x329   : > { %4934 = vmatpush2.bf16.msra.mxu0 %v7563_v23  ;;  %v7586_v23 = vld [vmem:[#allocation8 + $0x464] ss:$8 sps:$4 sm:$0xff]  }
 0x32a   : > { %4226 = vmatpush2.bf16.msra.mxu1 %v7566_v14  ;;  %5049 = vmatprep.subr.bf16.mxu0 %v7571_v48  ;;  %v7581_v14 = vld [vmem:[#allocation8 + $0x550] ss:$8 sps:$4 sm:$0xff]   ;;  %v10306_v48 = vld [vmem:[#allocation52_spill] sm:$0xff] }
 0x32b   : > { %4227 = vmatprep.subr.bf16.mxu1 %v7574_v63  ;;  %v10307_v63 = vpack.c.bf16 %v9322_v7, %v10306_v48  ;;  %v7596_v7 = vld [vmem:[#allocation8 + $0x440] ss:$8 sps:$4 sm:$0xff]   ;;  %v7602_v48 = vld [vmem:[#allocation8 + $0x430] ss:$8 sps:$4 sm:$0xff]  }
 0x32c   : > { %4936 = vmatmul.mubr.bf16.vlgmr.msra.gmra.mxu0 %v10303_v43  ;;  %v7590_v43 = vld [vmem:[#allocation8 + $0x450] ss:$8 sps:$4 sm:$0xff]  }
 0x32d   : > { %4945 = vmatprep.mubr.bf16.mxu0 %v10305_v11  ;;  %5050 = vmatpush1.bf16.msra.mxu0 %v7569_v13  ;;  %v10308_v13 = vld [vmem:[#allocation22_spill] sm:$0xff] }
 0x32e   : > { %4228 = vmatpush2.bf16.msra.mxu1 %v7572_v6  ;;  %5051 = vmatprep.subr.bf16.mxu0 %v7577_v46  ;;  %v10309_v6 = vld [vmem:[#allocation56_spill] sm:$0xff]  ;;  %v7598_v11 = vld [vmem:[#allocation8 + $0x444] ss:$8 sps:$4 sm:$0xff]  }
 0x32f   : > { %4976 = vmatprep.subr.bf16.mxu1 %v7580_v49  ;;  %v10310_v46 = vpack.c.bf16 %v10308_v13, %v10309_v6  ;;  %v7587_v49 = vld [vmem:[#allocation8 + $0x540] ss:$8 sps:$4 sm:$0xff]   ;;  %v7610_v13 = vld [vmem:[#allocation8 + $0x424] ss:$8 sps:$4 sm:$0xff]   ;;  %v7605_v6 = vld [vmem:[#allocation8 + $0x510] ss:$8 sps:$4 sm:$0xff]  }
 0x331   : > { %4230 = vmatmul.mubr.bf16.vlgmr.msra.gmra.mxu1 %v9479_v22  ;;  %5052 = vmatpush1.bf16.msra.mxu0 %v7575_v19  ;;  %v7593_v19 = vld [vmem:[#allocation8 + $0x530] ss:$8 sps:$4 sm:$0xff]  }
 0x332   : > { %4239 = vmatprep.mubr.bf16.mxu1 %v9508_v16  ;;  %4977 = vmatpush1.bf16.msra.mxu1 %v7578_v45  ;;  %v7601_v45 = vld [vmem:[#allocation8 + $0x524] ss:$8 sps:$4 sm:$0xff]  }
 0x333   : > { %5053 = vmatprep.subr.bf16.mxu0 %v7583_v34  ;;  %4978 = vmatprep.subr.bf16.mxu1 %v7586_v23  ;;  %v7604_v34 = vld [vmem:[#allocation8 + $0x434] ss:$8 sps:$4 sm:$0xff]  }
 0x334   : > { %4946 = vmatmul.mubr.bf16.gmra.mxu0 %v10307_v63  ;;  %v10311_v23 = vld [vmem:[#allocation59_spill] sm:$0xff] }
 0x335   : > { %4955 = vmatprep.mubr.bf16.mxu0 %v10310_v46  ;;  %5054 = vmatpush1.bf16.msra.mxu0 %v7581_v14  ;;  %v10312_v14 = vld [vmem:[#allocation57_spill] sm:$0xff]  ;;  %v7607_v63 = vld [vmem:[#allocation8 + $0x514] ss:$8 sps:$4 sm:$0xff]  }
 0x336   : > { %4979 = vmatpush1.bf16.msra.mxu1 %v7584_v12  ;;  %5055 = vmatprep.subr.bf16.mxu0 %v7589_v10  ;;  %v10313_v12 = vpack.c.bf16 %v10311_v23, %v10312_v14  ;;  %v10314_v10 = vpack.c.bf16 %v9417_v32, %v9360_v56  ;;  %v7608_v46 = vld [vmem:[#allocation8 + $0x420] ss:$8 sps:$4 sm:$0xff]   ;;  %v7616_v32 = vld [vmem:[#allocation8 + $0x414] ss:$8 sps:$4 sm:$0xff]   ;;  %v7625_v14 = vld [vmem:[#allocation8 + $0x5e4] ss:$8 sps:$4 sm:$0xff]  }
 0x337   : > { %4980 = vmatprep.subr.bf16.mxu1 %v7592_v58  ;;  %v7599_v58 = vld [vmem:[#allocation8 + $0x520] ss:$8 sps:$4 sm:$0xff]   ;;  %v10315_v56 = vld [vmem:[#allocation23_spill] sm:$0xff] }
 0x338   : > { %v7620_v23 = vld [vmem:[#allocation8 + $0x400] ss:$8 sps:$4 sm:$0xff]  }
 0x339   : > { %4240 = vmatmul.mubr.bf16.gmra.mxu1 %v9529_v15  ;;  %5056 = vmatpush1.bf16.msra.mxu0 %v7587_v49  ;;  %v7613_v49 = vld [vmem:[#allocation8 + $0x504] ss:$8 sps:$4 sm:$0xff]  }
 0x33a   : > { %4249 = vmatprep.mubr.bf16.mxu1 %v9538_v17  ;;  %4981 = vmatpush1.bf16.msra.mxu1 %v7590_v43  ;;  %v10316_v43 = vpack.c.bf16 %v9387_v36, %v10315_v56  ;;  %v10318_v36 = vpack.c.bf16 %v9182_v41, %v9166_v51  ;;  %v7637_v51 = vld [vmem:[#allocation8 + $0x5c4] ss:$8 sps:$4 sm:$0xff]   ;;  %v7640_v41 = vld [vmem:[#allocation8 + $0x4d4] ss:$8 sps:$4 sm:$0xff]   ;;  %v7644_v56 = vld [vmem:[#allocation8 + $0x4c0] ss:$8 sps:$4 sm:$0xff]  }
 0x33b   : > { %5057 = vmatprep.subr.bf16.mxu0 %v7595_v57  ;;  %4982 = vmatprep.subr.bf16.mxu1 %v7598_v11  ;;  %v10317_v57 = vpack.c.bf16 %v9484_v44, %v9431_v37  ;;  %v7611_v11 = vld [vmem:[#allocation8 + $0x500] ss:$8 sps:$4 sm:$0xff]   ;;  %v7628_v37 = vld [vmem:[#allocation8 + $0x4f4] ss:$8 sps:$4 sm:$0xff]  }
 0x33c   : > { %4956 = vmatmul.mubr.bf16.gmra.mxu0 %v10313_v12  ;;  %v7623_v44 = vld [vmem:[#allocation8 + $0x5e0] ss:$8 sps:$4 sm:$0xff]   ;;  %v7626_v12 = vld [vmem:[#allocation8 + $0x4f0] ss:$8 sps:$4 sm:$0xff]  }
 0x33d   : > { %4965 = vmatprep.mubr.bf16.mxu0 %v10314_v10  ;;  %5058 = vmatpush1.bf16.msra.mxu0 %v7593_v19  ;;  %v7614_v19 = vld [vmem:[#allocation8 + $0x410] ss:$8 sps:$4 sm:$0xff]   ;;  %v7631_v10 = vld [vmem:[#allocation8 + $0x5d4] ss:$8 sps:$4 sm:$0xff]  }
 0x33e   : > { %4983 = vmatpush1.bf16.msra.mxu1 %v7596_v7  ;;  %5059 = vmatprep.subr.bf16.mxu0 %v7601_v45  ;;  %v7619_v7 = vld [vmem:[#allocation8 + $0x5f4] ss:$8 sps:$4 sm:$0xff]   ;;  %v7622_v45 = vld [vmem:[#allocation8 + $0x404] ss:$8 sps:$4 sm:$0xff]  }
 0x33f   : > { %4984 = vmatprep.subr.bf16.mxu1 %v7604_v34  ;;  %v7617_v34 = vld [vmem:[#allocation8 + $0x5f0] ss:$8 sps:$4 sm:$0xff]  }
 0x341   : > { %4250 = vmatmul.mubr.bf16.gmra.mxu1 %v9571_v33  ;;  %5060 = vmatpush1.bf16.msra.mxu0 %v7599_v58  ;;  %v7634_v58 = vld [vmem:[#allocation8 + $0x4e4] ss:$8 sps:$4 sm:$0xff]  }
 0x342   : > { %4259 = vmatprep.mubr.bf16.mxu1 %v9579_v60  ;;  %4985 = vmatpush1.bf16.msra.mxu1 %v7602_v48  ;;  %v7629_v48 = vld [vmem:[#allocation8 + $0x5d0] ss:$8 sps:$4 sm:$0xff]  }
 0x343   : > { %5061 = vmatprep.subr.bf16.mxu0 %v7607_v63  ;;  %4986 = vmatprep.subr.bf16.mxu1 %v7610_v13  ;;  %v7632_v63 = vld [vmem:[#allocation8 + $0x4e0] ss:$8 sps:$4 sm:$0xff]  }
 0x344   : > { %4966 = vmatmul.mubr.bf16.gmra.mxu0 %v10316_v43  ;;  %v7635_v13 = vld [vmem:[#allocation8 + $0x5c0] ss:$8 sps:$4 sm:$0xff]   ;;  %v7649_v43 = vld [vmem:[#allocation8 + $0x5a4] ss:$8 sps:$4 sm:$0xff]  }
 0x345   : > { %5062 = vmatpush1.bf16.msra.mxu0 %v7605_v6  ;;  %5081 = vmatprep.mubr.bf16.mxu0 %v10317_v57  ;;  %v7638_v6 = vld [vmem:[#allocation8 + $0x4d0] ss:$8 sps:$4 sm:$0xff]   ;;  %v7652_v57 = vld [vmem:[#allocation8 + $0x4b4] ss:$8 sps:$4 sm:$0xff]  }
 0x346   : > { %4987 = vmatpush1.bf16.msra.mxu1 %v7608_v46  ;;  %5063 = vmatprep.subr.bf16.mxu0 %v7613_v49  ;;  %v7643_v46 = vld [vmem:[#allocation8 + $0x5b4] ss:$8 sps:$4 sm:$0xff]   ;;  %v7646_v49 = vld [vmem:[#allocation8 + $0x4c4] ss:$8 sps:$4 sm:$0xff]  }
 0x347   : > { %4988 = vmatprep.subr.bf16.mxu1 %v7616_v32  ;;  %v7641_v32 = vld [vmem:[#allocation8 + $0x5b0] ss:$8 sps:$4 sm:$0xff]  }
 0x349   : > { %4260 = vmatmul.mubr.bf16.gmra.mxu1 %v9607_v42  ;;  %5064 = vmatpush1.bf16.msra.mxu0 %v7611_v11  ;;  %v7647_v11 = vld [vmem:[#allocation8 + $0x5a0] ss:$8 sps:$4 sm:$0xff]  }
 0x34a   : > { %4989 = vmatpush1.bf16.msra.mxu1 %v7614_v19  ;;  %5008 = vmatprep.mubr.bf16.mxu1 %v10318_v36  ;;  %v7650_v19 = vld [vmem:[#allocation8 + $0x4b0] ss:$8 sps:$4 sm:$0xff]   ;;  %v7656_v36 = vld [vmem:[#allocation8 + $0x4a0] ss:$8 sps:$4 sm:$0xff]  }
 0x34b   : > { %5065 = vmatprep.subr.bf16.mxu0 %v7619_v7  ;;  %4990 = vmatprep.subr.bf16.mxu1 %v7622_v45  ;;  %v7655_v7 = vld [vmem:[#allocation8 + $0x594] ss:$8 sps:$4 sm:$0xff]   ;;  %v7658_v45 = vld [vmem:[#allocation8 + $0x4a4] ss:$8 sps:$4 sm:$0xff]  }
 0x34d   : > { %5066 = vmatpush2.bf16.msra.mxu0 %v7617_v34  ;;  %v7653_v34 = vld [vmem:[#allocation8 + $0x590] ss:$8 sps:$4 sm:$0xff]  }
 0x34e   : > { %4991 = vmatpush1.bf16.msra.mxu1 %v7620_v23  ;;  %5067 = vmatprep.subr.bf16.mxu0 %v7625_v14  ;;  %v7661_v23 = vld [vmem:[#allocation8 + $0x584] ss:$8 sps:$4 sm:$0xff]   ;;  %v7664_v14 = vld [vmem:[#allocation8 + $0x494] ss:$8 sps:$4 sm:$0xff]  }
 0x34f   : > { %4992 = vmatprep.subr.bf16.mxu1 %v7628_v37  ;;  %v7659_v37 = vld [vmem:[#allocation8 + $0x580] ss:$8 sps:$4 sm:$0xff]  }
 0x351   : > { %5068 = vmatpush2.bf16.msra.mxu0 %v7623_v44  ;;  %v7662_v44 = vld [vmem:[#allocation8 + $0x490] ss:$8 sps:$4 sm:$0xff]  }
 0x352   : > { %4993 = vmatpush2.bf16.msra.mxu1 %v7626_v12  ;;  %5069 = vmatprep.subr.bf16.mxu0 %v7631_v10  ;;  %v7667_v12 = vld [vmem:[#allocation8 + $0x774] ss:$8 sps:$4 sm:$0xff]   ;;  %v7670_v10 = vld [vmem:[#allocation8 + $0x484] ss:$8 sps:$4 sm:$0xff]  }
 0x353   : > { %4994 = vmatprep.subr.bf16.mxu1 %v7634_v58  ;;  %v7665_v58 = vld [vmem:[#allocation8 + $0x770] ss:$8 sps:$4 sm:$0xff]  }
 0x355   : > { %5070 = vmatpush2.bf16.msra.mxu0 %v7629_v48  ;;  %v7668_v48 = vld [vmem:[#allocation8 + $0x480] ss:$8 sps:$4 sm:$0xff]  }
 0x356   : > { %4995 = vmatpush2.bf16.msra.mxu1 %v7632_v63  ;;  %5071 = vmatprep.subr.bf16.mxu0 %v7637_v51  ;;  %v7673_v63 = vld [vmem:[#allocation8 + $0x764] ss:$8 sps:$4 sm:$0xff]   ;;  %v7676_v51 = vld [vmem:[#allocation8 + $0x674] ss:$8 sps:$4 sm:$0xff]  }
 0x357   : > { %4996 = vmatprep.subr.bf16.mxu1 %v7640_v41  ;;  %v10319_v41 = vld [vmem:[#allocation26_spill] sm:$0xff] }
 0x359   : > { %5072 = vmatpush2.bf16.msra.mxu0 %v7635_v13  ;;  %v10320_v13 = vld [vmem:[#allocation21_spill] sm:$0xff] }
 0x35a   : > { %4997 = vmatpush2.bf16.msra.mxu1 %v7638_v6  ;;  %5073 = vmatprep.subr.bf16.mxu0 %v7643_v46  ;;  %v10321_v6 = vpack.c.bf16 %v10319_v41, %v10320_v13  ;;  %v10322_v46 = vpack.c.bf16 %v9521_v26, %v9489_v25  ;;  %v7680_v25 = vld [vmem:[#allocation8 + $0x660] ss:$8 sps:$4 sm:$0xff]   ;;  %v7685_v26 = vld [vmem:[#allocation8 + $0x744] ss:$8 sps:$4 sm:$0xff]   ;;  %v10337_v13 = vpack.c.bf16 %v9329_v30, %v9299_v38  ;;  %v7725_v38 = vld [vmem:[#allocation8 + $0x7d0] ss:$8 sps:$4 sm:$0xff]  }
 0x35b   : > { %4998 = vmatprep.subr.bf16.mxu1 %v7646_v49  ;;  %v7671_v49 = vld [vmem:[#allocation8 + $0x760] ss:$8 sps:$4 sm:$0xff]  }
 0x35c   : > { %v10336_v41 = vld [vmem:[#allocation60_spill] sm:$0xff] }
 0x35d   : > { %5074 = vmatpush2.bf16.msra.mxu0 %v7641_v32  ;;  %v7674_v32 = vld [vmem:[#allocation8 + $0x670] ss:$8 sps:$4 sm:$0xff]   ;;  %v7728_v30 = vld [vmem:[#allocation8 + $0x6e0] ss:$8 sps:$4 sm:$0xff]  }
 0x35e   : > { %4999 = vmatpush2.bf16.msra.mxu1 %v7644_v56  ;;  %5075 = vmatprep.subr.bf16.mxu0 %v7649_v43  ;;  %v7679_v56 = vld [vmem:[#allocation8 + $0x754] ss:$8 sps:$4 sm:$0xff]   ;;  %v7682_v43 = vld [vmem:[#allocation8 + $0x664] ss:$8 sps:$4 sm:$0xff]  }
 0x35f   : > { %5000 = vmatprep.subr.bf16.mxu1 %v7652_v57  ;;  %v10323_v57 = vld [vmem:[#allocation17_spill] sm:$0xff] }
 0x361   : > { %5076 = vmatpush2.bf16.msra.mxu0 %v7647_v11  ;;  %v10324_v11 = vld [vmem:[#allocation34_spill] sm:$0xff] }
 0x362   : > { %5001 = vmatpush2.bf16.msra.mxu1 %v7650_v19  ;;  %5077 = vmatprep.subr.bf16.mxu0 %v7655_v7  ;;  %v10325_v19 = vpack.c.bf16 %v10323_v57, %v10324_v11  ;;  %v7677_v7 = vld [vmem:[#allocation8 + $0x750] ss:$8 sps:$4 sm:$0xff]   ;;  %v7730_v57 = vld [vmem:[#allocation8 + $0x6e4] ss:$8 sps:$4 sm:$0xff]  }
 0x363   : > { %5002 = vmatprep.subr.bf16.mxu1 %v7658_v45  ;;  %v10326_v45 = vpack.c.bf16 %v9232_v55, %v9206_v59  ;;  %v7686_v59 = vld [vmem:[#allocation8 + $0x650] ss:$8 sps:$4 sm:$0xff]   ;;  %v7691_v55 = vld [vmem:[#allocation8 + $0x734] ss:$8 sps:$4 sm:$0xff]   ;;  %v7733_v11 = vld [vmem:[#allocation8 + $0x7c4] ss:$8 sps:$4 sm:$0xff]  }
 0x365   : > { %5078 = vmatpush2.bf16.msra.mxu0 %v7653_v34  ;;  %v7688_v34 = vld [vmem:[#allocation8 + $0x654] ss:$8 sps:$4 sm:$0xff]  }
 0x366   : > { %5003 = vmatpush2.bf16.msra.mxu1 %v7656_v36  ;;  %5079 = vmatprep.subr.bf16.mxu0 %v7661_v23  ;;  %v10327_v36 = vpack.c.bf16 %v9543_v29, %v9511_v61  ;;  %v10328_v23 = vpack.c.bf16 %v9560_v5, %v9524_v21  ;;  %v10330_v29 = vpack.c.bf16 %v9286_v2, %v9256_v53  ;;  %v7692_v21 = vld [vmem:[#allocation8 + $0x640] ss:$8 sps:$4 sm:$0xff]   ;;  %v7697_v61 = vld [vmem:[#allocation8 + $0x724] ss:$8 sps:$4 sm:$0xff]   ;;  %v7700_v5 = vld [vmem:[#allocation8 + $0x634] ss:$8 sps:$4 sm:$0xff]  }
 0x367   : > { %5004 = vmatprep.subr.bf16.mxu1 %v7664_v14  ;;  %v7683_v14 = vld [vmem:[#allocation8 + $0x740] ss:$8 sps:$4 sm:$0xff]   ;;  %v7698_v53 = vld [vmem:[#allocation8 + $0x630] ss:$8 sps:$4 sm:$0xff]   ;;  %v7703_v2 = vld [vmem:[#allocation8 + $0x714] ss:$8 sps:$4 sm:$0xff]  }
 0x369   : > { %5080 = vmatpush2.bf16.msra.mxu0 %v7659_v37  ;;  %v7694_v37 = vld [vmem:[#allocation8 + $0x644] ss:$8 sps:$4 sm:$0xff]  }
 0x36a   : > { %5005 = vmatpush2.bf16.msra.mxu1 %v7662_v44  ;;  %5820 = vmatprep.subr.bf16.mxu0 %v7667_v12  ;;  %v10329_v44 = vpack.c.bf16 %v9217_v62, %v9196_v35  ;;  %v7689_v12 = vld [vmem:[#allocation8 + $0x730] ss:$8 sps:$4 sm:$0xff]   ;;  %v10332_v35 = vpack.c.bf16 %v9434_v28, %v9563_v31  ;;  %v7695_v62 = vld [vmem:[#allocation8 + $0x720] ss:$8 sps:$4 sm:$0xff]   ;;  %v7709_v31 = vld [vmem:[#allocation8 + $0x704] ss:$8 sps:$4 sm:$0xff]  }
 0x36b   : > { %5006 = vmatprep.subr.bf16.mxu1 %v7670_v10  ;;  %v10331_v10 = vpack.c.bf16 %v9589_v4, %v9548_v40  ;;  %v10334_v40 = vpack.c.bf16 %v9357_v47, %v9313_v9  ;;  %v7704_v28 = vld [vmem:[#allocation8 + $0x620] ss:$8 sps:$4 sm:$0xff]   ;;  %v7712_v4 = vld [vmem:[#allocation8 + $0x614] ss:$8 sps:$4 sm:$0xff]   ;;  %v7718_v47 = vld [vmem:[#allocation8 + $0x604] ss:$8 sps:$4 sm:$0xff]  }
 0x36c   : > { %5082 = vmatmul.mubr.bf16.vlgmr.msra.gmra.mxu0 %v10321_v6  ;;  %v7715_v9 = vld [vmem:[#allocation8 + $0x7f4] ss:$8 sps:$4 sm:$0xff]   ;;  %v7713_v6 = vld [vmem:[#allocation8 + $0x7f0] ss:$8 sps:$4 sm:$0xff]  }
 0x36d   : > { %5091 = vmatprep.mubr.bf16.mxu0 %v10322_v46  ;;  %5821 = vmatpush1.bf16.msra.mxu0 %v7665_v58  ;;  %v7706_v58 = vld [vmem:[#allocation8 + $0x624] ss:$8 sps:$4 sm:$0xff]  }
 0x36e   : > { %5007 = vmatpush2.bf16.msra.mxu1 %v7668_v48  ;;  %5822 = vmatprep.subr.bf16.mxu0 %v7673_v63  ;;  %v10333_v48 = vpack.c.bf16 %v9276_v54, %v9243_v8  ;;  %v7701_v63 = vld [vmem:[#allocation8 + $0x710] ss:$8 sps:$4 sm:$0xff]   ;;  %v7707_v8 = vld [vmem:[#allocation8 + $0x700] ss:$8 sps:$4 sm:$0xff]  }
 0x36f   : > { %5747 = vmatprep.subr.bf16.mxu1 %v7676_v51  ;;  %v10335_v51 = vpack.c.bf16 %v9465_v3, %v9592_v20  ;;  %v7710_v54 = vld [vmem:[#allocation8 + $0x610] ss:$8 sps:$4 sm:$0xff]   ;;  %v7716_v3 = vld [vmem:[#allocation8 + $0x600] ss:$8 sps:$4 sm:$0xff]   ;;  %v7721_v20 = vld [vmem:[#allocation8 + $0x7e4] ss:$8 sps:$4 sm:$0xff]  }
 0x370   : > { %v10338_v46 = vld [vmem:[#allocation18_spill] sm:$0xff] }
 0x371   : > { %5009 = vmatmul.mubr.bf16.vlgmr.msra.gmra.mxu1 %v10325_v19  ;;  %5823 = vmatpush1.bf16.msra.mxu0 %v7671_v49  ;;  %v7724_v49 = vld [vmem:[#allocation8 + $0x6f4] ss:$8 sps:$4 sm:$0xff]  }
 0x372   : > { %5018 = vmatprep.mubr.bf16.mxu1 %v10326_v45  ;;  %5748 = vmatpush1.bf16.msra.mxu1 %v7674_v32  ;;  %v7719_v32 = vld [vmem:[#allocation8 + $0x7e0] ss:$8 sps:$4 sm:$0xff]   ;;  %v7736_v19 = vld [vmem:[#allocation8 + $0x6d4] ss:$8 sps:$4 sm:$0xff]   ;;  %v7734_v45 = vld [vmem:[#allocation8 + $0x6d0] ss:$8 sps:$4 sm:$0xff]  }
 0x373   : > { %5824 = vmatprep.subr.bf16.mxu0 %v7679_v56  ;;  %5749 = vmatprep.subr.bf16.mxu1 %v7682_v43  ;;  %v7722_v56 = vld [vmem:[#allocation8 + $0x6f0] ss:$8 sps:$4 sm:$0xff]   ;;  %v7727_v43 = vld [vmem:[#allocation8 + $0x7d4] ss:$8 sps:$4 sm:$0xff]  }
 0x374   : > { %5092 = vmatmul.mubr.bf16.gmra.mxu0 %v10327_v36  ;;  %v7740_v36 = vld [vmem:[#allocation8 + $0x6c0] ss:$8 sps:$4 sm:$0xff]  }
 0x375   : > { %5101 = vmatprep.mubr.bf16.mxu0 %v10328_v23  ;;  %5825 = vmatpush1.bf16.msra.mxu0 %v7677_v7  ;;  %v7731_v7 = vld [vmem:[#allocation8 + $0x7c0] ss:$8 sps:$4 sm:$0xff]   ;;  %v7745_v23 = vld [vmem:[#allocation8 + $0x7a4] ss:$8 sps:$4 sm:$0xff]  }
 0x376   : > { %5750 = vmatpush1.bf16.msra.mxu1 %v7680_v25  ;;  %5826 = vmatprep.subr.bf16.mxu0 %v7685_v26  ;;  %v7739_v25 = vld [vmem:[#allocation8 + $0x7b4] ss:$8 sps:$4 sm:$0xff]   ;;  %v7742_v26 = vld [vmem:[#allocation8 + $0x6c4] ss:$8 sps:$4 sm:$0xff]  }
 0x377   : > { %5751 = vmatprep.subr.bf16.mxu1 %v7688_v34  ;;  %v7737_v34 = vld [vmem:[#allocation8 + $0x7b0] ss:$8 sps:$4 sm:$0xff]  }
 0x379   : > { %5019 = vmatmul.mubr.bf16.gmra.mxu1 %v10329_v44  ;;  %5827 = vmatpush1.bf16.msra.mxu0 %v7683_v14  ;;  %v7748_v14 = vld [vmem:[#allocation8 + $0x6b4] ss:$8 sps:$4 sm:$0xff]   ;;  %v7754_v44 = vld [vmem:[#allocation8 + $0x6a4] ss:$8 sps:$4 sm:$0xff]  }
 0x37a   : > { %5028 = vmatprep.mubr.bf16.mxu1 %v10330_v29  ;;  %5752 = vmatpush1.bf16.msra.mxu1 %v7686_v59  ;;  %v7743_v59 = vld [vmem:[#allocation8 + $0x7a0] ss:$8 sps:$4 sm:$0xff]  }
 0x37b   : > { %5828 = vmatprep.subr.bf16.mxu0 %v7691_v55  ;;  %5753 = vmatprep.subr.bf16.mxu1 %v7694_v37  ;;  %v7746_v55 = vld [vmem:[#allocation8 + $0x6b0] ss:$8 sps:$4 sm:$0xff]   ;;  %v7751_v37 = vld [vmem:[#allocation8 + $0x794] ss:$8 sps:$4 sm:$0xff]   ;;  %v7752_v29 = vld [vmem:[#allocation8 + $0x6a0] ss:$8 sps:$4 sm:$0xff]  }
 0x37c   : > { %5102 = vmatmul.mubr.bf16.gmra.mxu0 %v10331_v10  ;;  %v7758_v10 = vld [vmem:[#allocation8 + $0x690] ss:$8 sps:$4 sm:$0xff]  }
 0x37d   : > { %5111 = vmatprep.mubr.bf16.mxu0 %v10332_v35  ;;  %5829 = vmatpush1.bf16.msra.mxu0 %v7689_v12  ;;  %v7749_v12 = vld [vmem:[#allocation8 + $0x790] ss:$8 sps:$4 sm:$0xff]   ;;  %v7763_v35 = vld [vmem:[#allocation8 + $0x684] ss:$8 sps:$4 sm:$0xff]  }
 0x37e   : > { %5754 = vmatpush1.bf16.msra.mxu1 %v7692_v21  ;;  %5830 = vmatprep.subr.bf16.mxu0 %v7697_v61  ;;  %v7757_v21 = vld [vmem:[#allocation8 + $0x784] ss:$8 sps:$4 sm:$0xff]   ;;  %v7760_v61 = vld [vmem:[#allocation8 + $0x694] ss:$8 sps:$4 sm:$0xff]  }
 0x37f   : > { %5755 = vmatprep.subr.bf16.mxu1 %v7700_v5  ;;  %v7755_v5 = vld [vmem:[#allocation8 + $0x780] ss:$8 sps:$4 sm:$0xff]  }
 0x381   : > { %5029 = vmatmul.mubr.bf16.gmra.mxu1 %v10333_v48  ;;  %5831 = vmatpush1.bf16.msra.mxu0 %v7695_v62  ;;  %v7761_v62 = vld [vmem:[#allocation8 + $0x680] ss:$8 sps:$4 sm:$0xff]   ;;  %v10340_v48 = vld [vmem:[#allocation55_spill] sm:$0xff] }
 0x382   : > { %5038 = vmatprep.mubr.bf16.mxu1 %v10334_v40  ;;  %5756 = vmatpush1.bf16.msra.mxu1 %v7698_v53  ;;  %v7766_v53 = vld [vmem:[#allocation8 + $0x874] ss:$8 sps:$4 sm:$0xff]   ;;  %v7764_v40 = vld [vmem:[#allocation8 + $0x870] ss:$8 sps:$4 sm:$0xff]  }
 0x383   : > { %5832 = vmatprep.subr.bf16.mxu0 %v7703_v2  ;;  %5757 = vmatprep.subr.bf16.mxu1 %v7706_v58  ;;  %v10339_v2 = vld [vmem:[#allocation43_spill] sm:$0xff] }
 0x384   : > { %5112 = vmatmul.mubr.bf16.gmra.mxu0 %v10335_v51 }
 0x385   : > { %5833 = vmatpush1.bf16.msra.mxu0 %v7701_v63  ;;  %5852 = vmatprep.mubr.bf16.mxu0 %v10336_v41 }
 0x386   : > { %5758 = vmatpush1.bf16.msra.mxu1 %v7704_v28  ;;  %5834 = vmatprep.subr.bf16.mxu0 %v7709_v31  ;;  %v7769_v28 = vld [vmem:[#allocation8 + $0x864] ss:$8 sps:$4 sm:$0xff]  }
 0x387   : > { %5759 = vmatprep.subr.bf16.mxu1 %v7712_v4  ;;  %v10341_v4 = vld [vmem:[#allocation54_spill] sm:$0xff] }
 0x389   : > { %5039 = vmatmul.mubr.bf16.gmra.mxu1 %v10337_v13  ;;  %5835 = vmatpush1.bf16.msra.mxu0 %v7707_v8  ;;  %v10342_v8 = vld [vmem:[#allocation20_spill] sm:$0xff] }
 0x38a   : > { %5760 = vmatpush1.bf16.msra.mxu1 %v7710_v54  ;;  %5779 = vmatprep.mubr.bf16.mxu1 %v10338_v46  ;;  %v7772_v13 = vld [vmem:[#allocation8 + $0x854] ss:$8 sps:$4 sm:$0xff]  }
 0x38b   : > { %5836 = vmatprep.subr.bf16.mxu0 %v7715_v9  ;;  %5761 = vmatprep.subr.bf16.mxu1 %v7718_v47  ;;  %v7767_v9 = vld [vmem:[#allocation8 + $0x860] ss:$8 sps:$4 sm:$0xff]  }
 0x38d   : > { %5837 = vmatpush2.bf16.msra.mxu0 %v7713_v6 }
 0x38e   : > { %5762 = vmatpush1.bf16.msra.mxu1 %v7716_v3  ;;  %5838 = vmatprep.subr.bf16.mxu0 %v7721_v20 }
 0x38f   : > { %5763 = vmatprep.subr.bf16.mxu1 %v7724_v49 }
 0x391   : > { %5839 = vmatpush2.bf16.msra.mxu0 %v7719_v32  ;;  %v7770_v32 = vld [vmem:[#allocation8 + $0x850] ss:$8 sps:$4 sm:$0xff]  }
 0x392   : > { %5764 = vmatpush2.bf16.msra.mxu1 %v7722_v56  ;;  %5840 = vmatprep.subr.bf16.mxu0 %v7727_v43  ;;  %v7775_v43 = vld [vmem:[#allocation8 + $0x844] ss:$8 sps:$4 sm:$0xff]  }
 0x393   : > { %5765 = vmatprep.subr.bf16.mxu1 %v7730_v57 }
 0x395   : > { %5841 = vmatpush2.bf16.msra.mxu0 %v7725_v38 }
 0x396   : > { %5766 = vmatpush2.bf16.msra.mxu1 %v7728_v30  ;;  %5842 = vmatprep.subr.bf16.mxu0 %v7733_v11 }
 0x397   : > { %5767 = vmatprep.subr.bf16.mxu1 %v7736_v19 }
 0x399   : > { %5843 = vmatpush2.bf16.msra.mxu0 %v7731_v7  ;;  %v7778_v7 = vld [vmem:[#allocation8 + $0x834] ss:$8 sps:$4 sm:$0xff]  }
 0x39a   : > { %5768 = vmatpush2.bf16.msra.mxu1 %v7734_v45  ;;  %5844 = vmatprep.subr.bf16.mxu0 %v7739_v25 }
 0x39b   : > { %5769 = vmatprep.subr.bf16.mxu1 %v7742_v26  ;;  %v10343_v26 = vld [vmem:[#allocation24_spill] sm:$0xff] }
 0x39d   : > { %5845 = vmatpush2.bf16.msra.mxu0 %v7737_v34 }
 0x39e   : > { %5770 = vmatpush2.bf16.msra.mxu1 %v7740_v36  ;;  %5846 = vmatprep.subr.bf16.mxu0 %v7745_v23  ;;  %v7776_v23 = vld [vmem:[#allocation8 + $0x830] ss:$8 sps:$4 sm:$0xff]  }
 0x39f   : > { %5771 = vmatprep.subr.bf16.mxu1 %v7748_v14  ;;  %v7781_v14 = vld [vmem:[#allocation8 + $0x824] ss:$8 sps:$4 sm:$0xff]  }
 0x3a1   : > { %5847 = vmatpush2.bf16.msra.mxu0 %v7743_v59 }
 0x3a2   : > { %5772 = vmatpush2.bf16.msra.mxu1 %v7746_v55  ;;  %5848 = vmatprep.subr.bf16.mxu0 %v7751_v37 }
 0x3a3   : > { %5773 = vmatprep.subr.bf16.mxu1 %v7754_v44 }
 0x3a5   : > { %5849 = vmatpush2.bf16.msra.mxu0 %v7749_v12 }
 0x3a6   : > { %5774 = vmatpush2.bf16.msra.mxu1 %v7752_v29  ;;  %5850 = vmatprep.subr.bf16.mxu0 %v7757_v21  ;;  %v7779_v29 = vld [vmem:[#allocation8 + $0x820] ss:$8 sps:$4 sm:$0xff]  }
 0x3a7   : > { %5775 = vmatprep.subr.bf16.mxu1 %v7760_v61  ;;  %v7784_v61 = vld [vmem:[#allocation8 + $0x814] ss:$8 sps:$4 sm:$0xff]  }
 0x3a9   : > { %5851 = vmatpush2.bf16.msra.mxu0 %v7755_v5 }
 0x3aa   : > { %5776 = vmatpush2.bf16.msra.mxu1 %v7758_v10  ;;  %v10345_v10 = vld [vmem:[#allocation58_spill] sm:$0xff] }
 0x3ab   : > { %5777 = vmatprep.subr.bf16.mxu1 %v7763_v35  ;;  %v4158_v58 = vpop.f32.mrf.mxu0 }
 0x3ac   : > { %5853 = vmatmul.mubr.bf16.vlgmr.msra.gmra.mxu0 %v10339_v2 }
 0x3ad   : > { %5862 = vmatprep.mubr.bf16.mxu0 %v10340_v48  ;;  %v4160_v63 = vpop.f32.mrf.mxu0  ;;  %v7787_v48 = vld [vmem:[#allocation8 + $0x804] ss:$8 sps:$4 sm:$0xff]  }
 0x3ae   : > { %5778 = vmatpush2.bf16.msra.mxu1 %v7761_v62 }
 0x3af   : > { %5893 = vmatprep.subr.bf16.mxu1 %v7766_v53  ;;  %v4162_v31 = vpop.f32.mrf.mxu0 }
 0x3b1   : > { %5780 = vmatmul.mubr.bf16.vlgmr.msra.gmra.mxu1 %v10341_v4  ;;  %v4085_v51 = vpop.f32.mrf.mxu1  ;;  %v4164_v54 = vpop.f32.mrf.mxu0  ;;  %v7785_v4 = vld [vmem:[#allocation8 + $0x800] ss:$8 sps:$4 sm:$0xff]  }
 0x3b2   : > { %v9708_v41 = vadd.f32 %v4158_v58, %v4085_v51  ;;  %5789 = vmatprep.mubr.bf16.mxu1 %v10342_v8  ;;  %5894 = vmatpush1.bf16.msra.mxu1 %v7764_v40  ;;  %v10346_v40 = vld [vmem:[#allocation25_spill] sm:$0xff] }
 0x3b3   : > { %v4087_v47 = vpop.f32.mrf.mxu1  ;;  %5895 = vmatprep.subr.bf16.mxu1 %v7769_v28 }
 0x3b4   : > { %v9711_v6 = vadd.f32 %v4160_v63, %v4087_v47  ;;  %5863 = vmatmul.mubr.bf16.gmra.mxu0 %v9296_v0  ;;  %v4168_v46 = vpop.f32.mrf.mxu0 }
 0x3b5   : > { %5872 = vmatprep.mubr.bf16.mxu0 %v9334_v27  ;;  %v4089_v3 = vpop.f32.mrf.mxu1  ;;  %v7773_v27 = vld [vmem:[#allocation8 + $0x840] ss:$8 sps:$4 sm:$0xff]  }
 0x3b6   : > { %v9715_v20 = vadd.f32 %v4162_v31, %v4089_v3  ;;  %5896 = vmatpush1.bf16.msra.mxu1 %v7767_v9  ;;  %v4170_v49 = vpop.f32.mrf.mxu0 }
 0x3b7   : > { %v4091_v56 = vpop.f32.mrf.mxu1  ;;  %5897 = vmatprep.subr.bf16.mxu1 %v7772_v13 }
 0x3b8   : > { %v9717_v57 = vadd.f32 %v4164_v54, %v4091_v56  ;;  %v4172_v38 = vpop.f32.mrf.mxu0  ;;  %v7790_v54 = vld [vmem:[#allocation8 + $0x8f4] ss:$8 sps:$4 sm:$0xff]  }
 0x3b9   : > { %5790 = vmatmul.mubr.bf16.gmra.mxu1 %v9342_v24  ;;  %v4095_v30 = vpop.f32.mrf.mxu1 }
 0x3ba   : > { %v9720_v11 = vadd.f32 %v4168_v46, %v4095_v30  ;;  %5799 = vmatprep.mubr.bf16.mxu1 %v9391_v52  ;;  %5898 = vmatpush1.bf16.msra.mxu1 %v7770_v32  ;;  %v4174_v0 = vpop.f32.mrf.mxu0  ;;  %v7788_v46 = vld [vmem:[#allocation8 + $0x8f0] ss:$8 sps:$4 sm:$0xff]   ;;  %v7793_v32 = vld [vmem:[#allocation8 + $0x8e4] ss:$8 sps:$4 sm:$0xff]  }
 0x3bb   : > { %v4097_v19 = vpop.f32.mrf.mxu1  ;;  %5899 = vmatprep.subr.bf16.mxu1 %v7775_v43  ;;  %v7796_v43 = vld [vmem:[#allocation8 + $0x8d4] ss:$8 sps:$4 sm:$0xff]   ;;  %v7799_v30 = vld [vmem:[#allocation8 + $0x8c4] ss:$8 sps:$4 sm:$0xff]  }
 0x3bc   : > { %v9723_v45 = vadd.f32 %v4170_v49, %v4097_v19  ;;  %5873 = vmatmul.mubr.bf16.gmra.mxu0 %v9346_v1  ;;  %v4178_v25 = vpop.f32.mrf.mxu0  ;;  %v10344_v1 = vld [vmem:[#allocation19_spill] sm:$0xff] }
 0x3bd   : > { %5882 = vmatprep.mubr.bf16.mxu0 %v10343_v26  ;;  %v4099_v34 = vpop.f32.mrf.mxu1  ;;  %v7800_v19 = vld [vmem:[#allocation8 + $0x8b0] ss:$8 sps:$4 sm:$0xff]   ;;  %v7808_v26 = vld [vmem:[#allocation8 + $0x894] ss:$8 sps:$4 sm:$0xff]  }
 0x3be   : > { %v9727_v24 = vadd.f32 %v4172_v38, %v4099_v34  ;;  %5900 = vmatpush1.bf16.msra.mxu1 %v7773_v27  ;;  %v4180_v36 = vpop.f32.mrf.mxu0  ;;  %v7794_v38 = vld [vmem:[#allocation8 + $0x8d0] ss:$8 sps:$4 sm:$0xff]   ;;  %v7802_v27 = vld [vmem:[#allocation8 + $0x8b4] ss:$8 sps:$4 sm:$0xff]  }
 0x3bf   : > { %v4101_v52 = vpop.f32.mrf.mxu1  ;;  %5901 = vmatprep.subr.bf16.mxu1 %v7778_v7  ;;  %v7805_v7 = vld [vmem:[#allocation8 + $0x8a4] ss:$8 sps:$4 sm:$0xff]   ;;  %v7806_v34 = vld [vmem:[#allocation8 + $0x890] ss:$8 sps:$4 sm:$0xff]  }
 0x3c0   : > { %v9729_v59 = vadd.f32 %v4174_v0, %v4101_v52  ;;  %v4182_v55 = vpop.f32.mrf.mxu0  ;;  %v7797_v0 = vld [vmem:[#allocation8 + $0x8c0] ss:$8 sps:$4 sm:$0xff]  }
 0x3c1   : > { %5800 = vmatmul.mubr.bf16.gmra.mxu1 %v9395_v50  ;;  %v4105_v37 = vpop.f32.mrf.mxu1  ;;  %v7782_v50 = vld [vmem:[#allocation8 + $0x810] ss:$8 sps:$4 sm:$0xff]  }
 0x3c2   : > { %v9732_v44 = vadd.f32 %v4178_v25, %v4105_v37  ;;  %5809 = vmatprep.mubr.bf16.mxu1 %v10344_v1  ;;  %5902 = vmatpush1.bf16.msra.mxu1 %v7776_v23  ;;  %v4184_v12 = vpop.f32.mrf.mxu0  ;;  %v7803_v25 = vld [vmem:[#allocation8 + $0x8a0] ss:$8 sps:$4 sm:$0xff]  }
 0x3c3   : > { %v4107_v21 = vpop.f32.mrf.mxu1  ;;  %5903 = vmatprep.subr.bf16.mxu1 %v7781_v14  ;;  %v7809_v23 = vld [vmem:[#allocation8 + $0x880] ss:$8 sps:$4 sm:$0xff]  }
 0x3c4   : > { %v9735_v5 = vadd.f32 %v4180_v36, %v4107_v21  ;;  %5883 = vmatmul.mubr.bf16.gmra.mxu0 %v10345_v10  ;;  %v4188_v35 = vpop.f32.mrf.mxu0  ;;  %v7811_v36 = vld [vmem:[#allocation8 + $0x884] ss:$8 sps:$4 sm:$0xff]  }
 0x3c5   : > { %v4109_v62 = vpop.f32.mrf.mxu1 }
 0x3c6   : > { %v9738_v53 = vadd.f32 %v4182_v55, %v4109_v62  ;;  %5904 = vmatpush1.bf16.msra.mxu1 %v7779_v29  ;;  %v4190_v2 = vpop.f32.mrf.mxu0 }
 0x3c7   : > { %v4111_v58 = vpop.f32.mrf.mxu1  ;;  %5905 = vmatprep.subr.bf16.mxu1 %v7784_v61 }
 0x3c8   : > { %v9740_v63 = vadd.f32 %v4184_v12, %v4111_v58  ;;  %v4192_v51 = vpop.f32.mrf.mxu0 }
 0x3c9   : > { %5810 = vmatmul.mubr.bf16.gmra.mxu1 %v10346_v40  ;;  %v4115_v28 = vpop.f32.mrf.mxu1 }
 0x3ca   : > { %v9743_v31 = vadd.f32 %v4188_v35, %v4115_v28  ;;  %5906 = vmatpush1.bf16.msra.mxu1 %v7782_v50  ;;  %5925 = vmatprep.mubr.bf16.mxu1 %v9508_v16  ;;  %v4194_v3 = vpop.f32.mrf.mxu0  ;;  %v7791_v16 = vld [vmem:[#allocation8 + $0x8e0] ss:$8 sps:$4 sm:$0xff]  }
 0x3cb   : > { %v4117_v8 = vpop.f32.mrf.mxu1  ;;  %5907 = vmatprep.subr.bf16.mxu1 %v7787_v48 }
 0x3cc   : > { %v9746_v9 = vadd.f32 %v4190_v2, %v4117_v8 }
 0x3cd   : > { %v4119_v47 = vpop.f32.mrf.mxu1 }
 0x3ce   : > { %v9748_v13 = vadd.f32 %v4192_v51, %v4119_v47  ;;  %5908 = vmatpush1.bf16.msra.mxu1 %v7785_v4 }
 0x3cf   : > { %v4121_v49 = vpop.f32.mrf.mxu1  ;;  %5909 = vmatprep.subr.bf16.mxu1 %v7790_v54 }
 0x3d0   : > { %v9750_v56 = vadd.f32 %v4194_v3, %v4121_v49 }
 0x3d2   : > { %5910 = vmatpush2.bf16.msra.mxu1 %v7788_v46 }
 0x3d3   : > { %5911 = vmatprep.subr.bf16.mxu1 %v7793_v32 }
 0x3d6   : > { %5912 = vmatpush2.bf16.msra.mxu1 %v7791_v16 }
 0x3d7   : > { %5913 = vmatprep.subr.bf16.mxu1 %v7796_v43 }
 0x3da   : > { %5914 = vmatpush2.bf16.msra.mxu1 %v7794_v38 }
 0x3db   : > { %5915 = vmatprep.subr.bf16.mxu1 %v7799_v30 }
 0x3de   : > { %5916 = vmatpush2.bf16.msra.mxu1 %v7797_v0 }
 0x3df   : > { %5917 = vmatprep.subr.bf16.mxu1 %v7802_v27  ;;  %v10347_v27 = vld [vmem:[#allocation35_spill] sm:$0xff] }
 0x3e2   : > { %5918 = vmatpush2.bf16.msra.mxu1 %v7800_v19 }
 0x3e3   : > { %5919 = vmatprep.subr.bf16.mxu1 %v7805_v7 }
 0x3e6   : > { %5920 = vmatpush2.bf16.msra.mxu1 %v7803_v25 }
 0x3e7   : > { %5921 = vmatprep.subr.bf16.mxu1 %v7808_v26 }
 0x3ea   : > { %5922 = vmatpush2.bf16.msra.mxu1 %v7806_v34 }
 0x3eb   : > { %5923 = vmatprep.subr.bf16.mxu1 %v7811_v36 }
 0x3ec   : > { %v4937_v52 = vpop.f32.mrf.mxu0 }
 0x3ee   : > { %5924 = vmatpush2.bf16.msra.mxu1 %v7809_v23  ;;  %v4939_v55 = vpop.f32.mrf.mxu0 }
 0x3f0   : > { %v4941_v21 = vpop.f32.mrf.mxu0 }
 0x3f1   : > { %v4231_v14 = vpop.f32.mrf.mxu1  ;;  %5926 = vmatmul.mubr.bf16.vlgmr.msra.gmra.mxu1 %v9529_v15 }
 0x3f2   : > { %v4232_v37 = vadd.f32 %v4231_v14, %v9708_v41  ;;  %5935 = vmatprep.mubr.bf16.mxu1 %v9538_v17  ;;  %v4943_v15 = vpop.f32.mrf.mxu0 }
 0x3f3   : > { %v4233_v1 = vpop.f32.mrf.mxu1 }
 0x3f4   : > { %v4234_v12 = vadd.f32 %v4233_v1, %v9711_v6  ;;  %v4270_v19 = vmul.f32 %v4232_v37, %v10347_v27 }
 0x3f5   : > { %v4235_v29 = vpop.f32.mrf.mxu1 }
 0x3f6   : > { %v9757_v61 = vadd.f32 %v4235_v29, %v9715_v20  ;;  %v4947_v20 = vpop.f32.mrf.mxu0  ;;  %v4271_v36 = vmul.f32 %v4234_v12, %v10347_v27 }
 0x3f7   : > { %v4237_v10 = vpop.f32.mrf.mxu1 }
 0x3f8   : > { %v9760_v35 = vadd.f32 %v4237_v10, %v9717_v57 }
 0x3f9   : > { %v4241_v62 = vpop.f32.mrf.mxu1  ;;  %5936 = vmatmul.mubr.bf16.gmra.mxu1 %v9571_v33 }
 0x3fa   : > { %v9764_v41 = vadd.f32 %v4241_v62, %v9720_v11  ;;  %5945 = vmatprep.mubr.bf16.mxu1 %v9579_v60  ;;  %v4949_v11 = vpop.f32.mrf.mxu0  ;;  %v10348_v62 = vld [vmem:[#allocation41_spill] sm:$0xff] }
 0x3fb   : > { %v4243_v17 = vpop.f32.mrf.mxu1 }
 0x3fc   : > { %v9768_v6 = vadd.f32 %v4243_v17, %v9723_v45  ;;  %v4272_v17 = vmul.f32 %v9757_v61, %v10348_v62 }
 0x3fd   : > { %v4245_v50 = vpop.f32.mrf.mxu1 }
 0x3fe   : > { %v9771_v2 = vadd.f32 %v4245_v50, %v9727_v24  ;;  %v4951_v24 = vpop.f32.mrf.mxu0 }
 0x3ff   : > { %v4247_v57 = vpop.f32.mrf.mxu1 }
 0x400   : > { %v9774_v58 = vadd.f32 %v4247_v57, %v9729_v59 }
 0x401   : > { %v4251_v33 = vpop.f32.mrf.mxu1  ;;  %5946 = vmatmul.mubr.bf16.gmra.mxu1 %v9607_v42 }
 0x402   : > { %v9778_v48 = vadd.f32 %v4251_v33, %v9732_v44  ;;  %5955 = vmatprep.mubr.bf16.mxu1 %v9459_v39  ;;  %v4953_v44 = vpop.f32.mrf.mxu0 }
 0x403   : > { %v4253_v60 = vpop.f32.mrf.mxu1 }
 0x404   : > { %v9782_v45 = vadd.f32 %v4253_v60, %v9735_v5  ;;  %v4957_v54 = vpop.f32.mrf.mxu0 }
 0x405   : > { %v4255_v40 = vpop.f32.mrf.mxu1 }
 0x406   : > { %v9785_v28 = vadd.f32 %v4255_v40, %v9738_v53  ;;  %v9803_v46 = vpop.f32.mrf.mxu0 }
 0x407   : > { %v4257_v59 = vpop.f32.mrf.mxu1 }
 0x408   : > { %v9788_v4 = vadd.f32 %v4257_v59, %v9740_v63 }
 0x409   : > { %v4261_v42 = vpop.f32.mrf.mxu1  ;;  %5956 = vmatmul.mubr.bf16.gmra.mxu1 %v9479_v22  ;;  %v9805_v22 = vpop.f32.mrf.mxu0 }
 0x40a   : > { %v9792_v51 = vadd.f32 %v4261_v42, %v9743_v31  ;;  %v10349_v42 = vld [vmem:[#allocation45_spill] sm:$0xff] }
 0x40b   : > { %v4263_v39 = vpop.f32.mrf.mxu1  ;;  %v9807_v3 = vpop.f32.mrf.mxu0 }
 0x40c   : > { %v9795_v5 = vadd.f32 %v4263_v39, %v9746_v9  ;;  %v4274_v39 = vmul.f32 %v9764_v41, %v10349_v42 }
 0x40d   : > { %v4265_v8 = vpop.f32.mrf.mxu1  ;;  %v9809_v31 = vpop.f32.mrf.mxu0 }
 0x40e   : > { %v9798_v53 = vadd.f32 %v4265_v8, %v9748_v13 }
 0x40f   : > { %v4267_v47 = vpop.f32.mrf.mxu1  ;;  %v9811_v49 = vpop.f32.mrf.mxu0 }
 0x410   : > { %v9801_v63 = vadd.f32 %v4267_v47, %v9750_v56 }
 0x411   : > { %v9813_v9 = vpop.f32.mrf.mxu0 }
 0x413   : > { %v9815_v32 = vpop.f32.mrf.mxu0 }
 0x42c   : > { %v5083_v13 = vpop.f32.mrf.mxu0 }
 0x42e   : > { %v5085_v16 = vpop.f32.mrf.mxu0 }
 0x430   : > { %v5087_v43 = vpop.f32.mrf.mxu0 }
 0x431   : > { %v5010_v38 = vpop.f32.mrf.mxu1 }
 0x432   : > { %v5011_v56 = vadd.f32 %v5010_v38, %v4937_v52  ;;  %v5089_v30 = vpop.f32.mrf.mxu0 }
 0x433   : > { %v5012_v0 = vpop.f32.mrf.mxu1 }
 0x434   : > { %v5084_v7 = vadd.f32 %v5083_v13, %v5011_v56  ;;  %v5013_v25 = vadd.f32 %v5012_v0, %v4939_v55  ;;  %v5093_v26 = vpop.f32.mrf.mxu0  ;;  %v4273_v55 = vmul.f32 %v9760_v35, %v10348_v62 }
 0x435   : > { %v5014_v34 = vpop.f32.mrf.mxu1 }
 0x436   : > { %v9819_v23 = vadd.f32 %v5084_v7, %v4270_v19  ;;  %v5086_v14 = vadd.f32 %v5085_v16, %v5013_v25  ;;  %v5015_v1 = vadd.f32 %v5014_v34, %v4941_v21  ;;  %v5095_v29 = vpop.f32.mrf.mxu0  ;;  %v4275_v16 = vmul.f32 %v9768_v6, %v10349_v42 }
 0x437   : > { %v5016_v10 = vpop.f32.mrf.mxu1 }
 0x438   : > { %v9823_v52 = vadd.f32 %v5086_v14, %v4271_v36  ;;  %v5088_v50 = vadd.f32 %v5087_v43, %v5015_v1  ;;  %v5017_v57 = vadd.f32 %v5016_v10, %v4943_v15  ;;  %v5097_v37 = vpop.f32.mrf.mxu0  ;;  %v10351_v14 = vld [vmem:[#allocation51_spill] sm:$0xff] }
 0x439   : > { %v5020_v33 = vpop.f32.mrf.mxu1  ;;  %v4278_v1 = vmul.f32 %v9778_v48, %v10351_v14 }
 0x43a   : > { %v9827_v60 = vadd.f32 %v5088_v50, %v4272_v17  ;;  %v5090_v12 = vadd.f32 %v5089_v30, %v5017_v57  ;;  %v5021_v40 = vadd.f32 %v5020_v33, %v4947_v20  ;;  %v5099_v59 = vpop.f32.mrf.mxu0  ;;  %v10350_v30 = vld [vmem:[#allocation46_spill] sm:$0xff]  ;;  %v4279_v17 = vmul.f32 %v9782_v45, %v10351_v14 }
 0x43b   : > { %v5022_v21 = vpop.f32.mrf.mxu1  ;;  %v4276_v0 = vmul.f32 %v9771_v2, %v10350_v30  ;;  %v4277_v25 = vmul.f32 %v9774_v58, %v10350_v30 }
 0x43c   : > { %v9831_v8 = vadd.f32 %v5090_v12, %v4273_v55  ;;  %v5094_v61 = vadd.f32 %v5093_v26, %v5021_v40  ;;  %v5023_v47 = vadd.f32 %v5022_v21, %v4949_v11  ;;  %v5103_v13 = vpop.f32.mrf.mxu0 }
 0x43d   : > { %v5024_v15 = vpop.f32.mrf.mxu1 }
 0x43e   : > { %v9835_v43 = vadd.f32 %v5094_v61, %v4274_v39  ;;  %v5096_v35 = vadd.f32 %v5095_v29, %v5023_v47  ;;  %v5025_v38 = vadd.f32 %v5024_v15, %v4951_v24  ;;  %v5105_v56 = vpop.f32.mrf.mxu0  ;;  %v10353_v39 = vld [vmem:[#allocation38_spill] sm:$0xff] }
 0x43f   : > { %v5026_v20 = vpop.f32.mrf.mxu1  ;;  %v4282_v61 = vmul.f32 %v9792_v51, %v10353_v39 }
 0x440   : > { %v9839_v27 = vadd.f32 %v5096_v35, %v4275_v16  ;;  %v5098_v41 = vadd.f32 %v5097_v37, %v5025_v38  ;;  %v5027_v19 = vadd.f32 %v5026_v20, %v4953_v44  ;;  %v5107_v7 = vpop.f32.mrf.mxu0  ;;  %v10352_v37 = vld [vmem:[#allocation53_spill] sm:$0xff]  ;;  %v4283_v16 = vmul.f32 %v9795_v5, %v10353_v39 }
 0x441   : > { %v5030_v11 = vpop.f32.mrf.mxu1  ;;  %v4280_v33 = vmul.f32 %v9785_v28, %v10352_v37 }
 0x442   : > { %v9843_v26 = vadd.f32 %v5098_v41, %v4276_v0  ;;  %v5100_v6 = vadd.f32 %v5099_v59, %v5027_v19  ;;  %v5031_v34 = vadd.f32 %v5030_v11, %v4957_v54  ;;  %v5109_v36 = vpop.f32.mrf.mxu0  ;;  %v4281_v59 = vmul.f32 %v9788_v4, %v10352_v37 }
 0x443   : > { %v5032_v24 = vpop.f32.mrf.mxu1 }
 0x444   : > { %v9847_v29 = vadd.f32 %v5100_v6, %v4277_v25  ;;  %v5104_v2 = vadd.f32 %v5103_v13, %v5031_v34  ;;  %v5033_v10 = vadd.f32 %v5032_v24, %v9803_v46  ;;  %v5113_v44 = vpop.f32.mrf.mxu0 }
 0x445   : > { %v5034_v62 = vpop.f32.mrf.mxu1 }
 0x446   : > { %v9852_v58 = vadd.f32 %v5104_v2, %v4278_v1  ;;  %v5106_v50 = vadd.f32 %v5105_v56, %v5033_v10  ;;  %v5035_v54 = vadd.f32 %v5034_v62, %v9805_v22  ;;  %v5115_v46 = vpop.f32.mrf.mxu0  ;;  %v10354_v56 = vld [vmem:[#allocation36_spill] sm:$0xff] }
 0x447   : > { %v5036_v57 = vpop.f32.mrf.mxu1  ;;  %v4284_v20 = vmul.f32 %v9798_v53, %v10354_v56  ;;  %v4285_v41 = vmul.f32 %v9801_v63, %v10354_v56 }
 0x448   : > { %v9857_v48 = vadd.f32 %v5106_v50, %v4279_v17  ;;  %v5108_v55 = vadd.f32 %v5107_v7, %v5035_v54  ;;  %v5037_v12 = vadd.f32 %v5036_v57, %v9807_v3  ;;  %v5117_v3 = vpop.f32.mrf.mxu0 }
 0x449   : > { %v5040_v40 = vpop.f32.mrf.mxu1 }
 0x44a   : > { %v9862_v45 = vadd.f32 %v5108_v55, %v4280_v33  ;;  %v5110_v21 = vadd.f32 %v5109_v36, %v5037_v12  ;;  %v5041_v42 = vadd.f32 %v5040_v40, %v9809_v31 }
 0x44b   : > { %v5042_v22 = vpop.f32.mrf.mxu1 }
 0x44c   : > { %v9867_v28 = vadd.f32 %v5110_v21, %v4281_v59  ;;  %v5114_v47 = vadd.f32 %v5113_v44, %v5041_v42  ;;  %v5043_v13 = vadd.f32 %v5042_v22, %v9811_v49  ;;  %v5119_v49 = vpop.f32.mrf.mxu0  ;;  %v6046_v21 = vld [vmem:[#allocation11] sm:$0x3] }
 0x44d   : > { %v5044_v15 = vpop.f32.mrf.mxu1 }
 0x44e   : > { %v9872_v4 = vadd.f32 %v5114_v47, %v4282_v61  ;;  %v5116_v35 = vadd.f32 %v5115_v46, %v5043_v13  ;;  %v5045_v38 = vadd.f32 %v5044_v15, %v9813_v9  ;;  %v10355_v13 = vld [vmem:[#allocation40_spill] sm:$0xff]  ;;  %v10356_v15 = vsub.s32 0, %v10233_v18 }
 0x44f   : > { %v5046_v31 = vpop.f32.mrf.mxu1 }
 0x450   : > { %v9877_v51 = vadd.f32 %v5116_v35, %v4283_v16  ;;  %v5118_v30 = vadd.f32 %v5117_v3, %v5045_v38  ;;  %v5047_v0 = vadd.f32 %v5046_v31, %v9815_v32  ;;  %v9905_v16 = vrot.slane %v6046_v21, %v10356_v15 }
 0x451   : > { %v10357_v38 = vsub.s32 1, %v10233_v18 }
 0x452   : > { %v9882_v19 = vadd.f32 %v5118_v30, %v4284_v20  ;;  %v5120_v5 = vadd.f32 %v5119_v49, %v5047_v0 }
 0x453   : > { %v9909_v31 = vrot.slane %v6046_v21, %v10357_v38 }
 0x454   : > { %v9884_v7 = vadd.f32 %v5120_v5, %v4285_v41 }
 0x46c   : > { %v5854_v14 = vpop.f32.mrf.mxu0 }
 0x46e   : > { %v5856_v32 = vpop.f32.mrf.mxu0 }
 0x470   : > { %v5858_v63 = vpop.f32.mrf.mxu0 }
 0x471   : > { %v5781_v11 = vpop.f32.mrf.mxu1 }
 0x472   : > { %v5860_v44 = vpop.f32.mrf.mxu0  ;;  %v5855_v46 = vadd.f32 %v5854_v14, %v5781_v11 }
 0x473   : > { %v5783_v9 = vpop.f32.mrf.mxu1 }
 0x474   : > { %v5864_v17 = vpop.f32.mrf.mxu0  ;;  %v5857_v42 = vadd.f32 %v5856_v32, %v5783_v9 }
 0x475   : > { %v5785_v25 = vpop.f32.mrf.mxu1 }
 0x476   : > { %v5866_v54 = vpop.f32.mrf.mxu0  ;;  %v5859_v61 = vadd.f32 %v5858_v63, %v5785_v25  ;;  %v10358_v25 = vld [vmem:[#allocation44_spill] sm:$0xff] }
 0x477   : > { %v5787_v6 = vpop.f32.mrf.mxu1 }
 0x478   : > { %v5868_v37 = vpop.f32.mrf.mxu0  ;;  %v5861_v20 = vadd.f32 %v5860_v44, %v5787_v6 }
 0x479   : > { %v5791_v34 = vpop.f32.mrf.mxu1 }
 0x47a   : > { %v5870_v55 = vpop.f32.mrf.mxu0  ;;  %v5865_v32 = vadd.f32 %v5864_v17, %v5791_v34 }
 0x47b   : > { %v5793_v53 = vpop.f32.mrf.mxu1 }
 0x47c   : > { %v5874_v40 = vpop.f32.mrf.mxu0  ;;  %v5867_v21 = vadd.f32 %v5866_v54, %v5793_v53 }
 0x47d   : > { %v5795_v36 = vpop.f32.mrf.mxu1 }
 0x47e   : > { %v5876_v47 = vpop.f32.mrf.mxu0 }
 0x47f   : > { %v5797_v24 = vpop.f32.mrf.mxu1 }
 0x480   : > { %v9913_v5 = vpop.f32.mrf.mxu0  ;;  %v5871_v15 = vadd.f32 %v5870_v55, %v5797_v24 }
 0x481   : > { %v9886_v1 = vpop.f32.mrf.mxu1 }
 0x483   : > { %v9888_v2 = vpop.f32.mrf.mxu1 }
 0x485   : > { %v9890_v10 = vpop.f32.mrf.mxu1 }
 0x487   : > { %v9892_v62 = vpop.f32.mrf.mxu1 }
 0x489   : > { %v9894_v50 = vpop.f32.mrf.mxu1 }
 0x48b   : > { %v9896_v57 = vpop.f32.mrf.mxu1 }
 0x48d   : > { %v9898_v33 = vpop.f32.mrf.mxu1 }
 0x48f   : > { %v9900_v12 = vpop.f32.mrf.mxu1 }
 0x4b1   : > { %v5927_v59 = vpop.f32.mrf.mxu1 }
 0x4b2   : > { %v5928_v22 = vadd.f32 %v5927_v59, %v5855_v46  ;;  %v7828_v46 = vld [vmem:[%s8262_s28] sm:$0xff] }
 0x4b3   : > { %v5929_v39 = vpop.f32.mrf.mxu1 }
 0x4b4   : > { %v5966_v3 = vmul.f32 %v5928_v22, %v10355_v13  ;;  %v5930_v35 = vadd.f32 %v5929_v39, %v5857_v42  ;;  %v5869_v42 = vadd.f32 %v5868_v37, %v5795_v36  ;;  %v5880_v39 = vpop.f32.mrf.mxu0  ;;  %v7830_v36 = vld [vmem:[%s8262_s28 + $0x10] sm:$0xff] }
 0x4b5   : > { %v5931_v56 = vpop.f32.mrf.mxu1 }
 0x4b6   : > { %v5998_v30 = vadd.f32 %v5966_v3, %v9819_v23  ;;  %v5967_v0 = vmul.f32 %v5930_v35, %v10355_v13  ;;  %v5932_v49 = vadd.f32 %v5931_v56, %v5859_v61  ;;  %v7829_v13 = vld [vmem:[%s8262_s28 + $0x8] sm:$0xff]  ;;  %v10359_v35 = vld [vmem:[#allocation47_spill] sm:$0xff] }
 0x4b7   : > { %v5933_v41 = vpop.f32.mrf.mxu1 }
 0x4b8   : > { %v6058_v11 = vadd.f32 %v9905_v16, %v5998_v30  ;;  %v5999_v9 = vadd.f32 %v5967_v0, %v9823_v52  ;;  %v5968_v14 = vmul.f32 %v5932_v49, %v10358_v25  ;;  %v5934_v18 = vadd.f32 %v5933_v41, %v5861_v20  ;;  %v5884_v0 = vpop.f32.mrf.mxu0  ;;  %v7831_v41 = vld [vmem:[%s8262_s28 + $0x18] sm:$0xff] }
 0x4b9   : > { %v5937_v63 = vpop.f32.mrf.mxu1 }
 0x4ba   : > { %v6074_v6 = vadd.f32 %v7828_v46, %v6058_v11  ;;  %v6059_v23 = vadd.f32 %v9909_v31, %v5999_v9  ;;  %v6000_v44 = vadd.f32 %v5968_v14, %v9827_v60  ;;  %v5969_v59 = vmul.f32 %v5934_v18, %v10358_v25  ;;  %v10360_v9 = vld [vmem:[#allocation49_spill] sm:$0xff] }
 0x4bb   : > { %v5938_v22 = vadd.f32 %v5937_v63, %v5865_v32  ;;  %v5939_v52 = vpop.f32.mrf.mxu1  ;;  %v5877_v18 = vadd.f32 %v5876_v47, %v9888_v2  ;;  %v5886_v2 = vpop.f32.mrf.mxu0 }
 0x4bc   : > { %v6090_v61 = vmax.f32 %v6074_v6, 0.0  ;;  %v6075_v3 = vadd.f32 %v7829_v13, %v6059_v23  ;;  %v6060_v34 = vadd.f32 %v9905_v16, %v6000_v44  ;;  %v6001_v17 = vadd.f32 %v5969_v59, %v9831_v8  ;;  %v7832_v23 = vld [vmem:[%s8262_s28 + $0x20] sm:$0xff]  ;;  %v7833_v13 = vld [vmem:[%s8262_s28 + $0x28] sm:$0xff] }
 0x4bd   : > { %v5970_v38 = vmul.f32 %v5938_v22, %v10359_v35  ;;  %v5940_v60 = vadd.f32 %v5939_v52, %v5867_v21  ;;  %v5941_v56 = vpop.f32.mrf.mxu1  ;;  %v5875_v8 = vadd.f32 %v5874_v40, %v9886_v1 }
 0x4be   : > { %6106 = vst [vmem:[%s9928_s20] sm:$0xff] %v6090_v61  ;;  %v6091_v53 = vmax.f32 %v6075_v3, 0.0  ;;  %v6076_v54 = vadd.f32 %v7830_v36, %v6060_v34  ;;  %v6061_v37 = vadd.f32 %v9909_v31, %v6001_v17  ;;  %v5942_v20 = vadd.f32 %v5941_v56, %v5869_v42  ;;  %v10361_v42 = vld [vmem:[#allocation37_spill] sm:$0xff]  ;;  %v7834_v17 = vld [vmem:[%s8262_s28 + $0x30] sm:$0xff]  ;;  %v5888_v36 = vpop.f32.mrf.mxu0 }
 0x4bf   : > { %v6002_v24 = vadd.f32 %v5970_v38, %v9835_v43  ;;  %v5971_v55 = vmul.f32 %v5940_v60, %v10359_v35  ;;  %v5943_v30 = vpop.f32.mrf.mxu1  ;;  %v5881_v60 = vadd.f32 %v5880_v39, %v9892_v62  ;;  %v5885_v56 = vadd.f32 %v5884_v0, %v9894_v50  ;;  %v10362_v62 = vld [vmem:[#allocation48_spill] sm:$0xff] }
 0x4c0   : > { %6107 = vst [vmem:[%s9928_s20 + $0x8] sm:$0xff] %v6091_v53  ;;  %v6092_v49 = vmax.f32 %v6076_v54, 0.0  ;;  %v6077_v11 = vadd.f32 %v7831_v41, %v6061_v37  ;;  %v5972_v25 = vmul.f32 %v5942_v20, %v10360_v9  ;;  %v5944_v14 = vadd.f32 %v5943_v30, %v5871_v15  ;;  %v7835_v37 = vld [vmem:[%s8262_s28 + $0x38] sm:$0xff]  ;;  %v7836_v0 = vld [vmem:[%s8262_s28 + $0x40] sm:$0xff] }
 0x4c1   : > { %v6062_v32 = vadd.f32 %v9905_v16, %v6002_v24  ;;  %v6003_v1 = vadd.f32 %v5971_v55, %v9839_v27  ;;  %v5947_v43 = vpop.f32.mrf.mxu1  ;;  %v5887_v24 = vadd.f32 %v5886_v2, %v9896_v57  ;;  %v7838_v2 = vld [vmem:[%s8262_s28 + $0x50] sm:$0xff] }
 0x4c2   : > { %6108 = vst [vmem:[%s9928_s20 + $0x10] sm:$0xff] %v6092_v49  ;;  %v6093_v40 = vmax.f32 %v6077_v11, 0.0  ;;  %v6004_v63 = vadd.f32 %v5972_v25, %v9843_v26  ;;  %v5973_v46 = vmul.f32 %v5944_v14, %v10360_v9  ;;  %v5948_v6 = vadd.f32 %v5947_v43, %v5875_v8  ;;  %v5890_v14 = vpop.f32.mrf.mxu0  ;;  %v10363_v43 = vld [vmem:[#allocation39_spill] sm:$0xff] }
 0x4c3   : > { %v6078_v44 = vadd.f32 %v7832_v23, %v6062_v32  ;;  %v6063_v59 = vadd.f32 %v9909_v31, %v6003_v1  ;;  %v5949_v21 = vpop.f32.mrf.mxu1  ;;  %v5879_v26 = vadd.f32 %v9913_v5, %v9890_v10  ;;  %v5889_v9 = vadd.f32 %v5888_v36, %v9898_v33  ;;  %v7837_v32 = vld [vmem:[%s8262_s28 + $0x48] sm:$0xff] }
 0x4c4   : > { %6109 = vst [vmem:[%s9928_s20 + $0x18] sm:$0xff] %v6093_v40  ;;  %v6064_v47 = vadd.f32 %v9905_v16, %v6004_v63  ;;  %v6005_v27 = vadd.f32 %v5973_v46, %v9847_v29  ;;  %v5974_v22 = vmul.f32 %v5948_v6, %v10361_v42  ;;  %v5950_v52 = vadd.f32 %v5949_v21, %v5877_v18 }
 0x4c5   : > { %v6094_v61 = vmax.f32 %v6078_v44, 0.0  ;;  %v6079_v3 = vadd.f32 %v7833_v13, %v6063_v59  ;;  %v5951_v34 = vpop.f32.mrf.mxu1  ;;  %v5891_v46 = vadd.f32 %v5890_v14, %v9900_v12 }
 0x4c6   : > { %v6080_v15 = vadd.f32 %v7834_v17, %v6064_v47  ;;  %v6065_v35 = vadd.f32 %v9909_v31, %v6005_v27  ;;  %v6006_v38 = vadd.f32 %v5974_v22, %v9852_v58  ;;  %v5975_v29 = vmul.f32 %v5950_v52, %v10361_v42  ;;  %v10364_v22 = vld [vmem:[#allocation42_spill] sm:$0xff] }
 0x4c7   : > { %6110 = vst [vmem:[%s9928_s20 + $0x20] sm:$0xff] %v6094_v61  ;;  %v6095_v10 = vmax.f32 %v6079_v3, 0.0  ;;  %v5952_v5 = vadd.f32 %v5951_v34, %v5879_v26  ;;  %v5953_v53 = vpop.f32.mrf.mxu1  ;;  %v7839_v61 = vld [vmem:[%s8262_s28 + $0x58] sm:$0xff]  ;;  %v7840_v3 = vld [vmem:[%s8262_s28 + $0x60] sm:$0xff] }
 0x4c8   : > { %v6096_v54 = vmax.f32 %v6080_v15, 0.0  ;;  %v6081_v20 = vadd.f32 %v7835_v37, %v6065_v35  ;;  %v6066_v8 = vadd.f32 %v9905_v16, %v6006_v38  ;;  %v6007_v58 = vadd.f32 %v5975_v29, %v9857_v48  ;;  %v7841_v29 = vld [vmem:[%s8262_s28 + $0x68] sm:$0xff]  ;;  %v7843_v37 = vld [vmem:[%s8262_s28 + $0x78] sm:$0xff] }
 0x4c9   : > { %6111 = vst [vmem:[%s9928_s20 + $0x28] sm:$0xff] %v6095_v10  ;;  %v5976_v50 = vmul.f32 %v5952_v5, %v10362_v62  ;;  %v5954_v39 = vadd.f32 %v5953_v53, %v5881_v60  ;;  %v5957_v55 = vpop.f32.mrf.mxu1  ;;  %v7842_v5 = vld [vmem:[%s8262_s28 + $0x70] sm:$0xff]  ;;  %s8060_s28 = smov [#allocation12]  }
 0x4ca   : > { %6112 = vst [vmem:[%s9928_s20 + $0x30] sm:$0xff] %v6096_v54  ;;  %v6097_v30 = vmax.f32 %v6081_v20, 0.0  ;;  %v6082_v49 = vadd.f32 %v7836_v0, %v6066_v8  ;;  %v6067_v41 = vadd.f32 %v9909_v31, %v6007_v58  ;;  %v5958_v11 = vadd.f32 %v5957_v55, %v5885_v56  ;;  %s7980_s22 = sshll.u32 %s8060_s28, 4  ;;  %s7981_s22 = int_to_ptr.vmem [resolvable:$false] %s7980_s22 }
 0x4cb   : > { %v6008_v48 = vadd.f32 %v5976_v50, %v9862_v45  ;;  %v5977_v57 = vmul.f32 %v5954_v39, %v10362_v62  ;;  %v5959_v25 = vpop.f32.mrf.mxu1  ;;  %s7982_s23 = scalar_lea.vmem %s7981_s22, 4096  ;;  %p7983_p6 = scmp.lt.s32.totalorder %s10010_s26, %s7981_s22 }
 0x4cc   : > { %6113 = vst [vmem:[%s9928_s20 + $0x38] sm:$0xff] %v6097_v30  ;;  %v6098_v18 = vmax.f32 %v6082_v49, 0.0  ;;  %v6083_v1 = vadd.f32 %v7837_v32, %v6067_v41  ;;  %v5978_v40 = vmul.f32 %v5958_v11, %v10363_v43  ;;  %v5960_v63 = vadd.f32 %v5959_v25, %v5887_v24  ;;  %p7984_p0 = scmp.lt.s32.totalorder %s7982_s23, %s7976_s13 }
 0x4cd   : > { %v6068_v6 = vadd.f32 %v9905_v16, %v6008_v48  ;;  %v6009_v33 = vadd.f32 %v5977_v57, %v9867_v28  ;;  %v5961_v45 = vpop.f32.mrf.mxu1 }
 0x4ce   : > { %6114 = vst [vmem:[%s9928_s20 + $0x40] sm:$0xff] %v6098_v18  ;;  %v6099_v23 = vmax.f32 %v6083_v1, 0.0  ;;  %v6010_v44 = vadd.f32 %v5978_v40, %v9872_v4  ;;  %v5979_v59 = vmul.f32 %v5960_v63, %v10363_v43  ;;  %v5962_v21 = vadd.f32 %v5961_v45, %v5889_v9  ;;  %p7985_p5 = por %p7984_p0, %p7983_p6 }
 0x4cf   : > { %v6084_v47 = vadd.f32 %v7838_v2, %v6068_v6  ;;  %v6069_v27 = vadd.f32 %v9909_v31, %v6009_v33  ;;  %v5963_v12 = vpop.f32.mrf.mxu1 }
 0x4d0   : > { %6115 = vst [vmem:[%s9928_s20 + $0x48] sm:$0xff] %v6099_v23  ;;  %v6070_v28 = vadd.f32 %v9905_v16, %v6010_v44  ;;  %v6011_v42 = vadd.f32 %v5979_v59, %v9877_v51  ;;  %v5980_v52 = vmul.f32 %v5962_v21, %v10364_v22  ;;  %v5964_v26 = vadd.f32 %v5963_v12, %v5891_v46  ;;  %p7986_p10 = pnand %p7985_p5, %p7979_p13 }
 0x4d1   : > { %v6100_v4 = vmax.f32 %v6084_v47, 0.0  ;;  %v6085_v13 = vadd.f32 %v7839_v61, %v6069_v27 }
 0x4d2   : > { %v6086_v34 = vadd.f32 %v7840_v3, %v6070_v28  ;;  %v6071_v17 = vadd.f32 %v9909_v31, %v6011_v42  ;;  %v6012_v15 = vadd.f32 %v5980_v52, %v9882_v19  ;;  %v5981_v35 = vmul.f32 %v5964_v26, %v10364_v22 }
 0x4d3   : > { %6116 = vst [vmem:[%s9928_s20 + $0x50] sm:$0xff] %v6100_v4  ;;  %v6101_v51 = vmax.f32 %v6085_v13, 0.0 }
 0x4d4   : > { %v6102_v38 = vmax.f32 %v6086_v34, 0.0  ;;  %v6087_v60 = vadd.f32 %v7841_v29, %v6071_v17  ;;  %v6072_v56 = vadd.f32 %v9905_v16, %v6012_v15  ;;  %v6013_v10 = vadd.f32 %v5981_v35, %v9884_v7 }
 0x4d5   : > { %6117 = vst [vmem:[%s9928_s20 + $0x58] sm:$0xff] %v6101_v51 }
 0x4d6   : > { %6118 = vst [vmem:[%s9928_s20 + $0x60] sm:$0xff] %v6102_v38  ;;  %v6103_v19 = vmax.f32 %v6087_v60, 0.0  ;;  %v6088_v53 = vadd.f32 %v7842_v5, %v6072_v56  ;;  %v6073_v36 = vadd.f32 %v9909_v31, %v6013_v10 }
 0x4d8   : > { %6119 = vst [vmem:[%s9928_s20 + $0x68] sm:$0xff] %v6103_v19  ;;  %v6104_v54 = vmax.f32 %v6088_v53, 0.0  ;;  %v6089_v20 = vadd.f32 %v7843_v37, %v6073_v36 }
 0x4da   : > { %6120 = vst [vmem:[%s9928_s20 + $0x70] sm:$0xff] %v6104_v54  ;;  %v6105_v7 = vmax.f32 %v6089_v20, 0.0 }
 0x4dc   : > { %6121 = vst [vmem:[%s9928_s20 + $0x78] sm:$0xff] %v6105_v7 }
 0x4dd   : > { %7989 = shalt.err (!%p7986_p10)
}
 0x4de   : > { %s7990_s17 = scalar_lea.hbm %s10008_s25, 2048  ;;  %s7994_s18 = scalar_lea.hbm %s10064_s9, 4096 }
 0x4df   : > { %p7991_p3 = scmp.ne.s32.totalorder %s10008_s25, %s7990_s17  ;;  %p7995_p11 = scmp.lt.s32.totalorder %s10008_s25, %s10064_s9 }
 0x4e0   : > { %p7996_p4 = scmp.lt.s32.totalorder %s7994_s18, %s7990_s17 }
 0x4e1   : > { %p7992_p8 = pnand %p7991_p3, %p10365_p1 }
 0x4e2   : > { %p7997_p7 = por %p7996_p4, %p7995_p11 }
 0x4e3   : > { %p7993_p2 = pneg %p7992_p8 }
 0x4e5   : > { %p7998_p12 = pnand %p7997_p7, %p7993_p2 }
 0x4e7   : > { %8001 = shalt.err (!%p7998_p12)
}
 0x4e8   : > { %s8061_s14 = smov 256   ;;  %s8062_s19 = smov 16  }
 0x4e9   : > { %6870 = dma.vmem_to_hbm [thread:$0]  (%p10365_p1), %s10010_s26, 2048, %s10008_s25, %s6123_s1, %s8061_s14, %s8061_s14, %s8062_s19  }
 0x4ea PF: > { %s6152_s13 = sand.u32 1, %s8036_s30   ;;  %p10366_p9 = scmp.ne.s32.totalorder %s10168_s16, 0 }
 0x4eb   : > { %p10367_p13 = scmp.ge.s32.totalorder %s8048_s12, 2  ;;  %s6153_s28 = scalar_lea.sflag [#allocation5], %s6152_s13 }
 0x4ed   : > { %p6890_p6 = pnand %p10367_p13, %p10366_p9 }
 0x4ef   : > { %p6891_p0 = pneg %p6890_p6 }
 0x4f1   : > { %8031 = dma.done.wait (%p6891_p0), %s6153_s28, 2048  }
 0x4f2   : > { %8033 = vsyncadd (%p6891_p0), %s6153_s28, 4294965248  ;;  %p24_p5 = scmp.ge.s32.totalorder %s8201_s24, 4   ;;  %s10368_s30 = smov %s8040_s10 }
 0x4f3   : > { %s10369_s10 = smov %s8044_s11  ;;  %s10370_s11 = smov %s8217_s21 }
 0x4f4   : > { %s10371_s12 = smov %s8201_s24  ;;  %26 = sbr.rel (!%p24_p5) target bundleno = 11 (0xb), region = 121 }
 0x4f9   :  { %6158 = vsyncpa [#allocation4], 1 }
 0x4fa   :  { %6160 = vsyncpa [#allocation4 + $0x1], 1 }
 0x4fb   :  { %6161 = vsyncpa [#allocation7], 1 }
 0x4fc   :  { %6162 = vsyncpa [#allocation10], 1 }
 0x4fd   :  { %6163 = vsyncpa [#allocation5], 1 }
 0x4fe   :  { %6165 = vsyncpa [#allocation5 + $0x1], 1 }

</bundles_post_ra>
